<compile_context>
chip_gen: v7x
topology: tpu7x:2x2x1
jax: 0.10.0
libtpu: 0.0.40
codegen_flags: <defaults>
</compile_context>

<pallas_src>
import jax
import jax.numpy as jnp
from jax import lax
from jax.experimental import pallas as pl
from jax.experimental.pallas import tpu as pltpu

# ----- small, self-consistent model dims (stand-ins for BERT-base sizes) -----
H = 32              # bert hidden_size (stand-in for 768)
NH = 4              # attention heads
DH = H // NH        # head dim
FF = 64             # FFN intermediate
NLAYERS = 2         # transformer layers
BERT_VOCAB = 100    # wordpiece vocab (synthetic)
MAX_POS = 64
ENTITY_NUM = 10
VOCAB_TAGS = 16     # `vocab_size` = number of NER tags (output of self.fc)
LSTM_H = H // 2     # LSTM hidden_size = hidden_dim // 2 (bidirectional -> 2*LSTM_H = H)
LSTM_LAYERS = 2

# ----- packed embedding-table slab row offsets (all 8-aligned) -----
WORD_OFF = 0
ENT_OFF = 104
POS_OFF = 120
EMB_TAB_ROWS = POS_OFF + MAX_POS          # 184

# ----- packed (rows, 128) const slab row offsets -----
EMB_LN_ROW = 0                            # rows 0,1 : embedding LN gamma, beta
LAYER_ROW = 2                             # 8 rows per encoder layer:
#   +0 bqkv(96) +1 attn_out_bias(32) +2 ln1_g +3 ln1_b +4 b1(64) +5 ffn_out_bias +6 ln2_g +7 ln2_b
LSTMB_ROW = LAYER_ROW + 8 * NLAYERS       # 18,19 : per-LSTM-layer [b_fwd | b_bwd] (128)
FCB_ROW = LSTMB_ROW + LSTM_LAYERS         # 20    : fc bias (16)
FCW_ROW = 24                              # 24..55: fc weight rows (H rows, lanes 0:VOCAB_TAGS)
CONST_ROWS = FCW_ROW + H                  # 56


# ---------------------------------------------------------------------------
# in-kernel helpers
# ---------------------------------------------------------------------------
def _ln(x, g, b, eps=1e-12):
    mu = jnp.mean(x, axis=-1, keepdims=True)
    var = jnp.mean((x - mu) ** 2, axis=-1, keepdims=True)
    return (x - mu) * lax.rsqrt(var + eps) * g + b


# ---------------------------------------------------------------------------
# the single fused kernel
# ---------------------------------------------------------------------------
def net_kernel(ids_ref, ids_col_ref, ent_col_ref, emb_tab_ref,
               wqkv_ref, wo_ref, w1_ref, w2_ref, lstm_w_ref, const_ref,
               logits_ref, yhat_ref):
    N, T = ids_ref.shape
    NT = N * T
    L = wqkv_ref.shape[0]
    scale = 1.0 / (DH ** 0.5)
    f32 = jnp.float32

    def crow(r, w):                                   # one packed const row, first w lanes
        return const_ref[r:r + 1, 0:w]

    # ------------- BERT embeddings: in-kernel "gather" via one-hot MXU matmuls -------------
    wid_oh = (ids_col_ref[...] ==
              lax.broadcasted_iota(jnp.int32, (NT, BERT_VOCAB), 1)).astype(f32)   # (NT, V_w)
    eid_oh = (ent_col_ref[...] ==
              lax.broadcasted_iota(jnp.int32, (NT, ENTITY_NUM), 1)).astype(f32)   # (NT, V_e)
    word_tab = emb_tab_ref[WORD_OFF:WORD_OFF + BERT_VOCAB, :]                      # (100, H)
    ent_tab = emb_tab_ref[ENT_OFF:ENT_OFF + ENTITY_NUM, :]                         # (10, H)
    pos_type = emb_tab_ref[POS_OFF:POS_OFF + T, :]                                 # (T, H) pos+type
    x2 = (jnp.dot(wid_oh, word_tab, preferred_element_type=f32)
          + jnp.dot(eid_oh, ent_tab, preferred_element_type=f32)
          + jnp.tile(pos_type, (N, 1)))                                            # (NT, H)
    x2 = _ln(x2, crow(EMB_LN_ROW, H), crow(EMB_LN_ROW + 1, H))

    # additive key mask, hoisted out of all loops; batch order of attention is (head, batch)
    key_mask = jnp.where(ids_ref[...] > 0, 0.0, -1e4).astype(f32)                  # (N, T)
    mask_b = jnp.concatenate([key_mask[:, None, :]] * NH, axis=0)                  # (NH*N, 1, T)

    # ---------------- BERT encoder layers (statically unrolled) --------------------
    for l in range(L):
        base = LAYER_ROW + 8 * l

        # fused QKV projection over all N*T rows
        qkv = jnp.dot(x2, wqkv_ref[l], preferred_element_type=f32) + crow(base + 0, 3 * H)
        q3 = qkv[:, 0:H].reshape(N, T, H)
        k3 = qkv[:, H:2 * H].reshape(N, T, H)
        v3 = qkv[:, 2 * H:3 * H].reshape(N, T, H)

        # head-batched attention: batch index b = h*N + n
        q_b = jnp.concatenate([q3[:, :, h * DH:(h + 1) * DH] for h in range(NH)], axis=0)
        k_b = jnp.concatenate([k3[:, :, h * DH:(h + 1) * DH] for h in range(NH)], axis=0)
        v_b = jnp.concatenate([v3[:, :, h * DH:(h + 1) * DH] for h in range(NH)], axis=0)
        s = jnp.einsum('bqd,bkd->bqk', q_b, k_b,
                       preferred_element_type=f32) * scale + mask_b                # (NH*N, T, T)
        # manual softmax: denominator reciprocal goes to the EUP slot
        m = jnp.max(s, axis=-1, keepdims=True)
        e = jnp.exp(s - m)
        p = e * pl.reciprocal(jnp.sum(e, axis=-1, keepdims=True), approx=True)
        ctx_b = jnp.einsum('bqk,bkd->bqd', p, v_b, preferred_element_type=f32)     # (NH*N, T, DH)
        ctx = jnp.concatenate([ctx_b[h * N:(h + 1) * N] for h in range(NH)], axis=-1)  # (N,T,H)
        ctx2 = ctx.reshape(NT, H)

        attn = jnp.dot(ctx2, wo_ref[l], preferred_element_type=f32) + crow(base + 1, H)
        h1 = _ln(x2 + attn, crow(base + 2, H), crow(base + 3, H))
        # TODO(synk): HF/PyTorch BERT uses the exact erf GELU; the tanh approximation is
        # kept here for Mosaic-lowering safety (small numerical difference only).
        ff = jax.nn.gelu(
            jnp.dot(h1, w1_ref[l], preferred_element_type=f32) + crow(base + 4, FF),
            approximate=True)
        x2 = _ln(h1 + jnp.dot(ff, w2_ref[l], preferred_element_type=f32) + crow(base + 5, H),
                 crow(base + 6, H), crow(base + 7, H))

    # ---------------- 2-layer bidirectional LSTM ------------------------------------
    # Forward & backward directions are lane-packed into a single (2N,48)x(48,128) MXU push
    # per (layer, timestep); row block 0:N carries the forward recurrence, N:2N the backward
    # one.  Gate math is uniform over the stacked rows; hidden/cell state stays in vregs.
    enc = x2.reshape(N, T, H)
    xs = [enc[:, t, :] for t in range(T)]                            # T x (N, H)
    sel_fwd = lax.broadcasted_iota(jnp.int32, (2 * N, 1), 0) < N     # forward-row selector
    for layer in range(LSTM_LAYERS):
        w_l = lstm_w_ref[layer]                                      # (H+LSTM_H, 8*LSTM_H)
        b_l = const_ref[LSTMB_ROW + layer:LSTMB_ROW + layer + 1, :]  # (1,128) = [b_fwd | b_bwd]
        hh = jnp.zeros((2 * N, LSTM_H), f32)
        cc = jnp.zeros((2 * N, LSTM_H), f32)
        out_f = [None] * T
        out_b = [None] * T
        for s in range(T):
            x_fb = jnp.concatenate([xs[s], xs[T - 1 - s]], axis=0)   # (2N, H)
            g2 = jnp.dot(jnp.concatenate([x_fb, hh], axis=-1), w_l,
                         preferred_element_type=f32) + b_l           # (2N, 128)
            gates = jnp.where(sel_fwd, g2[:, 0:4 * LSTM_H], g2[:, 4 * LSTM_H:8 * LSTM_H])
            # PyTorch gate order: i, f, g, o ; biases are combined (b_ih + b_hh)
            i_g = jax.nn.sigmoid(gates[:, 0 * LSTM_H:1 * LSTM_H])
            f_g = jax.nn.sigmoid(gates[:, 1 * LSTM_H:2 * LSTM_H])
            g_g = jnp.tanh(gates[:, 2 * LSTM_H:3 * LSTM_H])
            o_g = jax.nn.sigmoid(gates[:, 3 * LSTM_H:4 * LSTM_H])
            cc = f_g * cc + i_g * g_g
            hh = o_g * jnp.tanh(cc)
            out_f[s] = hh[0:N]
            out_b[T - 1 - s] = hh[N:2 * N]
        xs = [jnp.concatenate([out_f[t], out_b[t]], axis=-1) for t in range(T)]   # (N, H)

    # ---------------- FC + argmax; lane-dense (N, T*VOCAB) logits slab --------------
    fc_w = const_ref[FCW_ROW:FCW_ROW + H, 0:VOCAB_TAGS]              # (H, V)
    fc_b = crow(FCB_ROW, VOCAB_TAGS)                                 # (1, V)
    idv = lax.broadcasted_iota(jnp.int32, (N, VOCAB_TAGS), 1)
    logit_cols = []
    yhat_cols = []
    for t in range(T):
        lg = jnp.dot(xs[t], fc_w, preferred_element_type=f32) + fc_b          # (N, V)
        logit_cols.append(lg)
        mx = jnp.max(lg, axis=-1, keepdims=True)
        # argmax with first-index tie-breaking (matches torch.argmax)
        yhat_cols.append(jnp.min(jnp.where(lg == mx, idv, VOCAB_TAGS),
                                 axis=-1, keepdims=True))
    logits_ref[...] = jnp.concatenate(logit_cols, axis=-1)                     # (N, T*V) dense
    yhat_ref[...] = jnp.concatenate(yhat_cols, axis=-1).astype(jnp.int32)      # (N, T)


# ---------------------------------------------------------------------------
# wrapper (single pallas_call)
# ---------------------------------------------------------------------------
def _fs(shape):
    nd = len(shape)
    return pl.BlockSpec(shape, lambda i, _nd=nd: (0,) * _nd)


def _net_forward(params, input_ids, input_tags, entity_label):
    N, T = input_ids.shape
    ids = input_ids.astype(jnp.int32)
    ent = entity_label.astype(jnp.int32)
    # metadata-only reshapes (column layout for the in-kernel one-hot "gather")
    ids_col = ids.reshape(N * T, 1)
    ent_col = ent.reshape(N * T, 1)
    # note: the original forward also computes `mask = input_ids != 1` but never uses it.

    args = (ids, ids_col, ent_col, params['emb_tab'],
            params['wqkv'], params['wo'], params['w1'], params['w2'],
            params['lstm_w'], params['const'])

    logits_slab, y_hat = pl.pallas_call(
        net_kernel,
        out_shape=(jax.ShapeDtypeStruct((N, T * VOCAB_TAGS), jnp.float32),
                   jax.ShapeDtypeStruct((N, T), jnp.int32)),
        grid=(1,),
        in_specs=[_fs(a.shape) for a in args],
        out_specs=(_fs((N, T * VOCAB_TAGS)), _fs((N, T))),
        compiler_params=pltpu.CompilerParams(dimension_semantics=("arbitrary",)),
    )(*args)
    logits = logits_slab.reshape(N, T, VOCAB_TAGS)    # free bitcast back to (N, T, VOCAB)
    return logits, input_tags, y_hat


net_forward = jax.jit(_net_forward)


# ---------------------------------------------------------------------------
# parameters (deterministic synthetic init; pre-packed/stacked for the fused kernel)
# ---------------------------------------------------------------------------
def init_params(key):
    keys = iter(jax.random.split(key, 64))

    def nrm(shape, scale=0.02):
        return scale * jax.random.normal(next(keys), shape, jnp.float32)

    def pad_row(v):
        v = jnp.asarray(v, jnp.float32).reshape(-1)
        return jnp.pad(v, (0, 128 - v.shape[0]))

    p = {}

    # ----- embedding tables packed into one (184, H) slab -----
    word_emb = nrm((BERT_VOCAB, H))
    pos_emb = nrm((MAX_POS, H))
    type_emb = nrm((2, H))
    entity_emb = nrm((ENTITY_NUM, H))
    emb_tab = jnp.zeros((EMB_TAB_ROWS, H), jnp.float32)
    emb_tab = emb_tab.at[WORD_OFF:WORD_OFF + BERT_VOCAB].set(word_emb)
    emb_tab = emb_tab.at[ENT_OFF:ENT_OFF + ENTITY_NUM].set(entity_emb)
    emb_tab = emb_tab.at[POS_OFF:POS_OFF + MAX_POS].set(pos_emb + type_emb[0][None, :])
    p['emb_tab'] = emb_tab

    # ----- const slab rows (lane-padded to 128) -----
    rows = [pad_row(jnp.ones(H)),            # embedding LN gamma
            pad_row(jnp.zeros(H))]           # embedding LN beta

    # ----- encoder layers: stacked weights, QKV fused; biases/LN into the const slab -----
    wqkv, wo, w1, w2 = [], [], [], []
    for _ in range(NLAYERS):
        wq, wk, wv = nrm((H, H)), nrm((H, H)), nrm((H, H))
        wqkv.append(jnp.concatenate([wq, wk, wv], axis=1))            # (H, 3H)
        wo.append(nrm((H, H)))
        w1.append(nrm((H, FF)))
        w2.append(nrm((FF, H)))
        rows += [pad_row(jnp.zeros(3 * H)),  # bqkv
                 pad_row(jnp.zeros(H)),      # attn out bias
                 pad_row(jnp.ones(H)),       # ln1 gamma
                 pad_row(jnp.zeros(H)),      # ln1 beta
                 pad_row(jnp.zeros(FF)),     # b1
                 pad_row(jnp.zeros(H)),      # ffn out bias
                 pad_row(jnp.ones(H)),       # ln2 gamma
                 pad_row(jnp.zeros(H))]      # ln2 beta
    p['wqkv'] = jnp.stack(wqkv)
    p['wo'] = jnp.stack(wo)
    p['w1'] = jnp.stack(w1)
    p['w2'] = jnp.stack(w2)

    # ----- 2-layer bidirectional LSTM; per layer, [W_ih;W_hh] of fwd/bwd packed along lanes
    # (input size is H for both layers since 2*LSTM_H == H); combined bias b_ih + b_hh;
    # PyTorch gate order i, f, g, o -----
    lstm_w = []
    for _layer in range(LSTM_LAYERS):
        w_dirs = []
        for _d in range(2):                                           # forward, backward
            wih = nrm((H, 4 * LSTM_H), 0.1)
            whh = nrm((LSTM_H, 4 * LSTM_H), 0.1)
            w_dirs.append(jnp.concatenate([wih, whh], axis=0))        # (H+LSTM_H, 4*LSTM_H)
        lstm_w.append(jnp.concatenate(w_dirs, axis=1))                # (48, 128)
        rows.append(pad_row(jnp.zeros(8 * LSTM_H)))                   # [b_fwd | b_bwd]
    p['lstm_w'] = jnp.stack(lstm_w)                                   # (2, 48, 128)

    # ----- fc: xavier_normal_ on weight, zero bias (matches _param_init) -----
    std = (2.0 / (H + VOCAB_TAGS)) ** 0.5
    fc_w = std * jax.random.normal(next(keys), (H, VOCAB_TAGS), jnp.float32)
    rows.append(pad_row(jnp.zeros(VOCAB_TAGS)))                       # fc bias (row FCB_ROW)
    while len(rows) < FCW_ROW:                                        # pad to the fc-weight block
        rows.append(jnp.zeros(128, jnp.float32))
    const = jnp.stack(rows)                                           # (FCW_ROW, 128)
    fcw_rows = jnp.pad(fc_w, ((0, 0), (0, 128 - VOCAB_TAGS)))         # (H, 128)
    p['const'] = jnp.concatenate([const, fcw_rows], axis=0)           # (CONST_ROWS, 128)
    assert p['const'].shape == (CONST_ROWS, 128)
    return p


# TODO(synk): CRF(768)/CRF(31) submodules exist in __init__ but are never used in
# forward(), so they are intentionally omitted. Dropout / token_type are eval-mode
# fixed (no dropout, token_type_ids = 0).

if __name__ == "__main__":
    key = jax.random.PRNGKey(0)
    kp, k1, k2, k3 = jax.random.split(key, 4)
    params = init_params(kp)

    N, T = 2, 8
    input_ids = jax.random.randint(k1, (N, T), 0, BERT_VOCAB, dtype=jnp.int32)
    input_tags = jax.random.randint(k2, (N, T), 0, VOCAB_TAGS, dtype=jnp.int32)
    entity_label = jax.random.randint(k3, (N, T), 0, ENTITY_NUM, dtype=jnp.int32)

    logits, tags_out, y_hat = net_forward(params, input_ids, input_tags, entity_label)
    jax.block_until_ready((logits, tags_out, y_hat))

    assert logits.shape == (N, T, VOCAB_TAGS) and logits.dtype == jnp.float32
    assert tags_out.shape == (N, T)
    assert y_hat.shape == (N, T) and y_hat.dtype == jnp.int32
    assert bool(jnp.all(y_hat == jnp.argmax(logits, axis=-1).astype(jnp.int32)))
    print("KERNEL_OK")
</pallas_src>

<mosaic_0001>
module attributes {stable_mosaic.version = 11 : i64} {
  func.func @net_kernel(%arg0: i32, %arg1: memref<2x8xi32, #tpu.memory_space<vmem>>, %arg2: memref<16x1xi32, #tpu.memory_space<vmem>>, %arg3: memref<16x1xi32, #tpu.memory_space<vmem>>, %arg4: memref<184x32xf32, #tpu.memory_space<vmem>>, %arg5: memref<2x32x96xf32, #tpu.memory_space<vmem>>, %arg6: memref<2x32x32xf32, #tpu.memory_space<vmem>>, %arg7: memref<2x32x64xf32, #tpu.memory_space<vmem>>, %arg8: memref<2x64x32xf32, #tpu.memory_space<vmem>>, %arg9: memref<2x48x128xf32, #tpu.memory_space<vmem>>, %arg10: memref<56x128xf32, #tpu.memory_space<vmem>>, %arg11: memref<2x128xf32, #tpu.memory_space<vmem>>, %arg12: memref<2x8xi32, #tpu.memory_space<vmem>>) attributes {dimension_semantics = [#tpu.dimension_semantics<arbitrary>], iteration_bounds = array<i64: 1>, scalar_prefetch = 0 : i64, scratch_operands = 0 : i64, tpu.core_type = #tpu.core_type<tc>, window_params = [{pipeline_mode = #tpu.pipeline_mode<synchronous>, transform_indices = @transform_0, window_bounds = array<i64: 2, 8>}, {pipeline_mode = #tpu.pipeline_mode<synchronous>, transform_indices = @transform_1, window_bounds = array<i64: 16, 1>}, {pipeline_mode = #tpu.pipeline_mode<synchronous>, transform_indices = @transform_2, window_bounds = array<i64: 16, 1>}, {pipeline_mode = #tpu.pipeline_mode<synchronous>, transform_indices = @transform_3, window_bounds = array<i64: 184, 32>}, {pipeline_mode = #tpu.pipeline_mode<synchronous>, transform_indices = @transform_4, window_bounds = array<i64: 2, 32, 96>}, {pipeline_mode = #tpu.pipeline_mode<synchronous>, transform_indices = @transform_5, window_bounds = array<i64: 2, 32, 32>}, {pipeline_mode = #tpu.pipeline_mode<synchronous>, transform_indices = @transform_6, window_bounds = array<i64: 2, 32, 64>}, {pipeline_mode = #tpu.pipeline_mode<synchronous>, transform_indices = @transform_7, window_bounds = array<i64: 2, 64, 32>}, {pipeline_mode = #tpu.pipeline_mode<synchronous>, transform_indices = @transform_8, window_bounds = array<i64: 2, 48, 128>}, {pipeline_mode = #tpu.pipeline_mode<synchronous>, transform_indices = @transform_9, window_bounds = array<i64: 56, 128>}, {pipeline_mode = #tpu.pipeline_mode<synchronous>, transform_indices = @transform_10, window_bounds = array<i64: 2, 128>}, {pipeline_mode = #tpu.pipeline_mode<synchronous>, transform_indices = @transform_11, window_bounds = array<i64: 2, 8>}]} {
    %c0 = arith.constant 0 : index
    %c0_0 = arith.constant 0 : index
    %0 = vector.load %arg2[%c0, %c0_0] : memref<16x1xi32, #tpu.memory_space<vmem>>, vector<16x1xi32>
    %1 = tpu.iota {dimensions = array<i32: 1>} : vector<16x100xi32>
    %2 = vector.broadcast %0 : vector<16x1xi32> to vector<16x100xi32>
    %3 = arith.cmpi eq, %2, %1 : vector<16x100xi32>
    %4 = arith.extui %3 : vector<16x100xi1> to vector<16x100xi32>
    %5 = arith.sitofp %4 : vector<16x100xi32> to vector<16x100xf32>
    %c0_1 = arith.constant 0 : index
    %c0_2 = arith.constant 0 : index
    %6 = vector.load %arg3[%c0_1, %c0_2] : memref<16x1xi32, #tpu.memory_space<vmem>>, vector<16x1xi32>
    %7 = tpu.iota {dimensions = array<i32: 1>} : vector<16x10xi32>
    %8 = vector.broadcast %6 : vector<16x1xi32> to vector<16x10xi32>
    %9 = arith.cmpi eq, %8, %7 : vector<16x10xi32>
    %10 = arith.extui %9 : vector<16x10xi1> to vector<16x10xi32>
    %11 = arith.sitofp %10 : vector<16x10xi32> to vector<16x10xf32>
    %c0_3 = arith.constant 0 : index
    %c0_4 = arith.constant 0 : index
    %12 = vector.load %arg4[%c0_3, %c0_4] : memref<184x32xf32, #tpu.memory_space<vmem>>, vector<100x32xf32>
    %c104 = arith.constant 104 : index
    %c0_5 = arith.constant 0 : index
    %13 = vector.load %arg4[%c104, %c0_5] : memref<184x32xf32, #tpu.memory_space<vmem>>, vector<10x32xf32>
    %c120 = arith.constant 120 : index
    %c0_6 = arith.constant 0 : index
    %14 = vector.load %arg4[%c120, %c0_6] : memref<184x32xf32, #tpu.memory_space<vmem>>, vector<8x32xf32>
    %cst = arith.constant dense<0.000000e+00> : vector<16x32xf32>
    %15 = tpu.matmul %5, %12, %cst {dimension_numbers = #tpu.dot_dimension_numbers<[1], [0], [0], [1], [0, 0, 1, 1], [], []>} : vector<16x100xf32>, vector<100x32xf32>, vector<16x32xf32> -> vector<16x32xf32>
    %cst_7 = arith.constant dense<0.000000e+00> : vector<16x32xf32>
    %16 = tpu.matmul %11, %13, %cst_7 {dimension_numbers = #tpu.dot_dimension_numbers<[1], [0], [0], [1], [0, 0, 1, 1], [], []>} : vector<16x10xf32>, vector<10x32xf32>, vector<16x32xf32> -> vector<16x32xf32>
    %17 = arith.addf %15, %16 : vector<16x32xf32>
    %18 = tpu.concatenate %14, %14 in 0 : vector<8x32xf32>, vector<8x32xf32> -> vector<16x32xf32>
    %19 = arith.addf %17, %18 : vector<16x32xf32>
    %c0_8 = arith.constant 0 : index
    %c0_9 = arith.constant 0 : index
    %20 = vector.load %arg10[%c0_8, %c0_9] : memref<56x128xf32, #tpu.memory_space<vmem>>, vector<1x32xf32>
    %c1 = arith.constant 1 : index
    %c0_10 = arith.constant 0 : index
    %21 = vector.load %arg10[%c1, %c0_10] : memref<56x128xf32, #tpu.memory_space<vmem>>, vector<1x32xf32>
    %cst_11 = arith.constant dense<0.000000e+00> : vector<16xf32>
    %22 = vector.multi_reduction <add>, %19, %cst_11 [1] : vector<16x32xf32> to vector<16xf32>
    %23 = vector.shape_cast %22 : vector<16xf32> to vector<16x1xf32>
    %cst_12 = arith.constant 3.200000e+01 : f32
    %24 = vector.broadcast %cst_12 : f32 to vector<16x1xf32>
    %25 = arith.divf %23, %24 : vector<16x1xf32>
    %26 = vector.broadcast %25 : vector<16x1xf32> to vector<16x32xf32>
    %27 = arith.subf %19, %26 : vector<16x32xf32>
    %28 = arith.mulf %27, %27 : vector<16x32xf32>
    %cst_13 = arith.constant dense<0.000000e+00> : vector<16xf32>
    %29 = vector.multi_reduction <add>, %28, %cst_13 [1] : vector<16x32xf32> to vector<16xf32>
    %30 = vector.shape_cast %29 : vector<16xf32> to vector<16x1xf32>
    %cst_14 = arith.constant 3.200000e+01 : f32
    %31 = vector.broadcast %cst_14 : f32 to vector<16x1xf32>
    %32 = arith.divf %30, %31 : vector<16x1xf32>
    %33 = vector.broadcast %25 : vector<16x1xf32> to vector<16x32xf32>
    %34 = arith.subf %19, %33 : vector<16x32xf32>
    %cst_15 = arith.constant 9.99999996E-13 : f32
    %35 = vector.broadcast %cst_15 : f32 to vector<16x1xf32>
    %36 = arith.addf %32, %35 : vector<16x1xf32>
    %37 = math.rsqrt %36 : vector<16x1xf32>
    %38 = vector.broadcast %37 : vector<16x1xf32> to vector<16x32xf32>
    %39 = arith.mulf %34, %38 : vector<16x32xf32>
    %40 = vector.broadcast %20 : vector<1x32xf32> to vector<16x32xf32>
    %41 = arith.mulf %39, %40 : vector<16x32xf32>
    %42 = vector.broadcast %21 : vector<1x32xf32> to vector<16x32xf32>
    %43 = arith.addf %41, %42 : vector<16x32xf32>
    %c0_16 = arith.constant 0 : index
    %c0_17 = arith.constant 0 : index
    %44 = vector.load %arg1[%c0_16, %c0_17] : memref<2x8xi32, #tpu.memory_space<vmem>>, vector<2x8xi32>
    %c0_i32 = arith.constant 0 : i32
    %45 = vector.broadcast %c0_i32 : i32 to vector<2x8xi32>
    %46 = arith.cmpi sgt, %44, %45 : vector<2x8xi32>
    %cst_18 = arith.constant 0.000000e+00 : f32
    %cst_19 = arith.constant -1.000000e+04 : f32
    %47 = vector.broadcast %cst_18 : f32 to vector<2x8xf32>
    %48 = vector.broadcast %cst_19 : f32 to vector<2x8xf32>
    %49 = arith.select %46, %47, %48 : vector<2x8xi1>, vector<2x8xf32>
    %50 = vector.shape_cast %49 : vector<2x8xf32> to vector<2x1x8xf32>
    %51 = tpu.concatenate %50, %50, %50, %50 in 0 : vector<2x1x8xf32>, vector<2x1x8xf32>, vector<2x1x8xf32>, vector<2x1x8xf32> -> vector<8x1x8xf32>
    %c0_20 = arith.constant 0 : index
    %c0_21 = arith.constant 0 : index
    %c0_22 = arith.constant 0 : index
    %52 = vector.load %arg5[%c0_20, %c0_21, %c0_22] : memref<2x32x96xf32, #tpu.memory_space<vmem>>, vector<1x32x96xf32>
    %53 = vector.shape_cast %52 : vector<1x32x96xf32> to vector<32x96xf32>
    %cst_23 = arith.constant dense<0.000000e+00> : vector<16x96xf32>
    %54 = tpu.matmul %43, %53, %cst_23 {dimension_numbers = #tpu.dot_dimension_numbers<[1], [0], [0], [1], [0, 0, 1, 1], [], []>} : vector<16x32xf32>, vector<32x96xf32>, vector<16x96xf32> -> vector<16x96xf32>
    %c2 = arith.constant 2 : index
    %c0_24 = arith.constant 0 : index
    %55 = vector.load %arg10[%c2, %c0_24] : memref<56x128xf32, #tpu.memory_space<vmem>>, vector<1x96xf32>
    %56 = vector.broadcast %55 : vector<1x96xf32> to vector<16x96xf32>
    %57 = arith.addf %54, %56 : vector<16x96xf32>
    %58 = vector.extract_strided_slice %57 {offsets = [0, 0], sizes = [16, 32], strides = [1, 1]} : vector<16x96xf32> to vector<16x32xf32>
    %59 = vector.shape_cast %58 : vector<16x32xf32> to vector<2x8x32xf32>
    %60 = vector.extract_strided_slice %57 {offsets = [0, 32], sizes = [16, 32], strides = [1, 1]} : vector<16x96xf32> to vector<16x32xf32>
    %61 = vector.shape_cast %60 : vector<16x32xf32> to vector<2x8x32xf32>
    %62 = vector.extract_strided_slice %57 {offsets = [0, 64], sizes = [16, 32], strides = [1, 1]} : vector<16x96xf32> to vector<16x32xf32>
    %63 = vector.shape_cast %62 : vector<16x32xf32> to vector<2x8x32xf32>
    %64 = vector.extract_strided_slice %59 {offsets = [0, 0, 0], sizes = [2, 8, 8], strides = [1, 1, 1]} : vector<2x8x32xf32> to vector<2x8x8xf32>
    %65 = vector.extract_strided_slice %59 {offsets = [0, 0, 8], sizes = [2, 8, 8], strides = [1, 1, 1]} : vector<2x8x32xf32> to vector<2x8x8xf32>
    %66 = vector.extract_strided_slice %59 {offsets = [0, 0, 16], sizes = [2, 8, 8], strides = [1, 1, 1]} : vector<2x8x32xf32> to vector<2x8x8xf32>
    %67 = vector.extract_strided_slice %59 {offsets = [0, 0, 24], sizes = [2, 8, 8], strides = [1, 1, 1]} : vector<2x8x32xf32> to vector<2x8x8xf32>
    %68 = tpu.concatenate %64, %65, %66, %67 in 0 : vector<2x8x8xf32>, vector<2x8x8xf32>, vector<2x8x8xf32>, vector<2x8x8xf32> -> vector<8x8x8xf32>
    %69 = vector.extract_strided_slice %61 {offsets = [0, 0, 0], sizes = [2, 8, 8], strides = [1, 1, 1]} : vector<2x8x32xf32> to vector<2x8x8xf32>
    %70 = vector.extract_strided_slice %61 {offsets = [0, 0, 8], sizes = [2, 8, 8], strides = [1, 1, 1]} : vector<2x8x32xf32> to vector<2x8x8xf32>
    %71 = vector.extract_strided_slice %61 {offsets = [0, 0, 16], sizes = [2, 8, 8], strides = [1, 1, 1]} : vector<2x8x32xf32> to vector<2x8x8xf32>
    %72 = vector.extract_strided_slice %61 {offsets = [0, 0, 24], sizes = [2, 8, 8], strides = [1, 1, 1]} : vector<2x8x32xf32> to vector<2x8x8xf32>
    %73 = tpu.concatenate %69, %70, %71, %72 in 0 : vector<2x8x8xf32>, vector<2x8x8xf32>, vector<2x8x8xf32>, vector<2x8x8xf32> -> vector<8x8x8xf32>
    %74 = vector.extract_strided_slice %63 {offsets = [0, 0, 0], sizes = [2, 8, 8], strides = [1, 1, 1]} : vector<2x8x32xf32> to vector<2x8x8xf32>
    %75 = vector.extract_strided_slice %63 {offsets = [0, 0, 8], sizes = [2, 8, 8], strides = [1, 1, 1]} : vector<2x8x32xf32> to vector<2x8x8xf32>
    %76 = vector.extract_strided_slice %63 {offsets = [0, 0, 16], sizes = [2, 8, 8], strides = [1, 1, 1]} : vector<2x8x32xf32> to vector<2x8x8xf32>
    %77 = vector.extract_strided_slice %63 {offsets = [0, 0, 24], sizes = [2, 8, 8], strides = [1, 1, 1]} : vector<2x8x32xf32> to vector<2x8x8xf32>
    %78 = tpu.concatenate %74, %75, %76, %77 in 0 : vector<2x8x8xf32>, vector<2x8x8xf32>, vector<2x8x8xf32>, vector<2x8x8xf32> -> vector<8x8x8xf32>
    "tpu.trace_start"() <{level = 10 : i32, message = "bqd,bkd->bqk"}> : () -> ()
    %cst_25 = arith.constant dense<0.000000e+00> : vector<8x8x8xf32>
    %79 = tpu.matmul %68, %73, %cst_25 {dimension_numbers = #tpu.dot_dimension_numbers<[2], [2], [1], [1], [0, 0, 0, 1, 1, 1], [0], [0]>} : vector<8x8x8xf32>, vector<8x8x8xf32>, vector<8x8x8xf32> -> vector<8x8x8xf32>
    "tpu.trace_stop"() : () -> ()
    %cst_26 = arith.constant 0.353553385 : f32
    %80 = vector.broadcast %cst_26 : f32 to vector<8x8x8xf32>
    %81 = arith.mulf %79, %80 : vector<8x8x8xf32>
    %82 = vector.broadcast %51 : vector<8x1x8xf32> to vector<8x8x8xf32>
    %83 = arith.addf %81, %82 : vector<8x8x8xf32>
    %cst_27 = arith.constant dense<0xFF800000> : vector<8x8xf32>
    %84 = vector.multi_reduction <maximumf>, %83, %cst_27 [2] : vector<8x8x8xf32> to vector<8x8xf32>
    %85 = vector.shape_cast %84 : vector<8x8xf32> to vector<8x8x1xf32>
    %86 = vector.broadcast %85 : vector<8x8x1xf32> to vector<8x8x8xf32>
    %87 = arith.subf %83, %86 : vector<8x8x8xf32>
    %88 = math.exp %87 : vector<8x8x8xf32>
    %cst_28 = arith.constant dense<0.000000e+00> : vector<8x8xf32>
    %89 = vector.multi_reduction <add>, %88, %cst_28 [2] : vector<8x8x8xf32> to vector<8x8xf32>
    %90 = vector.shape_cast %89 : vector<8x8xf32> to vector<8x8x1xf32>
    %91 = tpu.reciprocal %90 {approx = true} : vector<8x8x1xf32> -> vector<8x8x1xf32>
    %92 = vector.broadcast %91 : vector<8x8x1xf32> to vector<8x8x8xf32>
    %93 = arith.mulf %88, %92 : vector<8x8x8xf32>
    "tpu.trace_start"() <{level = 10 : i32, message = "bqk,bkd->bqd"}> : () -> ()
    %cst_29 = arith.constant dense<0.000000e+00> : vector<8x8x8xf32>
    %94 = tpu.matmul %93, %78, %cst_29 {dimension_numbers = #tpu.dot_dimension_numbers<[2], [1], [1], [2], [0, 0, 0, 1, 1, 2], [0], [0]>} : vector<8x8x8xf32>, vector<8x8x8xf32>, vector<8x8x8xf32> -> vector<8x8x8xf32>
    "tpu.trace_stop"() : () -> ()
    %95 = vector.extract_strided_slice %94 {offsets = [0, 0, 0], sizes = [2, 8, 8], strides = [1, 1, 1]} : vector<8x8x8xf32> to vector<2x8x8xf32>
    %96 = vector.extract_strided_slice %94 {offsets = [2, 0, 0], sizes = [2, 8, 8], strides = [1, 1, 1]} : vector<8x8x8xf32> to vector<2x8x8xf32>
    %97 = vector.extract_strided_slice %94 {offsets = [4, 0, 0], sizes = [2, 8, 8], strides = [1, 1, 1]} : vector<8x8x8xf32> to vector<2x8x8xf32>
    %98 = vector.extract_strided_slice %94 {offsets = [6, 0, 0], sizes = [2, 8, 8], strides = [1, 1, 1]} : vector<8x8x8xf32> to vector<2x8x8xf32>
    %99 = tpu.concatenate %95, %96, %97, %98 in 2 : vector<2x8x8xf32>, vector<2x8x8xf32>, vector<2x8x8xf32>, vector<2x8x8xf32> -> vector<2x8x32xf32>
    %100 = vector.shape_cast %99 : vector<2x8x32xf32> to vector<16x32xf32>
    %c0_30 = arith.constant 0 : index
    %c0_31 = arith.constant 0 : index
    %c0_32 = arith.constant 0 : index
    %101 = vector.load %arg6[%c0_30, %c0_31, %c0_32] : memref<2x32x32xf32, #tpu.memory_space<vmem>>, vector<1x32x32xf32>
    %102 = vector.shape_cast %101 : vector<1x32x32xf32> to vector<32x32xf32>
    %cst_33 = arith.constant dense<0.000000e+00> : vector<16x32xf32>
    %103 = tpu.matmul %100, %102, %cst_33 {dimension_numbers = #tpu.dot_dimension_numbers<[1], [0], [0], [1], [0, 0, 1, 1], [], []>} : vector<16x32xf32>, vector<32x32xf32>, vector<16x32xf32> -> vector<16x32xf32>
    %c3 = arith.constant 3 : index
    %c0_34 = arith.constant 0 : index
    %104 = vector.load %arg10[%c3, %c0_34] : memref<56x128xf32, #tpu.memory_space<vmem>>, vector<1x32xf32>
    %105 = vector.broadcast %104 : vector<1x32xf32> to vector<16x32xf32>
    %106 = arith.addf %103, %105 : vector<16x32xf32>
    %107 = arith.addf %43, %106 : vector<16x32xf32>
    %c4 = arith.constant 4 : index
    %c0_35 = arith.constant 0 : index
    %108 = vector.load %arg10[%c4, %c0_35] : memref<56x128xf32, #tpu.memory_space<vmem>>, vector<1x32xf32>
    %c5 = arith.constant 5 : index
    %c0_36 = arith.constant 0 : index
    %109 = vector.load %arg10[%c5, %c0_36] : memref<56x128xf32, #tpu.memory_space<vmem>>, vector<1x32xf32>
    %cst_37 = arith.constant dense<0.000000e+00> : vector<16xf32>
    %110 = vector.multi_reduction <add>, %107, %cst_37 [1] : vector<16x32xf32> to vector<16xf32>
    %111 = vector.shape_cast %110 : vector<16xf32> to vector<16x1xf32>
    %cst_38 = arith.constant 3.200000e+01 : f32
    %112 = vector.broadcast %cst_38 : f32 to vector<16x1xf32>
    %113 = arith.divf %111, %112 : vector<16x1xf32>
    %114 = vector.broadcast %113 : vector<16x1xf32> to vector<16x32xf32>
    %115 = arith.subf %107, %114 : vector<16x32xf32>
    %116 = arith.mulf %115, %115 : vector<16x32xf32>
    %cst_39 = arith.constant dense<0.000000e+00> : vector<16xf32>
    %117 = vector.multi_reduction <add>, %116, %cst_39 [1] : vector<16x32xf32> to vector<16xf32>
    %118 = vector.shape_cast %117 : vector<16xf32> to vector<16x1xf32>
    %cst_40 = arith.constant 3.200000e+01 : f32
    %119 = vector.broadcast %cst_40 : f32 to vector<16x1xf32>
    %120 = arith.divf %118, %119 : vector<16x1xf32>
    %121 = vector.broadcast %113 : vector<16x1xf32> to vector<16x32xf32>
    %122 = arith.subf %107, %121 : vector<16x32xf32>
    %cst_41 = arith.constant 9.99999996E-13 : f32
    %123 = vector.broadcast %cst_41 : f32 to vector<16x1xf32>
    %124 = arith.addf %120, %123 : vector<16x1xf32>
    %125 = math.rsqrt %124 : vector<16x1xf32>
    %126 = vector.broadcast %125 : vector<16x1xf32> to vector<16x32xf32>
    %127 = arith.mulf %122, %126 : vector<16x32xf32>
    %128 = vector.broadcast %108 : vector<1x32xf32> to vector<16x32xf32>
    %129 = arith.mulf %127, %128 : vector<16x32xf32>
    %130 = vector.broadcast %109 : vector<1x32xf32> to vector<16x32xf32>
    %131 = arith.addf %129, %130 : vector<16x32xf32>
    %c0_42 = arith.constant 0 : index
    %c0_43 = arith.constant 0 : index
    %c0_44 = arith.constant 0 : index
    %132 = vector.load %arg7[%c0_42, %c0_43, %c0_44] : memref<2x32x64xf32, #tpu.memory_space<vmem>>, vector<1x32x64xf32>
    %133 = vector.shape_cast %132 : vector<1x32x64xf32> to vector<32x64xf32>
    %cst_45 = arith.constant dense<0.000000e+00> : vector<16x64xf32>
    %134 = tpu.matmul %131, %133, %cst_45 {dimension_numbers = #tpu.dot_dimension_numbers<[1], [0], [0], [1], [0, 0, 1, 1], [], []>} : vector<16x32xf32>, vector<32x64xf32>, vector<16x64xf32> -> vector<16x64xf32>
    %c6 = arith.constant 6 : index
    %c0_46 = arith.constant 0 : index
    %135 = vector.load %arg10[%c6, %c0_46] : memref<56x128xf32, #tpu.memory_space<vmem>>, vector<1x64xf32>
    %136 = vector.broadcast %135 : vector<1x64xf32> to vector<16x64xf32>
    %137 = arith.addf %134, %136 : vector<16x64xf32>
    %138 = arith.mulf %137, %137 : vector<16x64xf32>
    %139 = arith.mulf %137, %138 : vector<16x64xf32>
    %cst_47 = arith.constant 4.471500e-02 : f32
    %140 = vector.broadcast %cst_47 : f32 to vector<16x64xf32>
    %141 = arith.mulf %140, %139 : vector<16x64xf32>
    %142 = arith.addf %137, %141 : vector<16x64xf32>
    %cst_48 = arith.constant 0.797884583 : f32
    %143 = vector.broadcast %cst_48 : f32 to vector<16x64xf32>
    %144 = arith.mulf %143, %142 : vector<16x64xf32>
    %145 = math.tanh %144 : vector<16x64xf32>
    %cst_49 = arith.constant 1.000000e+00 : f32
    %146 = vector.broadcast %cst_49 : f32 to vector<16x64xf32>
    %147 = arith.addf %146, %145 : vector<16x64xf32>
    %cst_50 = arith.constant 5.000000e-01 : f32
    %148 = vector.broadcast %cst_50 : f32 to vector<16x64xf32>
    %149 = arith.mulf %148, %147 : vector<16x64xf32>
    %150 = arith.mulf %137, %149 : vector<16x64xf32>
    %c0_51 = arith.constant 0 : index
    %c0_52 = arith.constant 0 : index
    %c0_53 = arith.constant 0 : index
    %151 = vector.load %arg8[%c0_51, %c0_52, %c0_53] : memref<2x64x32xf32, #tpu.memory_space<vmem>>, vector<1x64x32xf32>
    %152 = vector.shape_cast %151 : vector<1x64x32xf32> to vector<64x32xf32>
    %cst_54 = arith.constant dense<0.000000e+00> : vector<16x32xf32>
    %153 = tpu.matmul %150, %152, %cst_54 {dimension_numbers = #tpu.dot_dimension_numbers<[1], [0], [0], [1], [0, 0, 1, 1], [], []>} : vector<16x64xf32>, vector<64x32xf32>, vector<16x32xf32> -> vector<16x32xf32>
    %154 = arith.addf %131, %153 : vector<16x32xf32>
    %c7 = arith.constant 7 : index
    %c0_55 = arith.constant 0 : index
    %155 = vector.load %arg10[%c7, %c0_55] : memref<56x128xf32, #tpu.memory_space<vmem>>, vector<1x32xf32>
    %156 = vector.broadcast %155 : vector<1x32xf32> to vector<16x32xf32>
    %157 = arith.addf %154, %156 : vector<16x32xf32>
    %c8 = arith.constant 8 : index
    %c0_56 = arith.constant 0 : index
    %158 = vector.load %arg10[%c8, %c0_56] : memref<56x128xf32, #tpu.memory_space<vmem>>, vector<1x32xf32>
    %c9 = arith.constant 9 : index
    %c0_57 = arith.constant 0 : index
    %159 = vector.load %arg10[%c9, %c0_57] : memref<56x128xf32, #tpu.memory_space<vmem>>, vector<1x32xf32>
    %cst_58 = arith.constant dense<0.000000e+00> : vector<16xf32>
    %160 = vector.multi_reduction <add>, %157, %cst_58 [1] : vector<16x32xf32> to vector<16xf32>
    %161 = vector.shape_cast %160 : vector<16xf32> to vector<16x1xf32>
    %cst_59 = arith.constant 3.200000e+01 : f32
    %162 = vector.broadcast %cst_59 : f32 to vector<16x1xf32>
    %163 = arith.divf %161, %162 : vector<16x1xf32>
    %164 = vector.broadcast %163 : vector<16x1xf32> to vector<16x32xf32>
    %165 = arith.subf %157, %164 : vector<16x32xf32>
    %166 = arith.mulf %165, %165 : vector<16x32xf32>
    %cst_60 = arith.constant dense<0.000000e+00> : vector<16xf32>
    %167 = vector.multi_reduction <add>, %166, %cst_60 [1] : vector<16x32xf32> to vector<16xf32>
    %168 = vector.shape_cast %167 : vector<16xf32> to vector<16x1xf32>
    %cst_61 = arith.constant 3.200000e+01 : f32
    %169 = vector.broadcast %cst_61 : f32 to vector<16x1xf32>
    %170 = arith.divf %168, %169 : vector<16x1xf32>
    %171 = vector.broadcast %163 : vector<16x1xf32> to vector<16x32xf32>
    %172 = arith.subf %157, %171 : vector<16x32xf32>
    %cst_62 = arith.constant 9.99999996E-13 : f32
    %173 = vector.broadcast %cst_62 : f32 to vector<16x1xf32>
    %174 = arith.addf %170, %173 : vector<16x1xf32>
    %175 = math.rsqrt %174 : vector<16x1xf32>
    %176 = vector.broadcast %175 : vector<16x1xf32> to vector<16x32xf32>
    %177 = arith.mulf %172, %176 : vector<16x32xf32>
    %178 = vector.broadcast %158 : vector<1x32xf32> to vector<16x32xf32>
    %179 = arith.mulf %177, %178 : vector<16x32xf32>
    %180 = vector.broadcast %159 : vector<1x32xf32> to vector<16x32xf32>
    %181 = arith.addf %179, %180 : vector<16x32xf32>
    %c1_63 = arith.constant 1 : index
    %c0_64 = arith.constant 0 : index
    %c0_65 = arith.constant 0 : index
    %182 = vector.load %arg5[%c1_63, %c0_64, %c0_65] : memref<2x32x96xf32, #tpu.memory_space<vmem>>, vector<1x32x96xf32>
    %183 = vector.shape_cast %182 : vector<1x32x96xf32> to vector<32x96xf32>
    %cst_66 = arith.constant dense<0.000000e+00> : vector<16x96xf32>
    %184 = tpu.matmul %181, %183, %cst_66 {dimension_numbers = #tpu.dot_dimension_numbers<[1], [0], [0], [1], [0, 0, 1, 1], [], []>} : vector<16x32xf32>, vector<32x96xf32>, vector<16x96xf32> -> vector<16x96xf32>
    %c10 = arith.constant 10 : index
    %c0_67 = arith.constant 0 : index
    %185 = vector.load %arg10[%c10, %c0_67] : memref<56x128xf32, #tpu.memory_space<vmem>>, vector<1x96xf32>
    %186 = vector.broadcast %185 : vector<1x96xf32> to vector<16x96xf32>
    %187 = arith.addf %184, %186 : vector<16x96xf32>
    %188 = vector.extract_strided_slice %187 {offsets = [0, 0], sizes = [16, 32], strides = [1, 1]} : vector<16x96xf32> to vector<16x32xf32>
    %189 = vector.shape_cast %188 : vector<16x32xf32> to vector<2x8x32xf32>
    %190 = vector.extract_strided_slice %187 {offsets = [0, 32], sizes = [16, 32], strides = [1, 1]} : vector<16x96xf32> to vector<16x32xf32>
    %191 = vector.shape_cast %190 : vector<16x32xf32> to vector<2x8x32xf32>
    %192 = vector.extract_strided_slice %187 {offsets = [0, 64], sizes = [16, 32], strides = [1, 1]} : vector<16x96xf32> to vector<16x32xf32>
    %193 = vector.shape_cast %192 : vector<16x32xf32> to vector<2x8x32xf32>
    %194 = vector.extract_strided_slice %189 {offsets = [0, 0, 0], sizes = [2, 8, 8], strides = [1, 1, 1]} : vector<2x8x32xf32> to vector<2x8x8xf32>
    %195 = vector.extract_strided_slice %189 {offsets = [0, 0, 8], sizes = [2, 8, 8], strides = [1, 1, 1]} : vector<2x8x32xf32> to vector<2x8x8xf32>
    %196 = vector.extract_strided_slice %189 {offsets = [0, 0, 16], sizes = [2, 8, 8], strides = [1, 1, 1]} : vector<2x8x32xf32> to vector<2x8x8xf32>
    %197 = vector.extract_strided_slice %189 {offsets = [0, 0, 24], sizes = [2, 8, 8], strides = [1, 1, 1]} : vector<2x8x32xf32> to vector<2x8x8xf32>
    %198 = tpu.concatenate %194, %195, %196, %197 in 0 : vector<2x8x8xf32>, vector<2x8x8xf32>, vector<2x8x8xf32>, vector<2x8x8xf32> -> vector<8x8x8xf32>
    %199 = vector.extract_strided_slice %191 {offsets = [0, 0, 0], sizes = [2, 8, 8], strides = [1, 1, 1]} : vector<2x8x32xf32> to vector<2x8x8xf32>
    %200 = vector.extract_strided_slice %191 {offsets = [0, 0, 8], sizes = [2, 8, 8], strides = [1, 1, 1]} : vector<2x8x32xf32> to vector<2x8x8xf32>
    %201 = vector.extract_strided_slice %191 {offsets = [0, 0, 16], sizes = [2, 8, 8], strides = [1, 1, 1]} : vector<2x8x32xf32> to vector<2x8x8xf32>
    %202 = vector.extract_strided_slice %191 {offsets = [0, 0, 24], sizes = [2, 8, 8], strides = [1, 1, 1]} : vector<2x8x32xf32> to vector<2x8x8xf32>
    %203 = tpu.concatenate %199, %200, %201, %202 in 0 : vector<2x8x8xf32>, vector<2x8x8xf32>, vector<2x8x8xf32>, vector<2x8x8xf32> -> vector<8x8x8xf32>
    %204 = vector.extract_strided_slice %193 {offsets = [0, 0, 0], sizes = [2, 8, 8], strides = [1, 1, 1]} : vector<2x8x32xf32> to vector<2x8x8xf32>
    %205 = vector.extract_strided_slice %193 {offsets = [0, 0, 8], sizes = [2, 8, 8], strides = [1, 1, 1]} : vector<2x8x32xf32> to vector<2x8x8xf32>
    %206 = vector.extract_strided_slice %193 {offsets = [0, 0, 16], sizes = [2, 8, 8], strides = [1, 1, 1]} : vector<2x8x32xf32> to vector<2x8x8xf32>
    %207 = vector.extract_strided_slice %193 {offsets = [0, 0, 24], sizes = [2, 8, 8], strides = [1, 1, 1]} : vector<2x8x32xf32> to vector<2x8x8xf32>
    %208 = tpu.concatenate %204, %205, %206, %207 in 0 : vector<2x8x8xf32>, vector<2x8x8xf32>, vector<2x8x8xf32>, vector<2x8x8xf32> -> vector<8x8x8xf32>
    "tpu.trace_start"() <{level = 10 : i32, message = "bqd,bkd->bqk"}> : () -> ()
    %cst_68 = arith.constant dense<0.000000e+00> : vector<8x8x8xf32>
    %209 = tpu.matmul %198, %203, %cst_68 {dimension_numbers = #tpu.dot_dimension_numbers<[2], [2], [1], [1], [0, 0, 0, 1, 1, 1], [0], [0]>} : vector<8x8x8xf32>, vector<8x8x8xf32>, vector<8x8x8xf32> -> vector<8x8x8xf32>
    "tpu.trace_stop"() : () -> ()
    %cst_69 = arith.constant 0.353553385 : f32
    %210 = vector.broadcast %cst_69 : f32 to vector<8x8x8xf32>
    %211 = arith.mulf %209, %210 : vector<8x8x8xf32>
    %212 = vector.broadcast %51 : vector<8x1x8xf32> to vector<8x8x8xf32>
    %213 = arith.addf %211, %212 : vector<8x8x8xf32>
    %cst_70 = arith.constant dense<0xFF800000> : vector<8x8xf32>
    %214 = vector.multi_reduction <maximumf>, %213, %cst_70 [2] : vector<8x8x8xf32> to vector<8x8xf32>
    %215 = vector.shape_cast %214 : vector<8x8xf32> to vector<8x8x1xf32>
    %216 = vector.broadcast %215 : vector<8x8x1xf32> to vector<8x8x8xf32>
    %217 = arith.subf %213, %216 : vector<8x8x8xf32>
    %218 = math.exp %217 : vector<8x8x8xf32>
    %cst_71 = arith.constant dense<0.000000e+00> : vector<8x8xf32>
    %219 = vector.multi_reduction <add>, %218, %cst_71 [2] : vector<8x8x8xf32> to vector<8x8xf32>
    %220 = vector.shape_cast %219 : vector<8x8xf32> to vector<8x8x1xf32>
    %221 = tpu.reciprocal %220 {approx = true} : vector<8x8x1xf32> -> vector<8x8x1xf32>
    %222 = vector.broadcast %221 : vector<8x8x1xf32> to vector<8x8x8xf32>
    %223 = arith.mulf %218, %222 : vector<8x8x8xf32>
    "tpu.trace_start"() <{level = 10 : i32, message = "bqk,bkd->bqd"}> : () -> ()
    %cst_72 = arith.constant dense<0.000000e+00> : vector<8x8x8xf32>
    %224 = tpu.matmul %223, %208, %cst_72 {dimension_numbers = #tpu.dot_dimension_numbers<[2], [1], [1], [2], [0, 0, 0, 1, 1, 2], [0], [0]>} : vector<8x8x8xf32>, vector<8x8x8xf32>, vector<8x8x8xf32> -> vector<8x8x8xf32>
    "tpu.trace_stop"() : () -> ()
    %225 = vector.extract_strided_slice %224 {offsets = [0, 0, 0], sizes = [2, 8, 8], strides = [1, 1, 1]} : vector<8x8x8xf32> to vector<2x8x8xf32>
    %226 = vector.extract_strided_slice %224 {offsets = [2, 0, 0], sizes = [2, 8, 8], strides = [1, 1, 1]} : vector<8x8x8xf32> to vector<2x8x8xf32>
    %227 = vector.extract_strided_slice %224 {offsets = [4, 0, 0], sizes = [2, 8, 8], strides = [1, 1, 1]} : vector<8x8x8xf32> to vector<2x8x8xf32>
    %228 = vector.extract_strided_slice %224 {offsets = [6, 0, 0], sizes = [2, 8, 8], strides = [1, 1, 1]} : vector<8x8x8xf32> to vector<2x8x8xf32>
    %229 = tpu.concatenate %225, %226, %227, %228 in 2 : vector<2x8x8xf32>, vector<2x8x8xf32>, vector<2x8x8xf32>, vector<2x8x8xf32> -> vector<2x8x32xf32>
    %230 = vector.shape_cast %229 : vector<2x8x32xf32> to vector<16x32xf32>
    %c1_73 = arith.constant 1 : index
    %c0_74 = arith.constant 0 : index
    %c0_75 = arith.constant 0 : index
    %231 = vector.load %arg6[%c1_73, %c0_74, %c0_75] : memref<2x32x32xf32, #tpu.memory_space<vmem>>, vector<1x32x32xf32>
    %232 = vector.shape_cast %231 : vector<1x32x32xf32> to vector<32x32xf32>
    %cst_76 = arith.constant dense<0.000000e+00> : vector<16x32xf32>
    %233 = tpu.matmul %230, %232, %cst_76 {dimension_numbers = #tpu.dot_dimension_numbers<[1], [0], [0], [1], [0, 0, 1, 1], [], []>} : vector<16x32xf32>, vector<32x32xf32>, vector<16x32xf32> -> vector<16x32xf32>
    %c11 = arith.constant 11 : index
    %c0_77 = arith.constant 0 : index
    %234 = vector.load %arg10[%c11, %c0_77] : memref<56x128xf32, #tpu.memory_space<vmem>>, vector<1x32xf32>
    %235 = vector.broadcast %234 : vector<1x32xf32> to vector<16x32xf32>
    %236 = arith.addf %233, %235 : vector<16x32xf32>
    %237 = arith.addf %181, %236 : vector<16x32xf32>
    %c12 = arith.constant 12 : index
    %c0_78 = arith.constant 0 : index
    %238 = vector.load %arg10[%c12, %c0_78] : memref<56x128xf32, #tpu.memory_space<vmem>>, vector<1x32xf32>
    %c13 = arith.constant 13 : index
    %c0_79 = arith.constant 0 : index
    %239 = vector.load %arg10[%c13, %c0_79] : memref<56x128xf32, #tpu.memory_space<vmem>>, vector<1x32xf32>
    %cst_80 = arith.constant dense<0.000000e+00> : vector<16xf32>
    %240 = vector.multi_reduction <add>, %237, %cst_80 [1] : vector<16x32xf32> to vector<16xf32>
    %241 = vector.shape_cast %240 : vector<16xf32> to vector<16x1xf32>
    %cst_81 = arith.constant 3.200000e+01 : f32
    %242 = vector.broadcast %cst_81 : f32 to vector<16x1xf32>
    %243 = arith.divf %241, %242 : vector<16x1xf32>
    %244 = vector.broadcast %243 : vector<16x1xf32> to vector<16x32xf32>
    %245 = arith.subf %237, %244 : vector<16x32xf32>
    %246 = arith.mulf %245, %245 : vector<16x32xf32>
    %cst_82 = arith.constant dense<0.000000e+00> : vector<16xf32>
    %247 = vector.multi_reduction <add>, %246, %cst_82 [1] : vector<16x32xf32> to vector<16xf32>
    %248 = vector.shape_cast %247 : vector<16xf32> to vector<16x1xf32>
    %cst_83 = arith.constant 3.200000e+01 : f32
    %249 = vector.broadcast %cst_83 : f32 to vector<16x1xf32>
    %250 = arith.divf %248, %249 : vector<16x1xf32>
    %251 = vector.broadcast %243 : vector<16x1xf32> to vector<16x32xf32>
    %252 = arith.subf %237, %251 : vector<16x32xf32>
    %cst_84 = arith.constant 9.99999996E-13 : f32
    %253 = vector.broadcast %cst_84 : f32 to vector<16x1xf32>
    %254 = arith.addf %250, %253 : vector<16x1xf32>
    %255 = math.rsqrt %254 : vector<16x1xf32>
    %256 = vector.broadcast %255 : vector<16x1xf32> to vector<16x32xf32>
    %257 = arith.mulf %252, %256 : vector<16x32xf32>
    %258 = vector.broadcast %238 : vector<1x32xf32> to vector<16x32xf32>
    %259 = arith.mulf %257, %258 : vector<16x32xf32>
    %260 = vector.broadcast %239 : vector<1x32xf32> to vector<16x32xf32>
    %261 = arith.addf %259, %260 : vector<16x32xf32>
    %c1_85 = arith.constant 1 : index
    %c0_86 = arith.constant 0 : index
    %c0_87 = arith.constant 0 : index
    %262 = vector.load %arg7[%c1_85, %c0_86, %c0_87] : memref<2x32x64xf32, #tpu.memory_space<vmem>>, vector<1x32x64xf32>
    %263 = vector.shape_cast %262 : vector<1x32x64xf32> to vector<32x64xf32>
    %cst_88 = arith.constant dense<0.000000e+00> : vector<16x64xf32>
    %264 = tpu.matmul %261, %263, %cst_88 {dimension_numbers = #tpu.dot_dimension_numbers<[1], [0], [0], [1], [0, 0, 1, 1], [], []>} : vector<16x32xf32>, vector<32x64xf32>, vector<16x64xf32> -> vector<16x64xf32>
    %c14 = arith.constant 14 : index
    %c0_89 = arith.constant 0 : index
    %265 = vector.load %arg10[%c14, %c0_89] : memref<56x128xf32, #tpu.memory_space<vmem>>, vector<1x64xf32>
    %266 = vector.broadcast %265 : vector<1x64xf32> to vector<16x64xf32>
    %267 = arith.addf %264, %266 : vector<16x64xf32>
    %268 = arith.mulf %267, %267 : vector<16x64xf32>
    %269 = arith.mulf %267, %268 : vector<16x64xf32>
    %cst_90 = arith.constant 4.471500e-02 : f32
    %270 = vector.broadcast %cst_90 : f32 to vector<16x64xf32>
    %271 = arith.mulf %270, %269 : vector<16x64xf32>
    %272 = arith.addf %267, %271 : vector<16x64xf32>
    %cst_91 = arith.constant 0.797884583 : f32
    %273 = vector.broadcast %cst_91 : f32 to vector<16x64xf32>
    %274 = arith.mulf %273, %272 : vector<16x64xf32>
    %275 = math.tanh %274 : vector<16x64xf32>
    %cst_92 = arith.constant 1.000000e+00 : f32
    %276 = vector.broadcast %cst_92 : f32 to vector<16x64xf32>
    %277 = arith.addf %276, %275 : vector<16x64xf32>
    %cst_93 = arith.constant 5.000000e-01 : f32
    %278 = vector.broadcast %cst_93 : f32 to vector<16x64xf32>
    %279 = arith.mulf %278, %277 : vector<16x64xf32>
    %280 = arith.mulf %267, %279 : vector<16x64xf32>
    %c1_94 = arith.constant 1 : index
    %c0_95 = arith.constant 0 : index
    %c0_96 = arith.constant 0 : index
    %281 = vector.load %arg8[%c1_94, %c0_95, %c0_96] : memref<2x64x32xf32, #tpu.memory_space<vmem>>, vector<1x64x32xf32>
    %282 = vector.shape_cast %281 : vector<1x64x32xf32> to vector<64x32xf32>
    %cst_97 = arith.constant dense<0.000000e+00> : vector<16x32xf32>
    %283 = tpu.matmul %280, %282, %cst_97 {dimension_numbers = #tpu.dot_dimension_numbers<[1], [0], [0], [1], [0, 0, 1, 1], [], []>} : vector<16x64xf32>, vector<64x32xf32>, vector<16x32xf32> -> vector<16x32xf32>
    %284 = arith.addf %261, %283 : vector<16x32xf32>
    %c15 = arith.constant 15 : index
    %c0_98 = arith.constant 0 : index
    %285 = vector.load %arg10[%c15, %c0_98] : memref<56x128xf32, #tpu.memory_space<vmem>>, vector<1x32xf32>
    %286 = vector.broadcast %285 : vector<1x32xf32> to vector<16x32xf32>
    %287 = arith.addf %284, %286 : vector<16x32xf32>
    %c16 = arith.constant 16 : index
    %c0_99 = arith.constant 0 : index
    %288 = vector.load %arg10[%c16, %c0_99] : memref<56x128xf32, #tpu.memory_space<vmem>>, vector<1x32xf32>
    %c17 = arith.constant 17 : index
    %c0_100 = arith.constant 0 : index
    %289 = vector.load %arg10[%c17, %c0_100] : memref<56x128xf32, #tpu.memory_space<vmem>>, vector<1x32xf32>
    %cst_101 = arith.constant dense<0.000000e+00> : vector<16xf32>
    %290 = vector.multi_reduction <add>, %287, %cst_101 [1] : vector<16x32xf32> to vector<16xf32>
    %291 = vector.shape_cast %290 : vector<16xf32> to vector<16x1xf32>
    %cst_102 = arith.constant 3.200000e+01 : f32
    %292 = vector.broadcast %cst_102 : f32 to vector<16x1xf32>
    %293 = arith.divf %291, %292 : vector<16x1xf32>
    %294 = vector.broadcast %293 : vector<16x1xf32> to vector<16x32xf32>
    %295 = arith.subf %287, %294 : vector<16x32xf32>
    %296 = arith.mulf %295, %295 : vector<16x32xf32>
    %cst_103 = arith.constant dense<0.000000e+00> : vector<16xf32>
    %297 = vector.multi_reduction <add>, %296, %cst_103 [1] : vector<16x32xf32> to vector<16xf32>
    %298 = vector.shape_cast %297 : vector<16xf32> to vector<16x1xf32>
    %cst_104 = arith.constant 3.200000e+01 : f32
    %299 = vector.broadcast %cst_104 : f32 to vector<16x1xf32>
    %300 = arith.divf %298, %299 : vector<16x1xf32>
    %301 = vector.broadcast %293 : vector<16x1xf32> to vector<16x32xf32>
    %302 = arith.subf %287, %301 : vector<16x32xf32>
    %cst_105 = arith.constant 9.99999996E-13 : f32
    %303 = vector.broadcast %cst_105 : f32 to vector<16x1xf32>
    %304 = arith.addf %300, %303 : vector<16x1xf32>
    %305 = math.rsqrt %304 : vector<16x1xf32>
    %306 = vector.broadcast %305 : vector<16x1xf32> to vector<16x32xf32>
    %307 = arith.mulf %302, %306 : vector<16x32xf32>
    %308 = vector.broadcast %288 : vector<1x32xf32> to vector<16x32xf32>
    %309 = arith.mulf %307, %308 : vector<16x32xf32>
    %310 = vector.broadcast %289 : vector<1x32xf32> to vector<16x32xf32>
    %311 = arith.addf %309, %310 : vector<16x32xf32>
    %312 = vector.shape_cast %311 : vector<16x32xf32> to vector<2x8x32xf32>
    %313 = vector.extract_strided_slice %312 {offsets = [0, 0, 0], sizes = [2, 1, 32], strides = [1, 1, 1]} : vector<2x8x32xf32> to vector<2x1x32xf32>
    %314 = vector.shape_cast %313 : vector<2x1x32xf32> to vector<2x32xf32>
    %315 = vector.extract_strided_slice %312 {offsets = [0, 1, 0], sizes = [2, 1, 32], strides = [1, 1, 1]} : vector<2x8x32xf32> to vector<2x1x32xf32>
    %316 = vector.shape_cast %315 : vector<2x1x32xf32> to vector<2x32xf32>
    %317 = vector.extract_strided_slice %312 {offsets = [0, 2, 0], sizes = [2, 1, 32], strides = [1, 1, 1]} : vector<2x8x32xf32> to vector<2x1x32xf32>
    %318 = vector.shape_cast %317 : vector<2x1x32xf32> to vector<2x32xf32>
    %319 = vector.extract_strided_slice %312 {offsets = [0, 3, 0], sizes = [2, 1, 32], strides = [1, 1, 1]} : vector<2x8x32xf32> to vector<2x1x32xf32>
    %320 = vector.shape_cast %319 : vector<2x1x32xf32> to vector<2x32xf32>
    %321 = vector.extract_strided_slice %312 {offsets = [0, 4, 0], sizes = [2, 1, 32], strides = [1, 1, 1]} : vector<2x8x32xf32> to vector<2x1x32xf32>
    %322 = vector.shape_cast %321 : vector<2x1x32xf32> to vector<2x32xf32>
    %323 = vector.extract_strided_slice %312 {offsets = [0, 5, 0], sizes = [2, 1, 32], strides = [1, 1, 1]} : vector<2x8x32xf32> to vector<2x1x32xf32>
    %324 = vector.shape_cast %323 : vector<2x1x32xf32> to vector<2x32xf32>
    %325 = vector.extract_strided_slice %312 {offsets = [0, 6, 0], sizes = [2, 1, 32], strides = [1, 1, 1]} : vector<2x8x32xf32> to vector<2x1x32xf32>
    %326 = vector.shape_cast %325 : vector<2x1x32xf32> to vector<2x32xf32>
    %327 = vector.extract_strided_slice %312 {offsets = [0, 7, 0], sizes = [2, 1, 32], strides = [1, 1, 1]} : vector<2x8x32xf32> to vector<2x1x32xf32>
    %328 = vector.shape_cast %327 : vector<2x1x32xf32> to vector<2x32xf32>
    %329 = tpu.iota {dimensions = array<i32: 0>} : vector<4x1xi32>
    %c2_i32 = arith.constant 2 : i32
    %330 = vector.broadcast %c2_i32 : i32 to vector<4x1xi32>
    %331 = arith.cmpi slt, %329, %330 : vector<4x1xi32>
    %c0_106 = arith.constant 0 : index
    %c0_107 = arith.constant 0 : index
    %c0_108 = arith.constant 0 : index
    %332 = vector.load %arg9[%c0_106, %c0_107, %c0_108] : memref<2x48x128xf32, #tpu.memory_space<vmem>>, vector<1x48x128xf32>
    %333 = vector.shape_cast %332 : vector<1x48x128xf32> to vector<48x128xf32>
    %c18 = arith.constant 18 : index
    %c0_109 = arith.constant 0 : index
    %334 = vector.load %arg10[%c18, %c0_109] : memref<56x128xf32, #tpu.memory_space<vmem>>, vector<1x128xf32>
    %cst_110 = arith.constant 0.000000e+00 : f32
    %335 = vector.broadcast %cst_110 : f32 to vector<4x16xf32>
    %cst_111 = arith.constant 0.000000e+00 : f32
    %336 = vector.broadcast %cst_111 : f32 to vector<4x16xf32>
    %337 = tpu.concatenate %314, %328 in 0 : vector<2x32xf32>, vector<2x32xf32> -> vector<4x32xf32>
    %338 = tpu.concatenate %337, %335 in 1 : vector<4x32xf32>, vector<4x16xf32> -> vector<4x48xf32>
    %cst_112 = arith.constant dense<0.000000e+00> : vector<4x128xf32>
    %339 = tpu.matmul %338, %333, %cst_112 {dimension_numbers = #tpu.dot_dimension_numbers<[1], [0], [0], [1], [0, 0, 1, 1], [], []>} : vector<4x48xf32>, vector<48x128xf32>, vector<4x128xf32> -> vector<4x128xf32>
    %340 = vector.broadcast %334 : vector<1x128xf32> to vector<4x128xf32>
    %341 = arith.addf %339, %340 : vector<4x128xf32>
    %342 = vector.extract_strided_slice %341 {offsets = [0, 0], sizes = [4, 64], strides = [1, 1]} : vector<4x128xf32> to vector<4x64xf32>
    %343 = vector.extract_strided_slice %341 {offsets = [0, 64], sizes = [4, 64], strides = [1, 1]} : vector<4x128xf32> to vector<4x64xf32>
    %344 = vector.shape_cast %331 : vector<4x1xi1> to vector<4x1xi1>
    %345 = vector.broadcast %344 : vector<4x1xi1> to vector<4x64xi1>
    %346 = arith.select %345, %342, %343 : vector<4x64xi1>, vector<4x64xf32>
    %347 = vector.extract_strided_slice %346 {offsets = [0, 0], sizes = [4, 16], strides = [1, 1]} : vector<4x64xf32> to vector<4x16xf32>
    %348 = arith.negf %347 : vector<4x16xf32>
    %349 = math.exp %348 : vector<4x16xf32>
    %cst_113 = arith.constant 1.000000e+00 : f32
    %350 = vector.broadcast %cst_113 : f32 to vector<4x16xf32>
    %351 = arith.addf %350, %349 : vector<4x16xf32>
    %352 = arith.divf %350, %351 : vector<4x16xf32>
    %353 = vector.extract_strided_slice %346 {offsets = [0, 16], sizes = [4, 16], strides = [1, 1]} : vector<4x64xf32> to vector<4x16xf32>
    %354 = arith.negf %353 : vector<4x16xf32>
    %355 = math.exp %354 : vector<4x16xf32>
    %cst_114 = arith.constant 1.000000e+00 : f32
    %356 = vector.broadcast %cst_114 : f32 to vector<4x16xf32>
    %357 = arith.addf %356, %355 : vector<4x16xf32>
    %358 = arith.divf %356, %357 : vector<4x16xf32>
    %359 = vector.extract_strided_slice %346 {offsets = [0, 32], sizes = [4, 16], strides = [1, 1]} : vector<4x64xf32> to vector<4x16xf32>
    %360 = math.tanh %359 : vector<4x16xf32>
    %361 = vector.extract_strided_slice %346 {offsets = [0, 48], sizes = [4, 16], strides = [1, 1]} : vector<4x64xf32> to vector<4x16xf32>
    %362 = arith.negf %361 : vector<4x16xf32>
    %363 = math.exp %362 : vector<4x16xf32>
    %cst_115 = arith.constant 1.000000e+00 : f32
    %364 = vector.broadcast %cst_115 : f32 to vector<4x16xf32>
    %365 = arith.addf %364, %363 : vector<4x16xf32>
    %366 = arith.divf %364, %365 : vector<4x16xf32>
    %367 = arith.mulf %358, %336 : vector<4x16xf32>
    %368 = arith.mulf %352, %360 : vector<4x16xf32>
    %369 = arith.addf %367, %368 : vector<4x16xf32>
    %370 = math.tanh %369 : vector<4x16xf32>
    %371 = arith.mulf %366, %370 : vector<4x16xf32>
    %372 = vector.extract_strided_slice %371 {offsets = [0, 0], sizes = [2, 16], strides = [1, 1]} : vector<4x16xf32> to vector<2x16xf32>
    %373 = vector.extract_strided_slice %371 {offsets = [2, 0], sizes = [2, 16], strides = [1, 1]} : vector<4x16xf32> to vector<2x16xf32>
    %374 = tpu.concatenate %316, %326 in 0 : vector<2x32xf32>, vector<2x32xf32> -> vector<4x32xf32>
    %375 = tpu.concatenate %374, %371 in 1 : vector<4x32xf32>, vector<4x16xf32> -> vector<4x48xf32>
    %cst_116 = arith.constant dense<0.000000e+00> : vector<4x128xf32>
    %376 = tpu.matmul %375, %333, %cst_116 {dimension_numbers = #tpu.dot_dimension_numbers<[1], [0], [0], [1], [0, 0, 1, 1], [], []>} : vector<4x48xf32>, vector<48x128xf32>, vector<4x128xf32> -> vector<4x128xf32>
    %377 = vector.broadcast %334 : vector<1x128xf32> to vector<4x128xf32>
    %378 = arith.addf %376, %377 : vector<4x128xf32>
    %379 = vector.extract_strided_slice %378 {offsets = [0, 0], sizes = [4, 64], strides = [1, 1]} : vector<4x128xf32> to vector<4x64xf32>
    %380 = vector.extract_strided_slice %378 {offsets = [0, 64], sizes = [4, 64], strides = [1, 1]} : vector<4x128xf32> to vector<4x64xf32>
    %381 = vector.shape_cast %331 : vector<4x1xi1> to vector<4x1xi1>
    %382 = vector.broadcast %381 : vector<4x1xi1> to vector<4x64xi1>
    %383 = arith.select %382, %379, %380 : vector<4x64xi1>, vector<4x64xf32>
    %384 = vector.extract_strided_slice %383 {offsets = [0, 0], sizes = [4, 16], strides = [1, 1]} : vector<4x64xf32> to vector<4x16xf32>
    %385 = arith.negf %384 : vector<4x16xf32>
    %386 = math.exp %385 : vector<4x16xf32>
    %cst_117 = arith.constant 1.000000e+00 : f32
    %387 = vector.broadcast %cst_117 : f32 to vector<4x16xf32>
    %388 = arith.addf %387, %386 : vector<4x16xf32>
    %389 = arith.divf %387, %388 : vector<4x16xf32>
    %390 = vector.extract_strided_slice %383 {offsets = [0, 16], sizes = [4, 16], strides = [1, 1]} : vector<4x64xf32> to vector<4x16xf32>
    %391 = arith.negf %390 : vector<4x16xf32>
    %392 = math.exp %391 : vector<4x16xf32>
    %cst_118 = arith.constant 1.000000e+00 : f32
    %393 = vector.broadcast %cst_118 : f32 to vector<4x16xf32>
    %394 = arith.addf %393, %392 : vector<4x16xf32>
    %395 = arith.divf %393, %394 : vector<4x16xf32>
    %396 = vector.extract_strided_slice %383 {offsets = [0, 32], sizes = [4, 16], strides = [1, 1]} : vector<4x64xf32> to vector<4x16xf32>
    %397 = math.tanh %396 : vector<4x16xf32>
    %398 = vector.extract_strided_slice %383 {offsets = [0, 48], sizes = [4, 16], strides = [1, 1]} : vector<4x64xf32> to vector<4x16xf32>
    %399 = arith.negf %398 : vector<4x16xf32>
    %400 = math.exp %399 : vector<4x16xf32>
    %cst_119 = arith.constant 1.000000e+00 : f32
    %401 = vector.broadcast %cst_119 : f32 to vector<4x16xf32>
    %402 = arith.addf %401, %400 : vector<4x16xf32>
    %403 = arith.divf %401, %402 : vector<4x16xf32>
    %404 = arith.mulf %395, %369 : vector<4x16xf32>
    %405 = arith.mulf %389, %397 : vector<4x16xf32>
    %406 = arith.addf %404, %405 : vector<4x16xf32>
    %407 = math.tanh %406 : vector<4x16xf32>
    %408 = arith.mulf %403, %407 : vector<4x16xf32>
    %409 = vector.extract_strided_slice %408 {offsets = [0, 0], sizes = [2, 16], strides = [1, 1]} : vector<4x16xf32> to vector<2x16xf32>
    %410 = vector.extract_strided_slice %408 {offsets = [2, 0], sizes = [2, 16], strides = [1, 1]} : vector<4x16xf32> to vector<2x16xf32>
    %411 = tpu.concatenate %318, %324 in 0 : vector<2x32xf32>, vector<2x32xf32> -> vector<4x32xf32>
    %412 = tpu.concatenate %411, %408 in 1 : vector<4x32xf32>, vector<4x16xf32> -> vector<4x48xf32>
    %cst_120 = arith.constant dense<0.000000e+00> : vector<4x128xf32>
    %413 = tpu.matmul %412, %333, %cst_120 {dimension_numbers = #tpu.dot_dimension_numbers<[1], [0], [0], [1], [0, 0, 1, 1], [], []>} : vector<4x48xf32>, vector<48x128xf32>, vector<4x128xf32> -> vector<4x128xf32>
    %414 = vector.broadcast %334 : vector<1x128xf32> to vector<4x128xf32>
    %415 = arith.addf %413, %414 : vector<4x128xf32>
    %416 = vector.extract_strided_slice %415 {offsets = [0, 0], sizes = [4, 64], strides = [1, 1]} : vector<4x128xf32> to vector<4x64xf32>
    %417 = vector.extract_strided_slice %415 {offsets = [0, 64], sizes = [4, 64], strides = [1, 1]} : vector<4x128xf32> to vector<4x64xf32>
    %418 = vector.shape_cast %331 : vector<4x1xi1> to vector<4x1xi1>
    %419 = vector.broadcast %418 : vector<4x1xi1> to vector<4x64xi1>
    %420 = arith.select %419, %416, %417 : vector<4x64xi1>, vector<4x64xf32>
    %421 = vector.extract_strided_slice %420 {offsets = [0, 0], sizes = [4, 16], strides = [1, 1]} : vector<4x64xf32> to vector<4x16xf32>
    %422 = arith.negf %421 : vector<4x16xf32>
    %423 = math.exp %422 : vector<4x16xf32>
    %cst_121 = arith.constant 1.000000e+00 : f32
    %424 = vector.broadcast %cst_121 : f32 to vector<4x16xf32>
    %425 = arith.addf %424, %423 : vector<4x16xf32>
    %426 = arith.divf %424, %425 : vector<4x16xf32>
    %427 = vector.extract_strided_slice %420 {offsets = [0, 16], sizes = [4, 16], strides = [1, 1]} : vector<4x64xf32> to vector<4x16xf32>
    %428 = arith.negf %427 : vector<4x16xf32>
    %429 = math.exp %428 : vector<4x16xf32>
    %cst_122 = arith.constant 1.000000e+00 : f32
    %430 = vector.broadcast %cst_122 : f32 to vector<4x16xf32>
    %431 = arith.addf %430, %429 : vector<4x16xf32>
    %432 = arith.divf %430, %431 : vector<4x16xf32>
    %433 = vector.extract_strided_slice %420 {offsets = [0, 32], sizes = [4, 16], strides = [1, 1]} : vector<4x64xf32> to vector<4x16xf32>
    %434 = math.tanh %433 : vector<4x16xf32>
    %435 = vector.extract_strided_slice %420 {offsets = [0, 48], sizes = [4, 16], strides = [1, 1]} : vector<4x64xf32> to vector<4x16xf32>
    %436 = arith.negf %435 : vector<4x16xf32>
    %437 = math.exp %436 : vector<4x16xf32>
    %cst_123 = arith.constant 1.000000e+00 : f32
    %438 = vector.broadcast %cst_123 : f32 to vector<4x16xf32>
    %439 = arith.addf %438, %437 : vector<4x16xf32>
    %440 = arith.divf %438, %439 : vector<4x16xf32>
    %441 = arith.mulf %432, %406 : vector<4x16xf32>
    %442 = arith.mulf %426, %434 : vector<4x16xf32>
    %443 = arith.addf %441, %442 : vector<4x16xf32>
    %444 = math.tanh %443 : vector<4x16xf32>
    %445 = arith.mulf %440, %444 : vector<4x16xf32>
    %446 = vector.extract_strided_slice %445 {offsets = [0, 0], sizes = [2, 16], strides = [1, 1]} : vector<4x16xf32> to vector<2x16xf32>
    %447 = vector.extract_strided_slice %445 {offsets = [2, 0], sizes = [2, 16], strides = [1, 1]} : vector<4x16xf32> to vector<2x16xf32>
    %448 = tpu.concatenate %320, %322 in 0 : vector<2x32xf32>, vector<2x32xf32> -> vector<4x32xf32>
    %449 = tpu.concatenate %448, %445 in 1 : vector<4x32xf32>, vector<4x16xf32> -> vector<4x48xf32>
    %cst_124 = arith.constant dense<0.000000e+00> : vector<4x128xf32>
    %450 = tpu.matmul %449, %333, %cst_124 {dimension_numbers = #tpu.dot_dimension_numbers<[1], [0], [0], [1], [0, 0, 1, 1], [], []>} : vector<4x48xf32>, vector<48x128xf32>, vector<4x128xf32> -> vector<4x128xf32>
    %451 = vector.broadcast %334 : vector<1x128xf32> to vector<4x128xf32>
    %452 = arith.addf %450, %451 : vector<4x128xf32>
    %453 = vector.extract_strided_slice %452 {offsets = [0, 0], sizes = [4, 64], strides = [1, 1]} : vector<4x128xf32> to vector<4x64xf32>
    %454 = vector.extract_strided_slice %452 {offsets = [0, 64], sizes = [4, 64], strides = [1, 1]} : vector<4x128xf32> to vector<4x64xf32>
    %455 = vector.shape_cast %331 : vector<4x1xi1> to vector<4x1xi1>
    %456 = vector.broadcast %455 : vector<4x1xi1> to vector<4x64xi1>
    %457 = arith.select %456, %453, %454 : vector<4x64xi1>, vector<4x64xf32>
    %458 = vector.extract_strided_slice %457 {offsets = [0, 0], sizes = [4, 16], strides = [1, 1]} : vector<4x64xf32> to vector<4x16xf32>
    %459 = arith.negf %458 : vector<4x16xf32>
    %460 = math.exp %459 : vector<4x16xf32>
    %cst_125 = arith.constant 1.000000e+00 : f32
    %461 = vector.broadcast %cst_125 : f32 to vector<4x16xf32>
    %462 = arith.addf %461, %460 : vector<4x16xf32>
    %463 = arith.divf %461, %462 : vector<4x16xf32>
    %464 = vector.extract_strided_slice %457 {offsets = [0, 16], sizes = [4, 16], strides = [1, 1]} : vector<4x64xf32> to vector<4x16xf32>
    %465 = arith.negf %464 : vector<4x16xf32>
    %466 = math.exp %465 : vector<4x16xf32>
    %cst_126 = arith.constant 1.000000e+00 : f32
    %467 = vector.broadcast %cst_126 : f32 to vector<4x16xf32>
    %468 = arith.addf %467, %466 : vector<4x16xf32>
    %469 = arith.divf %467, %468 : vector<4x16xf32>
    %470 = vector.extract_strided_slice %457 {offsets = [0, 32], sizes = [4, 16], strides = [1, 1]} : vector<4x64xf32> to vector<4x16xf32>
    %471 = math.tanh %470 : vector<4x16xf32>
    %472 = vector.extract_strided_slice %457 {offsets = [0, 48], sizes = [4, 16], strides = [1, 1]} : vector<4x64xf32> to vector<4x16xf32>
    %473 = arith.negf %472 : vector<4x16xf32>
    %474 = math.exp %473 : vector<4x16xf32>
    %cst_127 = arith.constant 1.000000e+00 : f32
    %475 = vector.broadcast %cst_127 : f32 to vector<4x16xf32>
    %476 = arith.addf %475, %474 : vector<4x16xf32>
    %477 = arith.divf %475, %476 : vector<4x16xf32>
    %478 = arith.mulf %469, %443 : vector<4x16xf32>
    %479 = arith.mulf %463, %471 : vector<4x16xf32>
    %480 = arith.addf %478, %479 : vector<4x16xf32>
    %481 = math.tanh %480 : vector<4x16xf32>
    %482 = arith.mulf %477, %481 : vector<4x16xf32>
    %483 = vector.extract_strided_slice %482 {offsets = [0, 0], sizes = [2, 16], strides = [1, 1]} : vector<4x16xf32> to vector<2x16xf32>
    %484 = vector.extract_strided_slice %482 {offsets = [2, 0], sizes = [2, 16], strides = [1, 1]} : vector<4x16xf32> to vector<2x16xf32>
    %485 = tpu.concatenate %322, %320 in 0 : vector<2x32xf32>, vector<2x32xf32> -> vector<4x32xf32>
    %486 = tpu.concatenate %485, %482 in 1 : vector<4x32xf32>, vector<4x16xf32> -> vector<4x48xf32>
    %cst_128 = arith.constant dense<0.000000e+00> : vector<4x128xf32>
    %487 = tpu.matmul %486, %333, %cst_128 {dimension_numbers = #tpu.dot_dimension_numbers<[1], [0], [0], [1], [0, 0, 1, 1], [], []>} : vector<4x48xf32>, vector<48x128xf32>, vector<4x128xf32> -> vector<4x128xf32>
    %488 = vector.broadcast %334 : vector<1x128xf32> to vector<4x128xf32>
    %489 = arith.addf %487, %488 : vector<4x128xf32>
    %490 = vector.extract_strided_slice %489 {offsets = [0, 0], sizes = [4, 64], strides = [1, 1]} : vector<4x128xf32> to vector<4x64xf32>
    %491 = vector.extract_strided_slice %489 {offsets = [0, 64], sizes = [4, 64], strides = [1, 1]} : vector<4x128xf32> to vector<4x64xf32>
    %492 = vector.shape_cast %331 : vector<4x1xi1> to vector<4x1xi1>
    %493 = vector.broadcast %492 : vector<4x1xi1> to vector<4x64xi1>
    %494 = arith.select %493, %490, %491 : vector<4x64xi1>, vector<4x64xf32>
    %495 = vector.extract_strided_slice %494 {offsets = [0, 0], sizes = [4, 16], strides = [1, 1]} : vector<4x64xf32> to vector<4x16xf32>
    %496 = arith.negf %495 : vector<4x16xf32>
    %497 = math.exp %496 : vector<4x16xf32>
    %cst_129 = arith.constant 1.000000e+00 : f32
    %498 = vector.broadcast %cst_129 : f32 to vector<4x16xf32>
    %499 = arith.addf %498, %497 : vector<4x16xf32>
    %500 = arith.divf %498, %499 : vector<4x16xf32>
    %501 = vector.extract_strided_slice %494 {offsets = [0, 16], sizes = [4, 16], strides = [1, 1]} : vector<4x64xf32> to vector<4x16xf32>
    %502 = arith.negf %501 : vector<4x16xf32>
    %503 = math.exp %502 : vector<4x16xf32>
    %cst_130 = arith.constant 1.000000e+00 : f32
    %504 = vector.broadcast %cst_130 : f32 to vector<4x16xf32>
    %505 = arith.addf %504, %503 : vector<4x16xf32>
    %506 = arith.divf %504, %505 : vector<4x16xf32>
    %507 = vector.extract_strided_slice %494 {offsets = [0, 32], sizes = [4, 16], strides = [1, 1]} : vector<4x64xf32> to vector<4x16xf32>
    %508 = math.tanh %507 : vector<4x16xf32>
    %509 = vector.extract_strided_slice %494 {offsets = [0, 48], sizes = [4, 16], strides = [1, 1]} : vector<4x64xf32> to vector<4x16xf32>
    %510 = arith.negf %509 : vector<4x16xf32>
    %511 = math.exp %510 : vector<4x16xf32>
    %cst_131 = arith.constant 1.000000e+00 : f32
    %512 = vector.broadcast %cst_131 : f32 to vector<4x16xf32>
    %513 = arith.addf %512, %511 : vector<4x16xf32>
    %514 = arith.divf %512, %513 : vector<4x16xf32>
    %515 = arith.mulf %506, %480 : vector<4x16xf32>
    %516 = arith.mulf %500, %508 : vector<4x16xf32>
    %517 = arith.addf %515, %516 : vector<4x16xf32>
    %518 = math.tanh %517 : vector<4x16xf32>
    %519 = arith.mulf %514, %518 : vector<4x16xf32>
    %520 = vector.extract_strided_slice %519 {offsets = [0, 0], sizes = [2, 16], strides = [1, 1]} : vector<4x16xf32> to vector<2x16xf32>
    %521 = vector.extract_strided_slice %519 {offsets = [2, 0], sizes = [2, 16], strides = [1, 1]} : vector<4x16xf32> to vector<2x16xf32>
    %522 = tpu.concatenate %324, %318 in 0 : vector<2x32xf32>, vector<2x32xf32> -> vector<4x32xf32>
    %523 = tpu.concatenate %522, %519 in 1 : vector<4x32xf32>, vector<4x16xf32> -> vector<4x48xf32>
    %cst_132 = arith.constant dense<0.000000e+00> : vector<4x128xf32>
    %524 = tpu.matmul %523, %333, %cst_132 {dimension_numbers = #tpu.dot_dimension_numbers<[1], [0], [0], [1], [0, 0, 1, 1], [], []>} : vector<4x48xf32>, vector<48x128xf32>, vector<4x128xf32> -> vector<4x128xf32>
    %525 = vector.broadcast %334 : vector<1x128xf32> to vector<4x128xf32>
    %526 = arith.addf %524, %525 : vector<4x128xf32>
    %527 = vector.extract_strided_slice %526 {offsets = [0, 0], sizes = [4, 64], strides = [1, 1]} : vector<4x128xf32> to vector<4x64xf32>
    %528 = vector.extract_strided_slice %526 {offsets = [0, 64], sizes = [4, 64], strides = [1, 1]} : vector<4x128xf32> to vector<4x64xf32>
    %529 = vector.shape_cast %331 : vector<4x1xi1> to vector<4x1xi1>
    %530 = vector.broadcast %529 : vector<4x1xi1> to vector<4x64xi1>
    %531 = arith.select %530, %527, %528 : vector<4x64xi1>, vector<4x64xf32>
    %532 = vector.extract_strided_slice %531 {offsets = [0, 0], sizes = [4, 16], strides = [1, 1]} : vector<4x64xf32> to vector<4x16xf32>
    %533 = arith.negf %532 : vector<4x16xf32>
    %534 = math.exp %533 : vector<4x16xf32>
    %cst_133 = arith.constant 1.000000e+00 : f32
    %535 = vector.broadcast %cst_133 : f32 to vector<4x16xf32>
    %536 = arith.addf %535, %534 : vector<4x16xf32>
    %537 = arith.divf %535, %536 : vector<4x16xf32>
    %538 = vector.extract_strided_slice %531 {offsets = [0, 16], sizes = [4, 16], strides = [1, 1]} : vector<4x64xf32> to vector<4x16xf32>
    %539 = arith.negf %538 : vector<4x16xf32>
    %540 = math.exp %539 : vector<4x16xf32>
    %cst_134 = arith.constant 1.000000e+00 : f32
    %541 = vector.broadcast %cst_134 : f32 to vector<4x16xf32>
    %542 = arith.addf %541, %540 : vector<4x16xf32>
    %543 = arith.divf %541, %542 : vector<4x16xf32>
    %544 = vector.extract_strided_slice %531 {offsets = [0, 32], sizes = [4, 16], strides = [1, 1]} : vector<4x64xf32> to vector<4x16xf32>
    %545 = math.tanh %544 : vector<4x16xf32>
    %546 = vector.extract_strided_slice %531 {offsets = [0, 48], sizes = [4, 16], strides = [1, 1]} : vector<4x64xf32> to vector<4x16xf32>
    %547 = arith.negf %546 : vector<4x16xf32>
    %548 = math.exp %547 : vector<4x16xf32>
    %cst_135 = arith.constant 1.000000e+00 : f32
    %549 = vector.broadcast %cst_135 : f32 to vector<4x16xf32>
    %550 = arith.addf %549, %548 : vector<4x16xf32>
    %551 = arith.divf %549, %550 : vector<4x16xf32>
    %552 = arith.mulf %543, %517 : vector<4x16xf32>
    %553 = arith.mulf %537, %545 : vector<4x16xf32>
    %554 = arith.addf %552, %553 : vector<4x16xf32>
    %555 = math.tanh %554 : vector<4x16xf32>
    %556 = arith.mulf %551, %555 : vector<4x16xf32>
    %557 = vector.extract_strided_slice %556 {offsets = [0, 0], sizes = [2, 16], strides = [1, 1]} : vector<4x16xf32> to vector<2x16xf32>
    %558 = vector.extract_strided_slice %556 {offsets = [2, 0], sizes = [2, 16], strides = [1, 1]} : vector<4x16xf32> to vector<2x16xf32>
    %559 = tpu.concatenate %326, %316 in 0 : vector<2x32xf32>, vector<2x32xf32> -> vector<4x32xf32>
    %560 = tpu.concatenate %559, %556 in 1 : vector<4x32xf32>, vector<4x16xf32> -> vector<4x48xf32>
    %cst_136 = arith.constant dense<0.000000e+00> : vector<4x128xf32>
    %561 = tpu.matmul %560, %333, %cst_136 {dimension_numbers = #tpu.dot_dimension_numbers<[1], [0], [0], [1], [0, 0, 1, 1], [], []>} : vector<4x48xf32>, vector<48x128xf32>, vector<4x128xf32> -> vector<4x128xf32>
    %562 = vector.broadcast %334 : vector<1x128xf32> to vector<4x128xf32>
    %563 = arith.addf %561, %562 : vector<4x128xf32>
    %564 = vector.extract_strided_slice %563 {offsets = [0, 0], sizes = [4, 64], strides = [1, 1]} : vector<4x128xf32> to vector<4x64xf32>
    %565 = vector.extract_strided_slice %563 {offsets = [0, 64], sizes = [4, 64], strides = [1, 1]} : vector<4x128xf32> to vector<4x64xf32>
    %566 = vector.shape_cast %331 : vector<4x1xi1> to vector<4x1xi1>
    %567 = vector.broadcast %566 : vector<4x1xi1> to vector<4x64xi1>
    %568 = arith.select %567, %564, %565 : vector<4x64xi1>, vector<4x64xf32>
    %569 = vector.extract_strided_slice %568 {offsets = [0, 0], sizes = [4, 16], strides = [1, 1]} : vector<4x64xf32> to vector<4x16xf32>
    %570 = arith.negf %569 : vector<4x16xf32>
    %571 = math.exp %570 : vector<4x16xf32>
    %cst_137 = arith.constant 1.000000e+00 : f32
    %572 = vector.broadcast %cst_137 : f32 to vector<4x16xf32>
    %573 = arith.addf %572, %571 : vector<4x16xf32>
    %574 = arith.divf %572, %573 : vector<4x16xf32>
    %575 = vector.extract_strided_slice %568 {offsets = [0, 16], sizes = [4, 16], strides = [1, 1]} : vector<4x64xf32> to vector<4x16xf32>
    %576 = arith.negf %575 : vector<4x16xf32>
    %577 = math.exp %576 : vector<4x16xf32>
    %cst_138 = arith.constant 1.000000e+00 : f32
    %578 = vector.broadcast %cst_138 : f32 to vector<4x16xf32>
    %579 = arith.addf %578, %577 : vector<4x16xf32>
    %580 = arith.divf %578, %579 : vector<4x16xf32>
    %581 = vector.extract_strided_slice %568 {offsets = [0, 32], sizes = [4, 16], strides = [1, 1]} : vector<4x64xf32> to vector<4x16xf32>
    %582 = math.tanh %581 : vector<4x16xf32>
    %583 = vector.extract_strided_slice %568 {offsets = [0, 48], sizes = [4, 16], strides = [1, 1]} : vector<4x64xf32> to vector<4x16xf32>
    %584 = arith.negf %583 : vector<4x16xf32>
    %585 = math.exp %584 : vector<4x16xf32>
    %cst_139 = arith.constant 1.000000e+00 : f32
    %586 = vector.broadcast %cst_139 : f32 to vector<4x16xf32>
    %587 = arith.addf %586, %585 : vector<4x16xf32>
    %588 = arith.divf %586, %587 : vector<4x16xf32>
    %589 = arith.mulf %580, %554 : vector<4x16xf32>
    %590 = arith.mulf %574, %582 : vector<4x16xf32>
    %591 = arith.addf %589, %590 : vector<4x16xf32>
    %592 = math.tanh %591 : vector<4x16xf32>
    %593 = arith.mulf %588, %592 : vector<4x16xf32>
    %594 = vector.extract_strided_slice %593 {offsets = [0, 0], sizes = [2, 16], strides = [1, 1]} : vector<4x16xf32> to vector<2x16xf32>
    %595 = vector.extract_strided_slice %593 {offsets = [2, 0], sizes = [2, 16], strides = [1, 1]} : vector<4x16xf32> to vector<2x16xf32>
    %596 = tpu.concatenate %328, %314 in 0 : vector<2x32xf32>, vector<2x32xf32> -> vector<4x32xf32>
    %597 = tpu.concatenate %596, %593 in 1 : vector<4x32xf32>, vector<4x16xf32> -> vector<4x48xf32>
    %cst_140 = arith.constant dense<0.000000e+00> : vector<4x128xf32>
    %598 = tpu.matmul %597, %333, %cst_140 {dimension_numbers = #tpu.dot_dimension_numbers<[1], [0], [0], [1], [0, 0, 1, 1], [], []>} : vector<4x48xf32>, vector<48x128xf32>, vector<4x128xf32> -> vector<4x128xf32>
    %599 = vector.broadcast %334 : vector<1x128xf32> to vector<4x128xf32>
    %600 = arith.addf %598, %599 : vector<4x128xf32>
    %601 = vector.extract_strided_slice %600 {offsets = [0, 0], sizes = [4, 64], strides = [1, 1]} : vector<4x128xf32> to vector<4x64xf32>
    %602 = vector.extract_strided_slice %600 {offsets = [0, 64], sizes = [4, 64], strides = [1, 1]} : vector<4x128xf32> to vector<4x64xf32>
    %603 = vector.shape_cast %331 : vector<4x1xi1> to vector<4x1xi1>
    %604 = vector.broadcast %603 : vector<4x1xi1> to vector<4x64xi1>
    %605 = arith.select %604, %601, %602 : vector<4x64xi1>, vector<4x64xf32>
    %606 = vector.extract_strided_slice %605 {offsets = [0, 0], sizes = [4, 16], strides = [1, 1]} : vector<4x64xf32> to vector<4x16xf32>
    %607 = arith.negf %606 : vector<4x16xf32>
    %608 = math.exp %607 : vector<4x16xf32>
    %cst_141 = arith.constant 1.000000e+00 : f32
    %609 = vector.broadcast %cst_141 : f32 to vector<4x16xf32>
    %610 = arith.addf %609, %608 : vector<4x16xf32>
    %611 = arith.divf %609, %610 : vector<4x16xf32>
    %612 = vector.extract_strided_slice %605 {offsets = [0, 16], sizes = [4, 16], strides = [1, 1]} : vector<4x64xf32> to vector<4x16xf32>
    %613 = arith.negf %612 : vector<4x16xf32>
    %614 = math.exp %613 : vector<4x16xf32>
    %cst_142 = arith.constant 1.000000e+00 : f32
    %615 = vector.broadcast %cst_142 : f32 to vector<4x16xf32>
    %616 = arith.addf %615, %614 : vector<4x16xf32>
    %617 = arith.divf %615, %616 : vector<4x16xf32>
    %618 = vector.extract_strided_slice %605 {offsets = [0, 32], sizes = [4, 16], strides = [1, 1]} : vector<4x64xf32> to vector<4x16xf32>
    %619 = math.tanh %618 : vector<4x16xf32>
    %620 = vector.extract_strided_slice %605 {offsets = [0, 48], sizes = [4, 16], strides = [1, 1]} : vector<4x64xf32> to vector<4x16xf32>
    %621 = arith.negf %620 : vector<4x16xf32>
    %622 = math.exp %621 : vector<4x16xf32>
    %cst_143 = arith.constant 1.000000e+00 : f32
    %623 = vector.broadcast %cst_143 : f32 to vector<4x16xf32>
    %624 = arith.addf %623, %622 : vector<4x16xf32>
    %625 = arith.divf %623, %624 : vector<4x16xf32>
    %626 = arith.mulf %617, %591 : vector<4x16xf32>
    %627 = arith.mulf %611, %619 : vector<4x16xf32>
    %628 = arith.addf %626, %627 : vector<4x16xf32>
    %629 = math.tanh %628 : vector<4x16xf32>
    %630 = arith.mulf %625, %629 : vector<4x16xf32>
    %631 = vector.extract_strided_slice %630 {offsets = [0, 0], sizes = [2, 16], strides = [1, 1]} : vector<4x16xf32> to vector<2x16xf32>
    %632 = vector.extract_strided_slice %630 {offsets = [2, 0], sizes = [2, 16], strides = [1, 1]} : vector<4x16xf32> to vector<2x16xf32>
    %633 = tpu.concatenate %372, %632 in 1 : vector<2x16xf32>, vector<2x16xf32> -> vector<2x32xf32>
    %634 = tpu.concatenate %409, %595 in 1 : vector<2x16xf32>, vector<2x16xf32> -> vector<2x32xf32>
    %635 = tpu.concatenate %446, %558 in 1 : vector<2x16xf32>, vector<2x16xf32> -> vector<2x32xf32>
    %636 = tpu.concatenate %483, %521 in 1 : vector<2x16xf32>, vector<2x16xf32> -> vector<2x32xf32>
    %637 = tpu.concatenate %520, %484 in 1 : vector<2x16xf32>, vector<2x16xf32> -> vector<2x32xf32>
    %638 = tpu.concatenate %557, %447 in 1 : vector<2x16xf32>, vector<2x16xf32> -> vector<2x32xf32>
    %639 = tpu.concatenate %594, %410 in 1 : vector<2x16xf32>, vector<2x16xf32> -> vector<2x32xf32>
    %640 = tpu.concatenate %631, %373 in 1 : vector<2x16xf32>, vector<2x16xf32> -> vector<2x32xf32>
    %c1_144 = arith.constant 1 : index
    %c0_145 = arith.constant 0 : index
    %c0_146 = arith.constant 0 : index
    %641 = vector.load %arg9[%c1_144, %c0_145, %c0_146] : memref<2x48x128xf32, #tpu.memory_space<vmem>>, vector<1x48x128xf32>
    %642 = vector.shape_cast %641 : vector<1x48x128xf32> to vector<48x128xf32>
    %c19 = arith.constant 19 : index
    %c0_147 = arith.constant 0 : index
    %643 = vector.load %arg10[%c19, %c0_147] : memref<56x128xf32, #tpu.memory_space<vmem>>, vector<1x128xf32>
    %cst_148 = arith.constant 0.000000e+00 : f32
    %644 = vector.broadcast %cst_148 : f32 to vector<4x16xf32>
    %cst_149 = arith.constant 0.000000e+00 : f32
    %645 = vector.broadcast %cst_149 : f32 to vector<4x16xf32>
    %646 = tpu.concatenate %633, %640 in 0 : vector<2x32xf32>, vector<2x32xf32> -> vector<4x32xf32>
    %647 = tpu.concatenate %646, %644 in 1 : vector<4x32xf32>, vector<4x16xf32> -> vector<4x48xf32>
    %cst_150 = arith.constant dense<0.000000e+00> : vector<4x128xf32>
    %648 = tpu.matmul %647, %642, %cst_150 {dimension_numbers = #tpu.dot_dimension_numbers<[1], [0], [0], [1], [0, 0, 1, 1], [], []>} : vector<4x48xf32>, vector<48x128xf32>, vector<4x128xf32> -> vector<4x128xf32>
    %649 = vector.broadcast %643 : vector<1x128xf32> to vector<4x128xf32>
    %650 = arith.addf %648, %649 : vector<4x128xf32>
    %651 = vector.extract_strided_slice %650 {offsets = [0, 0], sizes = [4, 64], strides = [1, 1]} : vector<4x128xf32> to vector<4x64xf32>
    %652 = vector.extract_strided_slice %650 {offsets = [0, 64], sizes = [4, 64], strides = [1, 1]} : vector<4x128xf32> to vector<4x64xf32>
    %653 = vector.shape_cast %331 : vector<4x1xi1> to vector<4x1xi1>
    %654 = vector.broadcast %653 : vector<4x1xi1> to vector<4x64xi1>
    %655 = arith.select %654, %651, %652 : vector<4x64xi1>, vector<4x64xf32>
    %656 = vector.extract_strided_slice %655 {offsets = [0, 0], sizes = [4, 16], strides = [1, 1]} : vector<4x64xf32> to vector<4x16xf32>
    %657 = arith.negf %656 : vector<4x16xf32>
    %658 = math.exp %657 : vector<4x16xf32>
    %cst_151 = arith.constant 1.000000e+00 : f32
    %659 = vector.broadcast %cst_151 : f32 to vector<4x16xf32>
    %660 = arith.addf %659, %658 : vector<4x16xf32>
    %661 = arith.divf %659, %660 : vector<4x16xf32>
    %662 = vector.extract_strided_slice %655 {offsets = [0, 16], sizes = [4, 16], strides = [1, 1]} : vector<4x64xf32> to vector<4x16xf32>
    %663 = arith.negf %662 : vector<4x16xf32>
    %664 = math.exp %663 : vector<4x16xf32>
    %cst_152 = arith.constant 1.000000e+00 : f32
    %665 = vector.broadcast %cst_152 : f32 to vector<4x16xf32>
    %666 = arith.addf %665, %664 : vector<4x16xf32>
    %667 = arith.divf %665, %666 : vector<4x16xf32>
    %668 = vector.extract_strided_slice %655 {offsets = [0, 32], sizes = [4, 16], strides = [1, 1]} : vector<4x64xf32> to vector<4x16xf32>
    %669 = math.tanh %668 : vector<4x16xf32>
    %670 = vector.extract_strided_slice %655 {offsets = [0, 48], sizes = [4, 16], strides = [1, 1]} : vector<4x64xf32> to vector<4x16xf32>
    %671 = arith.negf %670 : vector<4x16xf32>
    %672 = math.exp %671 : vector<4x16xf32>
    %cst_153 = arith.constant 1.000000e+00 : f32
    %673 = vector.broadcast %cst_153 : f32 to vector<4x16xf32>
    %674 = arith.addf %673, %672 : vector<4x16xf32>
    %675 = arith.divf %673, %674 : vector<4x16xf32>
    %676 = arith.mulf %667, %645 : vector<4x16xf32>
    %677 = arith.mulf %661, %669 : vector<4x16xf32>
    %678 = arith.addf %676, %677 : vector<4x16xf32>
    %679 = math.tanh %678 : vector<4x16xf32>
    %680 = arith.mulf %675, %679 : vector<4x16xf32>
    %681 = vector.extract_strided_slice %680 {offsets = [0, 0], sizes = [2, 16], strides = [1, 1]} : vector<4x16xf32> to vector<2x16xf32>
    %682 = vector.extract_strided_slice %680 {offsets = [2, 0], sizes = [2, 16], strides = [1, 1]} : vector<4x16xf32> to vector<2x16xf32>
    %683 = tpu.concatenate %634, %639 in 0 : vector<2x32xf32>, vector<2x32xf32> -> vector<4x32xf32>
    %684 = tpu.concatenate %683, %680 in 1 : vector<4x32xf32>, vector<4x16xf32> -> vector<4x48xf32>
    %cst_154 = arith.constant dense<0.000000e+00> : vector<4x128xf32>
    %685 = tpu.matmul %684, %642, %cst_154 {dimension_numbers = #tpu.dot_dimension_numbers<[1], [0], [0], [1], [0, 0, 1, 1], [], []>} : vector<4x48xf32>, vector<48x128xf32>, vector<4x128xf32> -> vector<4x128xf32>
    %686 = vector.broadcast %643 : vector<1x128xf32> to vector<4x128xf32>
    %687 = arith.addf %685, %686 : vector<4x128xf32>
    %688 = vector.extract_strided_slice %687 {offsets = [0, 0], sizes = [4, 64], strides = [1, 1]} : vector<4x128xf32> to vector<4x64xf32>
    %689 = vector.extract_strided_slice %687 {offsets = [0, 64], sizes = [4, 64], strides = [1, 1]} : vector<4x128xf32> to vector<4x64xf32>
    %690 = vector.shape_cast %331 : vector<4x1xi1> to vector<4x1xi1>
    %691 = vector.broadcast %690 : vector<4x1xi1> to vector<4x64xi1>
    %692 = arith.select %691, %688, %689 : vector<4x64xi1>, vector<4x64xf32>
    %693 = vector.extract_strided_slice %692 {offsets = [0, 0], sizes = [4, 16], strides = [1, 1]} : vector<4x64xf32> to vector<4x16xf32>
    %694 = arith.negf %693 : vector<4x16xf32>
    %695 = math.exp %694 : vector<4x16xf32>
    %cst_155 = arith.constant 1.000000e+00 : f32
    %696 = vector.broadcast %cst_155 : f32 to vector<4x16xf32>
    %697 = arith.addf %696, %695 : vector<4x16xf32>
    %698 = arith.divf %696, %697 : vector<4x16xf32>
    %699 = vector.extract_strided_slice %692 {offsets = [0, 16], sizes = [4, 16], strides = [1, 1]} : vector<4x64xf32> to vector<4x16xf32>
    %700 = arith.negf %699 : vector<4x16xf32>
    %701 = math.exp %700 : vector<4x16xf32>
    %cst_156 = arith.constant 1.000000e+00 : f32
    %702 = vector.broadcast %cst_156 : f32 to vector<4x16xf32>
    %703 = arith.addf %702, %701 : vector<4x16xf32>
    %704 = arith.divf %702, %703 : vector<4x16xf32>
    %705 = vector.extract_strided_slice %692 {offsets = [0, 32], sizes = [4, 16], strides = [1, 1]} : vector<4x64xf32> to vector<4x16xf32>
    %706 = math.tanh %705 : vector<4x16xf32>
    %707 = vector.extract_strided_slice %692 {offsets = [0, 48], sizes = [4, 16], strides = [1, 1]} : vector<4x64xf32> to vector<4x16xf32>
    %708 = arith.negf %707 : vector<4x16xf32>
    %709 = math.exp %708 : vector<4x16xf32>
    %cst_157 = arith.constant 1.000000e+00 : f32
    %710 = vector.broadcast %cst_157 : f32 to vector<4x16xf32>
    %711 = arith.addf %710, %709 : vector<4x16xf32>
    %712 = arith.divf %710, %711 : vector<4x16xf32>
    %713 = arith.mulf %704, %678 : vector<4x16xf32>
    %714 = arith.mulf %698, %706 : vector<4x16xf32>
    %715 = arith.addf %713, %714 : vector<4x16xf32>
    %716 = math.tanh %715 : vector<4x16xf32>
    %717 = arith.mulf %712, %716 : vector<4x16xf32>
    %718 = vector.extract_strided_slice %717 {offsets = [0, 0], sizes = [2, 16], strides = [1, 1]} : vector<4x16xf32> to vector<2x16xf32>
    %719 = vector.extract_strided_slice %717 {offsets = [2, 0], sizes = [2, 16], strides = [1, 1]} : vector<4x16xf32> to vector<2x16xf32>
    %720 = tpu.concatenate %635, %638 in 0 : vector<2x32xf32>, vector<2x32xf32> -> vector<4x32xf32>
    %721 = tpu.concatenate %720, %717 in 1 : vector<4x32xf32>, vector<4x16xf32> -> vector<4x48xf32>
    %cst_158 = arith.constant dense<0.000000e+00> : vector<4x128xf32>
    %722 = tpu.matmul %721, %642, %cst_158 {dimension_numbers = #tpu.dot_dimension_numbers<[1], [0], [0], [1], [0, 0, 1, 1], [], []>} : vector<4x48xf32>, vector<48x128xf32>, vector<4x128xf32> -> vector<4x128xf32>
    %723 = vector.broadcast %643 : vector<1x128xf32> to vector<4x128xf32>
    %724 = arith.addf %722, %723 : vector<4x128xf32>
    %725 = vector.extract_strided_slice %724 {offsets = [0, 0], sizes = [4, 64], strides = [1, 1]} : vector<4x128xf32> to vector<4x64xf32>
    %726 = vector.extract_strided_slice %724 {offsets = [0, 64], sizes = [4, 64], strides = [1, 1]} : vector<4x128xf32> to vector<4x64xf32>
    %727 = vector.shape_cast %331 : vector<4x1xi1> to vector<4x1xi1>
    %728 = vector.broadcast %727 : vector<4x1xi1> to vector<4x64xi1>
    %729 = arith.select %728, %725, %726 : vector<4x64xi1>, vector<4x64xf32>
    %730 = vector.extract_strided_slice %729 {offsets = [0, 0], sizes = [4, 16], strides = [1, 1]} : vector<4x64xf32> to vector<4x16xf32>
    %731 = arith.negf %730 : vector<4x16xf32>
    %732 = math.exp %731 : vector<4x16xf32>
    %cst_159 = arith.constant 1.000000e+00 : f32
    %733 = vector.broadcast %cst_159 : f32 to vector<4x16xf32>
    %734 = arith.addf %733, %732 : vector<4x16xf32>
    %735 = arith.divf %733, %734 : vector<4x16xf32>
    %736 = vector.extract_strided_slice %729 {offsets = [0, 16], sizes = [4, 16], strides = [1, 1]} : vector<4x64xf32> to vector<4x16xf32>
    %737 = arith.negf %736 : vector<4x16xf32>
    %738 = math.exp %737 : vector<4x16xf32>
    %cst_160 = arith.constant 1.000000e+00 : f32
    %739 = vector.broadcast %cst_160 : f32 to vector<4x16xf32>
    %740 = arith.addf %739, %738 : vector<4x16xf32>
    %741 = arith.divf %739, %740 : vector<4x16xf32>
    %742 = vector.extract_strided_slice %729 {offsets = [0, 32], sizes = [4, 16], strides = [1, 1]} : vector<4x64xf32> to vector<4x16xf32>
    %743 = math.tanh %742 : vector<4x16xf32>
    %744 = vector.extract_strided_slice %729 {offsets = [0, 48], sizes = [4, 16], strides = [1, 1]} : vector<4x64xf32> to vector<4x16xf32>
    %745 = arith.negf %744 : vector<4x16xf32>
    %746 = math.exp %745 : vector<4x16xf32>
    %cst_161 = arith.constant 1.000000e+00 : f32
    %747 = vector.broadcast %cst_161 : f32 to vector<4x16xf32>
    %748 = arith.addf %747, %746 : vector<4x16xf32>
    %749 = arith.divf %747, %748 : vector<4x16xf32>
    %750 = arith.mulf %741, %715 : vector<4x16xf32>
    %751 = arith.mulf %735, %743 : vector<4x16xf32>
    %752 = arith.addf %750, %751 : vector<4x16xf32>
    %753 = math.tanh %752 : vector<4x16xf32>
    %754 = arith.mulf %749, %753 : vector<4x16xf32>
    %755 = vector.extract_strided_slice %754 {offsets = [0, 0], sizes = [2, 16], strides = [1, 1]} : vector<4x16xf32> to vector<2x16xf32>
    %756 = vector.extract_strided_slice %754 {offsets = [2, 0], sizes = [2, 16], strides = [1, 1]} : vector<4x16xf32> to vector<2x16xf32>
    %757 = tpu.concatenate %636, %637 in 0 : vector<2x32xf32>, vector<2x32xf32> -> vector<4x32xf32>
    %758 = tpu.concatenate %757, %754 in 1 : vector<4x32xf32>, vector<4x16xf32> -> vector<4x48xf32>
    %cst_162 = arith.constant dense<0.000000e+00> : vector<4x128xf32>
    %759 = tpu.matmul %758, %642, %cst_162 {dimension_numbers = #tpu.dot_dimension_numbers<[1], [0], [0], [1], [0, 0, 1, 1], [], []>} : vector<4x48xf32>, vector<48x128xf32>, vector<4x128xf32> -> vector<4x128xf32>
    %760 = vector.broadcast %643 : vector<1x128xf32> to vector<4x128xf32>
    %761 = arith.addf %759, %760 : vector<4x128xf32>
    %762 = vector.extract_strided_slice %761 {offsets = [0, 0], sizes = [4, 64], strides = [1, 1]} : vector<4x128xf32> to vector<4x64xf32>
    %763 = vector.extract_strided_slice %761 {offsets = [0, 64], sizes = [4, 64], strides = [1, 1]} : vector<4x128xf32> to vector<4x64xf32>
    %764 = vector.shape_cast %331 : vector<4x1xi1> to vector<4x1xi1>
    %765 = vector.broadcast %764 : vector<4x1xi1> to vector<4x64xi1>
    %766 = arith.select %765, %762, %763 : vector<4x64xi1>, vector<4x64xf32>
    %767 = vector.extract_strided_slice %766 {offsets = [0, 0], sizes = [4, 16], strides = [1, 1]} : vector<4x64xf32> to vector<4x16xf32>
    %768 = arith.negf %767 : vector<4x16xf32>
    %769 = math.exp %768 : vector<4x16xf32>
    %cst_163 = arith.constant 1.000000e+00 : f32
    %770 = vector.broadcast %cst_163 : f32 to vector<4x16xf32>
    %771 = arith.addf %770, %769 : vector<4x16xf32>
    %772 = arith.divf %770, %771 : vector<4x16xf32>
    %773 = vector.extract_strided_slice %766 {offsets = [0, 16], sizes = [4, 16], strides = [1, 1]} : vector<4x64xf32> to vector<4x16xf32>
    %774 = arith.negf %773 : vector<4x16xf32>
    %775 = math.exp %774 : vector<4x16xf32>
    %cst_164 = arith.constant 1.000000e+00 : f32
    %776 = vector.broadcast %cst_164 : f32 to vector<4x16xf32>
    %777 = arith.addf %776, %775 : vector<4x16xf32>
    %778 = arith.divf %776, %777 : vector<4x16xf32>
    %779 = vector.extract_strided_slice %766 {offsets = [0, 32], sizes = [4, 16], strides = [1, 1]} : vector<4x64xf32> to vector<4x16xf32>
    %780 = math.tanh %779 : vector<4x16xf32>
    %781 = vector.extract_strided_slice %766 {offsets = [0, 48], sizes = [4, 16], strides = [1, 1]} : vector<4x64xf32> to vector<4x16xf32>
    %782 = arith.negf %781 : vector<4x16xf32>
    %783 = math.exp %782 : vector<4x16xf32>
    %cst_165 = arith.constant 1.000000e+00 : f32
    %784 = vector.broadcast %cst_165 : f32 to vector<4x16xf32>
    %785 = arith.addf %784, %783 : vector<4x16xf32>
    %786 = arith.divf %784, %785 : vector<4x16xf32>
    %787 = arith.mulf %778, %752 : vector<4x16xf32>
    %788 = arith.mulf %772, %780 : vector<4x16xf32>
    %789 = arith.addf %787, %788 : vector<4x16xf32>
    %790 = math.tanh %789 : vector<4x16xf32>
    %791 = arith.mulf %786, %790 : vector<4x16xf32>
    %792 = vector.extract_strided_slice %791 {offsets = [0, 0], sizes = [2, 16], strides = [1, 1]} : vector<4x16xf32> to vector<2x16xf32>
    %793 = vector.extract_strided_slice %791 {offsets = [2, 0], sizes = [2, 16], strides = [1, 1]} : vector<4x16xf32> to vector<2x16xf32>
    %794 = tpu.concatenate %637, %636 in 0 : vector<2x32xf32>, vector<2x32xf32> -> vector<4x32xf32>
    %795 = tpu.concatenate %794, %791 in 1 : vector<4x32xf32>, vector<4x16xf32> -> vector<4x48xf32>
    %cst_166 = arith.constant dense<0.000000e+00> : vector<4x128xf32>
    %796 = tpu.matmul %795, %642, %cst_166 {dimension_numbers = #tpu.dot_dimension_numbers<[1], [0], [0], [1], [0, 0, 1, 1], [], []>} : vector<4x48xf32>, vector<48x128xf32>, vector<4x128xf32> -> vector<4x128xf32>
    %797 = vector.broadcast %643 : vector<1x128xf32> to vector<4x128xf32>
    %798 = arith.addf %796, %797 : vector<4x128xf32>
    %799 = vector.extract_strided_slice %798 {offsets = [0, 0], sizes = [4, 64], strides = [1, 1]} : vector<4x128xf32> to vector<4x64xf32>
    %800 = vector.extract_strided_slice %798 {offsets = [0, 64], sizes = [4, 64], strides = [1, 1]} : vector<4x128xf32> to vector<4x64xf32>
    %801 = vector.shape_cast %331 : vector<4x1xi1> to vector<4x1xi1>
    %802 = vector.broadcast %801 : vector<4x1xi1> to vector<4x64xi1>
    %803 = arith.select %802, %799, %800 : vector<4x64xi1>, vector<4x64xf32>
    %804 = vector.extract_strided_slice %803 {offsets = [0, 0], sizes = [4, 16], strides = [1, 1]} : vector<4x64xf32> to vector<4x16xf32>
    %805 = arith.negf %804 : vector<4x16xf32>
    %806 = math.exp %805 : vector<4x16xf32>
    %cst_167 = arith.constant 1.000000e+00 : f32
    %807 = vector.broadcast %cst_167 : f32 to vector<4x16xf32>
    %808 = arith.addf %807, %806 : vector<4x16xf32>
    %809 = arith.divf %807, %808 : vector<4x16xf32>
    %810 = vector.extract_strided_slice %803 {offsets = [0, 16], sizes = [4, 16], strides = [1, 1]} : vector<4x64xf32> to vector<4x16xf32>
    %811 = arith.negf %810 : vector<4x16xf32>
    %812 = math.exp %811 : vector<4x16xf32>
    %cst_168 = arith.constant 1.000000e+00 : f32
    %813 = vector.broadcast %cst_168 : f32 to vector<4x16xf32>
    %814 = arith.addf %813, %812 : vector<4x16xf32>
    %815 = arith.divf %813, %814 : vector<4x16xf32>
    %816 = vector.extract_strided_slice %803 {offsets = [0, 32], sizes = [4, 16], strides = [1, 1]} : vector<4x64xf32> to vector<4x16xf32>
    %817 = math.tanh %816 : vector<4x16xf32>
    %818 = vector.extract_strided_slice %803 {offsets = [0, 48], sizes = [4, 16], strides = [1, 1]} : vector<4x64xf32> to vector<4x16xf32>
    %819 = arith.negf %818 : vector<4x16xf32>
    %820 = math.exp %819 : vector<4x16xf32>
    %cst_169 = arith.constant 1.000000e+00 : f32
    %821 = vector.broadcast %cst_169 : f32 to vector<4x16xf32>
    %822 = arith.addf %821, %820 : vector<4x16xf32>
    %823 = arith.divf %821, %822 : vector<4x16xf32>
    %824 = arith.mulf %815, %789 : vector<4x16xf32>
    %825 = arith.mulf %809, %817 : vector<4x16xf32>
    %826 = arith.addf %824, %825 : vector<4x16xf32>
    %827 = math.tanh %826 : vector<4x16xf32>
    %828 = arith.mulf %823, %827 : vector<4x16xf32>
    %829 = vector.extract_strided_slice %828 {offsets = [0, 0], sizes = [2, 16], strides = [1, 1]} : vector<4x16xf32> to vector<2x16xf32>
    %830 = vector.extract_strided_slice %828 {offsets = [2, 0], sizes = [2, 16], strides = [1, 1]} : vector<4x16xf32> to vector<2x16xf32>
    %831 = tpu.concatenate %638, %635 in 0 : vector<2x32xf32>, vector<2x32xf32> -> vector<4x32xf32>
    %832 = tpu.concatenate %831, %828 in 1 : vector<4x32xf32>, vector<4x16xf32> -> vector<4x48xf32>
    %cst_170 = arith.constant dense<0.000000e+00> : vector<4x128xf32>
    %833 = tpu.matmul %832, %642, %cst_170 {dimension_numbers = #tpu.dot_dimension_numbers<[1], [0], [0], [1], [0, 0, 1, 1], [], []>} : vector<4x48xf32>, vector<48x128xf32>, vector<4x128xf32> -> vector<4x128xf32>
    %834 = vector.broadcast %643 : vector<1x128xf32> to vector<4x128xf32>
    %835 = arith.addf %833, %834 : vector<4x128xf32>
    %836 = vector.extract_strided_slice %835 {offsets = [0, 0], sizes = [4, 64], strides = [1, 1]} : vector<4x128xf32> to vector<4x64xf32>
    %837 = vector.extract_strided_slice %835 {offsets = [0, 64], sizes = [4, 64], strides = [1, 1]} : vector<4x128xf32> to vector<4x64xf32>
    %838 = vector.shape_cast %331 : vector<4x1xi1> to vector<4x1xi1>
    %839 = vector.broadcast %838 : vector<4x1xi1> to vector<4x64xi1>
    %840 = arith.select %839, %836, %837 : vector<4x64xi1>, vector<4x64xf32>
    %841 = vector.extract_strided_slice %840 {offsets = [0, 0], sizes = [4, 16], strides = [1, 1]} : vector<4x64xf32> to vector<4x16xf32>
    %842 = arith.negf %841 : vector<4x16xf32>
    %843 = math.exp %842 : vector<4x16xf32>
    %cst_171 = arith.constant 1.000000e+00 : f32
    %844 = vector.broadcast %cst_171 : f32 to vector<4x16xf32>
    %845 = arith.addf %844, %843 : vector<4x16xf32>
    %846 = arith.divf %844, %845 : vector<4x16xf32>
    %847 = vector.extract_strided_slice %840 {offsets = [0, 16], sizes = [4, 16], strides = [1, 1]} : vector<4x64xf32> to vector<4x16xf32>
    %848 = arith.negf %847 : vector<4x16xf32>
    %849 = math.exp %848 : vector<4x16xf32>
    %cst_172 = arith.constant 1.000000e+00 : f32
    %850 = vector.broadcast %cst_172 : f32 to vector<4x16xf32>
    %851 = arith.addf %850, %849 : vector<4x16xf32>
    %852 = arith.divf %850, %851 : vector<4x16xf32>
    %853 = vector.extract_strided_slice %840 {offsets = [0, 32], sizes = [4, 16], strides = [1, 1]} : vector<4x64xf32> to vector<4x16xf32>
    %854 = math.tanh %853 : vector<4x16xf32>
    %855 = vector.extract_strided_slice %840 {offsets = [0, 48], sizes = [4, 16], strides = [1, 1]} : vector<4x64xf32> to vector<4x16xf32>
    %856 = arith.negf %855 : vector<4x16xf32>
    %857 = math.exp %856 : vector<4x16xf32>
    %cst_173 = arith.constant 1.000000e+00 : f32
    %858 = vector.broadcast %cst_173 : f32 to vector<4x16xf32>
    %859 = arith.addf %858, %857 : vector<4x16xf32>
    %860 = arith.divf %858, %859 : vector<4x16xf32>
    %861 = arith.mulf %852, %826 : vector<4x16xf32>
    %862 = arith.mulf %846, %854 : vector<4x16xf32>
    %863 = arith.addf %861, %862 : vector<4x16xf32>
    %864 = math.tanh %863 : vector<4x16xf32>
    %865 = arith.mulf %860, %864 : vector<4x16xf32>
    %866 = vector.extract_strided_slice %865 {offsets = [0, 0], sizes = [2, 16], strides = [1, 1]} : vector<4x16xf32> to vector<2x16xf32>
    %867 = vector.extract_strided_slice %865 {offsets = [2, 0], sizes = [2, 16], strides = [1, 1]} : vector<4x16xf32> to vector<2x16xf32>
    %868 = tpu.concatenate %639, %634 in 0 : vector<2x32xf32>, vector<2x32xf32> -> vector<4x32xf32>
    %869 = tpu.concatenate %868, %865 in 1 : vector<4x32xf32>, vector<4x16xf32> -> vector<4x48xf32>
    %cst_174 = arith.constant dense<0.000000e+00> : vector<4x128xf32>
    %870 = tpu.matmul %869, %642, %cst_174 {dimension_numbers = #tpu.dot_dimension_numbers<[1], [0], [0], [1], [0, 0, 1, 1], [], []>} : vector<4x48xf32>, vector<48x128xf32>, vector<4x128xf32> -> vector<4x128xf32>
    %871 = vector.broadcast %643 : vector<1x128xf32> to vector<4x128xf32>
    %872 = arith.addf %870, %871 : vector<4x128xf32>
    %873 = vector.extract_strided_slice %872 {offsets = [0, 0], sizes = [4, 64], strides = [1, 1]} : vector<4x128xf32> to vector<4x64xf32>
    %874 = vector.extract_strided_slice %872 {offsets = [0, 64], sizes = [4, 64], strides = [1, 1]} : vector<4x128xf32> to vector<4x64xf32>
    %875 = vector.shape_cast %331 : vector<4x1xi1> to vector<4x1xi1>
    %876 = vector.broadcast %875 : vector<4x1xi1> to vector<4x64xi1>
    %877 = arith.select %876, %873, %874 : vector<4x64xi1>, vector<4x64xf32>
    %878 = vector.extract_strided_slice %877 {offsets = [0, 0], sizes = [4, 16], strides = [1, 1]} : vector<4x64xf32> to vector<4x16xf32>
    %879 = arith.negf %878 : vector<4x16xf32>
    %880 = math.exp %879 : vector<4x16xf32>
    %cst_175 = arith.constant 1.000000e+00 : f32
    %881 = vector.broadcast %cst_175 : f32 to vector<4x16xf32>
    %882 = arith.addf %881, %880 : vector<4x16xf32>
    %883 = arith.divf %881, %882 : vector<4x16xf32>
    %884 = vector.extract_strided_slice %877 {offsets = [0, 16], sizes = [4, 16], strides = [1, 1]} : vector<4x64xf32> to vector<4x16xf32>
    %885 = arith.negf %884 : vector<4x16xf32>
    %886 = math.exp %885 : vector<4x16xf32>
    %cst_176 = arith.constant 1.000000e+00 : f32
    %887 = vector.broadcast %cst_176 : f32 to vector<4x16xf32>
    %888 = arith.addf %887, %886 : vector<4x16xf32>
    %889 = arith.divf %887, %888 : vector<4x16xf32>
    %890 = vector.extract_strided_slice %877 {offsets = [0, 32], sizes = [4, 16], strides = [1, 1]} : vector<4x64xf32> to vector<4x16xf32>
    %891 = math.tanh %890 : vector<4x16xf32>
    %892 = vector.extract_strided_slice %877 {offsets = [0, 48], sizes = [4, 16], strides = [1, 1]} : vector<4x64xf32> to vector<4x16xf32>
    %893 = arith.negf %892 : vector<4x16xf32>
    %894 = math.exp %893 : vector<4x16xf32>
    %cst_177 = arith.constant 1.000000e+00 : f32
    %895 = vector.broadcast %cst_177 : f32 to vector<4x16xf32>
    %896 = arith.addf %895, %894 : vector<4x16xf32>
    %897 = arith.divf %895, %896 : vector<4x16xf32>
    %898 = arith.mulf %889, %863 : vector<4x16xf32>
    %899 = arith.mulf %883, %891 : vector<4x16xf32>
    %900 = arith.addf %898, %899 : vector<4x16xf32>
    %901 = math.tanh %900 : vector<4x16xf32>
    %902 = arith.mulf %897, %901 : vector<4x16xf32>
    %903 = vector.extract_strided_slice %902 {offsets = [0, 0], sizes = [2, 16], strides = [1, 1]} : vector<4x16xf32> to vector<2x16xf32>
    %904 = vector.extract_strided_slice %902 {offsets = [2, 0], sizes = [2, 16], strides = [1, 1]} : vector<4x16xf32> to vector<2x16xf32>
    %905 = tpu.concatenate %640, %633 in 0 : vector<2x32xf32>, vector<2x32xf32> -> vector<4x32xf32>
    %906 = tpu.concatenate %905, %902 in 1 : vector<4x32xf32>, vector<4x16xf32> -> vector<4x48xf32>
    %cst_178 = arith.constant dense<0.000000e+00> : vector<4x128xf32>
    %907 = tpu.matmul %906, %642, %cst_178 {dimension_numbers = #tpu.dot_dimension_numbers<[1], [0], [0], [1], [0, 0, 1, 1], [], []>} : vector<4x48xf32>, vector<48x128xf32>, vector<4x128xf32> -> vector<4x128xf32>
    %908 = vector.broadcast %643 : vector<1x128xf32> to vector<4x128xf32>
    %909 = arith.addf %907, %908 : vector<4x128xf32>
    %910 = vector.extract_strided_slice %909 {offsets = [0, 0], sizes = [4, 64], strides = [1, 1]} : vector<4x128xf32> to vector<4x64xf32>
    %911 = vector.extract_strided_slice %909 {offsets = [0, 64], sizes = [4, 64], strides = [1, 1]} : vector<4x128xf32> to vector<4x64xf32>
    %912 = vector.shape_cast %331 : vector<4x1xi1> to vector<4x1xi1>
    %913 = vector.broadcast %912 : vector<4x1xi1> to vector<4x64xi1>
    %914 = arith.select %913, %910, %911 : vector<4x64xi1>, vector<4x64xf32>
    %915 = vector.extract_strided_slice %914 {offsets = [0, 0], sizes = [4, 16], strides = [1, 1]} : vector<4x64xf32> to vector<4x16xf32>
    %916 = arith.negf %915 : vector<4x16xf32>
    %917 = math.exp %916 : vector<4x16xf32>
    %cst_179 = arith.constant 1.000000e+00 : f32
    %918 = vector.broadcast %cst_179 : f32 to vector<4x16xf32>
    %919 = arith.addf %918, %917 : vector<4x16xf32>
    %920 = arith.divf %918, %919 : vector<4x16xf32>
    %921 = vector.extract_strided_slice %914 {offsets = [0, 16], sizes = [4, 16], strides = [1, 1]} : vector<4x64xf32> to vector<4x16xf32>
    %922 = arith.negf %921 : vector<4x16xf32>
    %923 = math.exp %922 : vector<4x16xf32>
    %cst_180 = arith.constant 1.000000e+00 : f32
    %924 = vector.broadcast %cst_180 : f32 to vector<4x16xf32>
    %925 = arith.addf %924, %923 : vector<4x16xf32>
    %926 = arith.divf %924, %925 : vector<4x16xf32>
    %927 = vector.extract_strided_slice %914 {offsets = [0, 32], sizes = [4, 16], strides = [1, 1]} : vector<4x64xf32> to vector<4x16xf32>
    %928 = math.tanh %927 : vector<4x16xf32>
    %929 = vector.extract_strided_slice %914 {offsets = [0, 48], sizes = [4, 16], strides = [1, 1]} : vector<4x64xf32> to vector<4x16xf32>
    %930 = arith.negf %929 : vector<4x16xf32>
    %931 = math.exp %930 : vector<4x16xf32>
    %cst_181 = arith.constant 1.000000e+00 : f32
    %932 = vector.broadcast %cst_181 : f32 to vector<4x16xf32>
    %933 = arith.addf %932, %931 : vector<4x16xf32>
    %934 = arith.divf %932, %933 : vector<4x16xf32>
    %935 = arith.mulf %926, %900 : vector<4x16xf32>
    %936 = arith.mulf %920, %928 : vector<4x16xf32>
    %937 = arith.addf %935, %936 : vector<4x16xf32>
    %938 = math.tanh %937 : vector<4x16xf32>
    %939 = arith.mulf %934, %938 : vector<4x16xf32>
    %940 = vector.extract_strided_slice %939 {offsets = [0, 0], sizes = [2, 16], strides = [1, 1]} : vector<4x16xf32> to vector<2x16xf32>
    %941 = vector.extract_strided_slice %939 {offsets = [2, 0], sizes = [2, 16], strides = [1, 1]} : vector<4x16xf32> to vector<2x16xf32>
    %942 = tpu.concatenate %681, %941 in 1 : vector<2x16xf32>, vector<2x16xf32> -> vector<2x32xf32>
    %943 = tpu.concatenate %718, %904 in 1 : vector<2x16xf32>, vector<2x16xf32> -> vector<2x32xf32>
    %944 = tpu.concatenate %755, %867 in 1 : vector<2x16xf32>, vector<2x16xf32> -> vector<2x32xf32>
    %945 = tpu.concatenate %792, %830 in 1 : vector<2x16xf32>, vector<2x16xf32> -> vector<2x32xf32>
    %946 = tpu.concatenate %829, %793 in 1 : vector<2x16xf32>, vector<2x16xf32> -> vector<2x32xf32>
    %947 = tpu.concatenate %866, %756 in 1 : vector<2x16xf32>, vector<2x16xf32> -> vector<2x32xf32>
    %948 = tpu.concatenate %903, %719 in 1 : vector<2x16xf32>, vector<2x16xf32> -> vector<2x32xf32>
    %949 = tpu.concatenate %940, %682 in 1 : vector<2x16xf32>, vector<2x16xf32> -> vector<2x32xf32>
    %c24 = arith.constant 24 : index
    %c0_182 = arith.constant 0 : index
    %950 = vector.load %arg10[%c24, %c0_182] : memref<56x128xf32, #tpu.memory_space<vmem>>, vector<32x16xf32>
    %c20 = arith.constant 20 : index
    %c0_183 = arith.constant 0 : index
    %951 = vector.load %arg10[%c20, %c0_183] : memref<56x128xf32, #tpu.memory_space<vmem>>, vector<1x16xf32>
    %952 = tpu.iota {dimensions = array<i32: 1>} : vector<2x16xi32>
    %cst_184 = arith.constant dense<0.000000e+00> : vector<2x16xf32>
    %953 = tpu.matmul %942, %950, %cst_184 {dimension_numbers = #tpu.dot_dimension_numbers<[1], [0], [0], [1], [0, 0, 1, 1], [], []>} : vector<2x32xf32>, vector<32x16xf32>, vector<2x16xf32> -> vector<2x16xf32>
    %954 = vector.broadcast %951 : vector<1x16xf32> to vector<2x16xf32>
    %955 = arith.addf %953, %954 : vector<2x16xf32>
    %cst_185 = arith.constant dense<0xFF800000> : vector<2xf32>
    %956 = vector.multi_reduction <maximumf>, %955, %cst_185 [1] : vector<2x16xf32> to vector<2xf32>
    %957 = vector.shape_cast %956 : vector<2xf32> to vector<2x1xf32>
    %958 = vector.broadcast %957 : vector<2x1xf32> to vector<2x16xf32>
    %959 = arith.cmpf oeq, %955, %958 : vector<2x16xf32>
    %c16_i32 = arith.constant 16 : i32
    %960 = vector.broadcast %c16_i32 : i32 to vector<2x16xi32>
    %961 = arith.select %959, %952, %960 : vector<2x16xi1>, vector<2x16xi32>
    %cst_186 = arith.constant dense<2147483647> : vector<2xi32>
    %962 = vector.multi_reduction <minsi>, %961, %cst_186 [1] : vector<2x16xi32> to vector<2xi32>
    %963 = vector.shape_cast %962 : vector<2xi32> to vector<2x1xi32>
    %cst_187 = arith.constant dense<0.000000e+00> : vector<2x16xf32>
    %964 = tpu.matmul %943, %950, %cst_187 {dimension_numbers = #tpu.dot_dimension_numbers<[1], [0], [0], [1], [0, 0, 1, 1], [], []>} : vector<2x32xf32>, vector<32x16xf32>, vector<2x16xf32> -> vector<2x16xf32>
    %965 = vector.broadcast %951 : vector<1x16xf32> to vector<2x16xf32>
    %966 = arith.addf %964, %965 : vector<2x16xf32>
    %cst_188 = arith.constant dense<0xFF800000> : vector<2xf32>
    %967 = vector.multi_reduction <maximumf>, %966, %cst_188 [1] : vector<2x16xf32> to vector<2xf32>
    %968 = vector.shape_cast %967 : vector<2xf32> to vector<2x1xf32>
    %969 = vector.broadcast %968 : vector<2x1xf32> to vector<2x16xf32>
    %970 = arith.cmpf oeq, %966, %969 : vector<2x16xf32>
    %c16_i32_189 = arith.constant 16 : i32
    %971 = vector.broadcast %c16_i32_189 : i32 to vector<2x16xi32>
    %972 = arith.select %970, %952, %971 : vector<2x16xi1>, vector<2x16xi32>
    %cst_190 = arith.constant dense<2147483647> : vector<2xi32>
    %973 = vector.multi_reduction <minsi>, %972, %cst_190 [1] : vector<2x16xi32> to vector<2xi32>
    %974 = vector.shape_cast %973 : vector<2xi32> to vector<2x1xi32>
    %cst_191 = arith.constant dense<0.000000e+00> : vector<2x16xf32>
    %975 = tpu.matmul %944, %950, %cst_191 {dimension_numbers = #tpu.dot_dimension_numbers<[1], [0], [0], [1], [0, 0, 1, 1], [], []>} : vector<2x32xf32>, vector<32x16xf32>, vector<2x16xf32> -> vector<2x16xf32>
    %976 = vector.broadcast %951 : vector<1x16xf32> to vector<2x16xf32>
    %977 = arith.addf %975, %976 : vector<2x16xf32>
    %cst_192 = arith.constant dense<0xFF800000> : vector<2xf32>
    %978 = vector.multi_reduction <maximumf>, %977, %cst_192 [1] : vector<2x16xf32> to vector<2xf32>
    %979 = vector.shape_cast %978 : vector<2xf32> to vector<2x1xf32>
    %980 = vector.broadcast %979 : vector<2x1xf32> to vector<2x16xf32>
    %981 = arith.cmpf oeq, %977, %980 : vector<2x16xf32>
    %c16_i32_193 = arith.constant 16 : i32
    %982 = vector.broadcast %c16_i32_193 : i32 to vector<2x16xi32>
    %983 = arith.select %981, %952, %982 : vector<2x16xi1>, vector<2x16xi32>
    %cst_194 = arith.constant dense<2147483647> : vector<2xi32>
    %984 = vector.multi_reduction <minsi>, %983, %cst_194 [1] : vector<2x16xi32> to vector<2xi32>
    %985 = vector.shape_cast %984 : vector<2xi32> to vector<2x1xi32>
    %cst_195 = arith.constant dense<0.000000e+00> : vector<2x16xf32>
    %986 = tpu.matmul %945, %950, %cst_195 {dimension_numbers = #tpu.dot_dimension_numbers<[1], [0], [0], [1], [0, 0, 1, 1], [], []>} : vector<2x32xf32>, vector<32x16xf32>, vector<2x16xf32> -> vector<2x16xf32>
    %987 = vector.broadcast %951 : vector<1x16xf32> to vector<2x16xf32>
    %988 = arith.addf %986, %987 : vector<2x16xf32>
    %cst_196 = arith.constant dense<0xFF800000> : vector<2xf32>
    %989 = vector.multi_reduction <maximumf>, %988, %cst_196 [1] : vector<2x16xf32> to vector<2xf32>
    %990 = vector.shape_cast %989 : vector<2xf32> to vector<2x1xf32>
    %991 = vector.broadcast %990 : vector<2x1xf32> to vector<2x16xf32>
    %992 = arith.cmpf oeq, %988, %991 : vector<2x16xf32>
    %c16_i32_197 = arith.constant 16 : i32
    %993 = vector.broadcast %c16_i32_197 : i32 to vector<2x16xi32>
    %994 = arith.select %992, %952, %993 : vector<2x16xi1>, vector<2x16xi32>
    %cst_198 = arith.constant dense<2147483647> : vector<2xi32>
    %995 = vector.multi_reduction <minsi>, %994, %cst_198 [1] : vector<2x16xi32> to vector<2xi32>
    %996 = vector.shape_cast %995 : vector<2xi32> to vector<2x1xi32>
    %cst_199 = arith.constant dense<0.000000e+00> : vector<2x16xf32>
    %997 = tpu.matmul %946, %950, %cst_199 {dimension_numbers = #tpu.dot_dimension_numbers<[1], [0], [0], [1], [0, 0, 1, 1], [], []>} : vector<2x32xf32>, vector<32x16xf32>, vector<2x16xf32> -> vector<2x16xf32>
    %998 = vector.broadcast %951 : vector<1x16xf32> to vector<2x16xf32>
    %999 = arith.addf %997, %998 : vector<2x16xf32>
    %cst_200 = arith.constant dense<0xFF800000> : vector<2xf32>
    %1000 = vector.multi_reduction <maximumf>, %999, %cst_200 [1] : vector<2x16xf32> to vector<2xf32>
    %1001 = vector.shape_cast %1000 : vector<2xf32> to vector<2x1xf32>
    %1002 = vector.broadcast %1001 : vector<2x1xf32> to vector<2x16xf32>
    %1003 = arith.cmpf oeq, %999, %1002 : vector<2x16xf32>
    %c16_i32_201 = arith.constant 16 : i32
    %1004 = vector.broadcast %c16_i32_201 : i32 to vector<2x16xi32>
    %1005 = arith.select %1003, %952, %1004 : vector<2x16xi1>, vector<2x16xi32>
    %cst_202 = arith.constant dense<2147483647> : vector<2xi32>
    %1006 = vector.multi_reduction <minsi>, %1005, %cst_202 [1] : vector<2x16xi32> to vector<2xi32>
    %1007 = vector.shape_cast %1006 : vector<2xi32> to vector<2x1xi32>
    %cst_203 = arith.constant dense<0.000000e+00> : vector<2x16xf32>
    %1008 = tpu.matmul %947, %950, %cst_203 {dimension_numbers = #tpu.dot_dimension_numbers<[1], [0], [0], [1], [0, 0, 1, 1], [], []>} : vector<2x32xf32>, vector<32x16xf32>, vector<2x16xf32> -> vector<2x16xf32>
    %1009 = vector.broadcast %951 : vector<1x16xf32> to vector<2x16xf32>
    %1010 = arith.addf %1008, %1009 : vector<2x16xf32>
    %cst_204 = arith.constant dense<0xFF800000> : vector<2xf32>
    %1011 = vector.multi_reduction <maximumf>, %1010, %cst_204 [1] : vector<2x16xf32> to vector<2xf32>
    %1012 = vector.shape_cast %1011 : vector<2xf32> to vector<2x1xf32>
    %1013 = vector.broadcast %1012 : vector<2x1xf32> to vector<2x16xf32>
    %1014 = arith.cmpf oeq, %1010, %1013 : vector<2x16xf32>
    %c16_i32_205 = arith.constant 16 : i32
    %1015 = vector.broadcast %c16_i32_205 : i32 to vector<2x16xi32>
    %1016 = arith.select %1014, %952, %1015 : vector<2x16xi1>, vector<2x16xi32>
    %cst_206 = arith.constant dense<2147483647> : vector<2xi32>
    %1017 = vector.multi_reduction <minsi>, %1016, %cst_206 [1] : vector<2x16xi32> to vector<2xi32>
    %1018 = vector.shape_cast %1017 : vector<2xi32> to vector<2x1xi32>
    %cst_207 = arith.constant dense<0.000000e+00> : vector<2x16xf32>
    %1019 = tpu.matmul %948, %950, %cst_207 {dimension_numbers = #tpu.dot_dimension_numbers<[1], [0], [0], [1], [0, 0, 1, 1], [], []>} : vector<2x32xf32>, vector<32x16xf32>, vector<2x16xf32> -> vector<2x16xf32>
    %1020 = vector.broadcast %951 : vector<1x16xf32> to vector<2x16xf32>
    %1021 = arith.addf %1019, %1020 : vector<2x16xf32>
    %cst_208 = arith.constant dense<0xFF800000> : vector<2xf32>
    %1022 = vector.multi_reduction <maximumf>, %1021, %cst_208 [1] : vector<2x16xf32> to vector<2xf32>
    %1023 = vector.shape_cast %1022 : vector<2xf32> to vector<2x1xf32>
    %1024 = vector.broadcast %1023 : vector<2x1xf32> to vector<2x16xf32>
    %1025 = arith.cmpf oeq, %1021, %1024 : vector<2x16xf32>
    %c16_i32_209 = arith.constant 16 : i32
    %1026 = vector.broadcast %c16_i32_209 : i32 to vector<2x16xi32>
    %1027 = arith.select %1025, %952, %1026 : vector<2x16xi1>, vector<2x16xi32>
    %cst_210 = arith.constant dense<2147483647> : vector<2xi32>
    %1028 = vector.multi_reduction <minsi>, %1027, %cst_210 [1] : vector<2x16xi32> to vector<2xi32>
    %1029 = vector.shape_cast %1028 : vector<2xi32> to vector<2x1xi32>
    %cst_211 = arith.constant dense<0.000000e+00> : vector<2x16xf32>
    %1030 = tpu.matmul %949, %950, %cst_211 {dimension_numbers = #tpu.dot_dimension_numbers<[1], [0], [0], [1], [0, 0, 1, 1], [], []>} : vector<2x32xf32>, vector<32x16xf32>, vector<2x16xf32> -> vector<2x16xf32>
    %1031 = vector.broadcast %951 : vector<1x16xf32> to vector<2x16xf32>
    %1032 = arith.addf %1030, %1031 : vector<2x16xf32>
    %cst_212 = arith.constant dense<0xFF800000> : vector<2xf32>
    %1033 = vector.multi_reduction <maximumf>, %1032, %cst_212 [1] : vector<2x16xf32> to vector<2xf32>
    %1034 = vector.shape_cast %1033 : vector<2xf32> to vector<2x1xf32>
    %1035 = vector.broadcast %1034 : vector<2x1xf32> to vector<2x16xf32>
    %1036 = arith.cmpf oeq, %1032, %1035 : vector<2x16xf32>
    %c16_i32_213 = arith.constant 16 : i32
    %1037 = vector.broadcast %c16_i32_213 : i32 to vector<2x16xi32>
    %1038 = arith.select %1036, %952, %1037 : vector<2x16xi1>, vector<2x16xi32>
    %cst_214 = arith.constant dense<2147483647> : vector<2xi32>
    %1039 = vector.multi_reduction <minsi>, %1038, %cst_214 [1] : vector<2x16xi32> to vector<2xi32>
    %1040 = vector.shape_cast %1039 : vector<2xi32> to vector<2x1xi32>
    %1041 = tpu.concatenate %955, %966, %977, %988, %999, %1010, %1021, %1032 in 1 : vector<2x16xf32>, vector<2x16xf32>, vector<2x16xf32>, vector<2x16xf32>, vector<2x16xf32>, vector<2x16xf32>, vector<2x16xf32>, vector<2x16xf32> -> vector<2x128xf32>
    %c0_215 = arith.constant 0 : index
    %c0_216 = arith.constant 0 : index
    %1042 = vector.load %arg11[%c0_215, %c0_216] : memref<2x128xf32, #tpu.memory_space<vmem>>, vector<2x128xf32>
    tpu.vector_store %arg11[%c0_215, %c0_216], %1041 {strides = array<i32>} : memref<2x128xf32, #tpu.memory_space<vmem>>, vector<2x128xf32>,
    %1043 = tpu.concatenate %963, %974, %985, %996, %1007, %1018, %1029, %1040 in 1 : vector<2x1xi32>, vector<2x1xi32>, vector<2x1xi32>, vector<2x1xi32>, vector<2x1xi32>, vector<2x1xi32>, vector<2x1xi32>, vector<2x1xi32> -> vector<2x8xi32>
    %c0_217 = arith.constant 0 : index
    %c0_218 = arith.constant 0 : index
    %1044 = vector.load %arg12[%c0_217, %c0_218] : memref<2x8xi32, #tpu.memory_space<vmem>>, vector<2x8xi32>
    tpu.vector_store %arg12[%c0_217, %c0_218], %1043 {strides = array<i32>} : memref<2x8xi32, #tpu.memory_space<vmem>>, vector<2x8xi32>,
    return
  }
  func.func @transform_0(%arg0: i32) -> (i32, i32) {
    %c0_i32 = arith.constant 0 : i32
    %c0_i32_0 = arith.constant 0 : i32
    %c0_i32_1 = arith.constant 0 : i32
    return %c0_i32, %c0_i32_0 : i32, i32
  }
  func.func @transform_1(%arg0: i32) -> (i32, i32) {
    %c0_i32 = arith.constant 0 : i32
    %c0_i32_0 = arith.constant 0 : i32
    %c0_i32_1 = arith.constant 0 : i32
    return %c0_i32, %c0_i32_0 : i32, i32
  }
  func.func @transform_2(%arg0: i32) -> (i32, i32) {
    %c0_i32 = arith.constant 0 : i32
    %c0_i32_0 = arith.constant 0 : i32
    %c0_i32_1 = arith.constant 0 : i32
    return %c0_i32, %c0_i32_0 : i32, i32
  }
  func.func @transform_3(%arg0: i32) -> (i32, i32) {
    %c0_i32 = arith.constant 0 : i32
    %c0_i32_0 = arith.constant 0 : i32
    %c0_i32_1 = arith.constant 0 : i32
    return %c0_i32, %c0_i32_0 : i32, i32
  }
  func.func @transform_4(%arg0: i32) -> (i32, i32, i32) {
    %c0_i32 = arith.constant 0 : i32
    %c0_i32_0 = arith.constant 0 : i32
    %c0_i32_1 = arith.constant 0 : i32
    %c0_i32_2 = arith.constant 0 : i32
    return %c0_i32, %c0_i32_0, %c0_i32_1 : i32, i32, i32
  }
  func.func @transform_5(%arg0: i32) -> (i32, i32, i32) {
    %c0_i32 = arith.constant 0 : i32
    %c0_i32_0 = arith.constant 0 : i32
    %c0_i32_1 = arith.constant 0 : i32
    %c0_i32_2 = arith.constant 0 : i32
    return %c0_i32, %c0_i32_0, %c0_i32_1 : i32, i32, i32
  }
  func.func @transform_6(%arg0: i32) -> (i32, i32, i32) {
    %c0_i32 = arith.constant 0 : i32
    %c0_i32_0 = arith.constant 0 : i32
    %c0_i32_1 = arith.constant 0 : i32
    %c0_i32_2 = arith.constant 0 : i32
    return %c0_i32, %c0_i32_0, %c0_i32_1 : i32, i32, i32
  }
  func.func @transform_7(%arg0: i32) -> (i32, i32, i32) {
    %c0_i32 = arith.constant 0 : i32
    %c0_i32_0 = arith.constant 0 : i32
    %c0_i32_1 = arith.constant 0 : i32
    %c0_i32_2 = arith.constant 0 : i32
    return %c0_i32, %c0_i32_0, %c0_i32_1 : i32, i32, i32
  }
  func.func @transform_8(%arg0: i32) -> (i32, i32, i32) {
    %c0_i32 = arith.constant 0 : i32
    %c0_i32_0 = arith.constant 0 : i32
    %c0_i32_1 = arith.constant 0 : i32
    %c0_i32_2 = arith.constant 0 : i32
    return %c0_i32, %c0_i32_0, %c0_i32_1 : i32, i32, i32
  }
  func.func @transform_9(%arg0: i32) -> (i32, i32) {
    %c0_i32 = arith.constant 0 : i32
    %c0_i32_0 = arith.constant 0 : i32
    %c0_i32_1 = arith.constant 0 : i32
    return %c0_i32, %c0_i32_0 : i32, i32
  }
  func.func @transform_10(%arg0: i32) -> (i32, i32) {
    %c0_i32 = arith.constant 0 : i32
    %c0_i32_0 = arith.constant 0 : i32
    %c0_i32_1 = arith.constant 0 : i32
    return %c0_i32, %c0_i32_0 : i32, i32
  }
  func.func @transform_11(%arg0: i32) -> (i32, i32) {
    %c0_i32 = arith.constant 0 : i32
    %c0_i32_0 = arith.constant 0 : i32
    %c0_i32_1 = arith.constant 0 : i32
    return %c0_i32, %c0_i32_0 : i32, i32
  }
}

</mosaic_0001>

<bundles_post_ra>
// kernel: _net_forward.1
= control target key start
LH: loop header
LB: loop body
LE: loop exit
PB: predicated region body
PF: predicated region fallthrough
CT: control target
= control target key end

     0   :  { %v8437_v2 = vmov 0   ;;  %vm91_vm0 = vcmask 1041408   ;;  %vm8438_vm1 = vmmov 1   ;;  %s9905_s0 = inlined_call_operand.vmem [shape: s32[2,8], index: 0, kind: input, shape index: {}]   ;;  %s9906_s1 = inlined_call_operand.vmem [shape: s32[16,1], index: 1, kind: input, shape index: {}]   ;;  %s9907_s2 = inlined_call_operand.vmem [shape: s32[16,1], index: 2, kind: input, shape index: {}]   ;;  %s9908_s3 = inlined_call_operand.vmem [shape: f32[184,32], index: 3, kind: input, shape index: {}]   ;;  %s9909_s4 = inlined_call_operand.vmem [shape: f32[2,32,96], index: 4, kind: input, shape index: {}]   ;;  %s9910_s5 = inlined_call_operand.vmem [shape: f32[2,32,32], index: 5, kind: input, shape index: {}]   ;;  %s9911_s6 = inlined_call_operand.vmem [shape: f32[2,32,64], index: 6, kind: input, shape index: {}]   ;;  %s9912_s7 = inlined_call_operand.vmem [shape: f32[2,64,32], index: 7, kind: input, shape index: {}]   ;;  %s9913_s8 = inlined_call_operand.vmem [shape: f32[2,48,128], index: 8, kind: input, shape index: {}]   ;;  %s9914_s9 = inlined_call_operand.vmem [shape: f32[56,128], index: 9, kind: input, shape index: {}]   ;;  %s9915_s10 = inlined_call_operand.vmem [shape: f32[2,128], index: 10, kind: output, shape index: {0}]   ;;  %s9916_s11 = inlined_call_operand.hbm [shape: s32[2,8], index: 11, kind: output, shape index: {1}]  }
   0x1   :  { %v39_v0 = vld [vmem:[%s9906_s1 + $0x8] sm:$0xff]  ;;  %v38_v1 = vld [vmem:[%s9906_s1] sm:$0xff]  ;;  %8192 = vset.pattern.permute.xlu1 %v8437_v2  ;;  %8191 = vset.pattern.permute.xlu0 %v8437_v2  ;;  %v70_v7 = vld [vmem:[%s9908_s3 + $0x10] sm:$0xff] }
   0x2   :  { %v68_v3 = vld [vmem:[%s9908_s3] sm:$0xff]  ;;  %v69_v4 = vld [vmem:[%s9908_s3 + $0x8] sm:$0xff]  ;;  %46 = vperm.xlu1 %8192, %v39_v0   ;;  %43 = vperm.xlu0 %8191, %v38_v1   ;;  %v71_v8 = vld [vmem:[%s9908_s3 + $0x18] sm:$0xff] }
   0x3   :  { %v55_v5 = vld [vmem:[%s9907_s2 + $0x8] sm:$0xff]  ;;  %v7874_v6 = vpack.c.bf16 %v69_v4, %v68_v3  ;;  %v54_v9 = vld [vmem:[%s9907_s2] sm:$0xff]  ;;  %v7878_v10 = vpack.c.bf16 %v71_v8, %v70_v7  ;;  %v82_v15 = vld [vmem:[%s9908_s3 + $0x70] sm:$0x3] }
   0x4   :  { %v72_v11 = vld [vmem:[%s9908_s3 + $0x20] sm:$0xff]  ;;  %v73_v12 = vld [vmem:[%s9908_s3 + $0x28] sm:$0xff]  ;;  %vm7869_vm2 = vmpackc.low %vm91_vm0, %vm8438_vm1 }
   0x5   :  { %7875 = vmatprep.subr.bf16.mxu0 %v7874_v6  ;;  %v81_v13 = vld [vmem:[%s9908_s3 + $0x68] sm:$0xff]  ;;  %v7882_v14 = vpack.c.bf16 %v73_v12, %v72_v11  ;;  %v74_v16 = vld [vmem:[%s9908_s3 + $0x30] sm:$0xff]  ;;  %v75_v17 = vld [vmem:[%s9908_s3 + $0x38] sm:$0xff] }
   0x6   :  { %7877 = vmatpush3.bf16.msra.mxu0 %v7874_v6  ;;  %60 = vperm.xlu1 %8192, %v55_v5   ;;  %v7868_v18 = vpack.c.bf16 %v82_v15, %v81_v13 }
   0x7   :  { %57 = vperm.xlu0 %8191, %v54_v9   ;;  %7879 = vmatprep.subr.bf16.mxu0 %v7878_v10 }
   0x8   :  { %17 = vsyncpa [#allocation3], 0  ;;  %7870 = vmatprep.subr.msk.bf16.mxu1 %vm7869_vm2, %v7868_v18  ;;  %v7886_v19 = vpack.c.bf16 %v75_v17, %v74_v16  ;;  %v76_v20 = vld [vmem:[%s9908_s3 + $0x40] sm:$0xff]  ;;  %v77_v21 = vld [vmem:[%s9908_s3 + $0x48] sm:$0xff]  ;;  %vm177_vm3 = vcmask 1043456   ;;  %v8439_v27 = vmov 0.0   ;;  %v40_v28 = vlaneseq }
   0x9   :  { %7873 = vmatpush3.bf16.msk.msra.mxu1 %vm7869_vm2, %v7868_v18  ;;  %v7890_v22 = vpack.c.bf16 %v77_v21, %v76_v20  ;;  %v78_v23 = vld [vmem:[%s9908_s3 + $0x50] sm:$0xff]  ;;  %v79_v24 = vld [vmem:[%s9908_s3 + $0x58] sm:$0xff]  ;;  %v80_v26 = vld [vmem:[%s9908_s3 + $0x60] sm:$0xf]  ;;  %vm170_vm4 = vcmask 818176   ;;  %vm84_vm7 = vcmask 80896  }
   0xa   :  { %7881 = vmatpush3.bf16.msra.mxu0 %v7878_v10  ;;  %v7894_v25 = vpack.c.bf16 %v79_v24, %v78_v23  ;;  %v8576_v29 = vand.u32 127, %v40_v28  ;;  %v83_v41 = vld [vmem:[%s9908_s3 + $0x78] sm:$0xff]  ;;  %vm260_vm10 = vcmask 261120   ;;  %v326_v59 = vld [vmem:[%s9909_s4] sm:$0xff]  ;;  %v327_v60 = vld [vmem:[%s9909_s4 + $0x8] sm:$0xff]  ;;  %vm8440_vm11 = vmmov 0  }
   0xb   :  { %7883 = vmatprep.subr.bf16.mxu0 %v7882_v14  ;;  %v328_v61 = vld [vmem:[%s9909_s4 + $0x10] sm:$0xff]  ;;  %v7898_v62 = vpack.c.bf16 %v327_v60, %v326_v59  ;;  %v329_v63 = vld [vmem:[%s9909_s4 + $0x18] sm:$0xff]  ;;  %v6798_v8 = vld [vmem:[%s9914_s9] ss:$0 sm:$0xff]  ;;  %s8441_s1 = smov 120   ;;  %s8442_s28 = smov 104  }
   0xc   :  { %v7902_v0 = vpack.c.bf16 %v329_v63, %v328_v61  ;;  %v6799_v10 = vld [vmem:[%s9914_s9 + $0x1] ss:$0 sm:$0xff]  ;;  %v6800_v17 = vld [vmem:[%s9914_s9 + $0x2] ss:$0 sm:$0xff]  ;;  %s8443_s29 = smov 112   ;;  %s8444_s30 = smov 96  }
   0xd   :  { %7899 = vmatprep.subr.bf16.mxu1 %v7898_v62  ;;  %vm432_vm12 = vcmask 64512   ;;  %s8448_s17 = smov 8   ;;  %s8449_s21 = smov 16   ;;  %vm1787_vm14 = vcmask 130048   ;;  %vm1790_vm15 = vcmask 195584   ;;  %vm2041_vm1 = vcmask 523264  }
   0xe   :  { %7885 = vmatpush3.bf16.msra.mxu0 %v7882_v14  ;;  %s8450_s22 = smov 24   ;;  %vm4021_vm2 = vcmask 1041409   ;;  %s8452_s2 = smov 32  }
   0xf   :  { %7887 = vmatprep.subr.bf16.mxu0 %v7886_v19  ;;  %s8453_s12 = smov 80  }
  0x12   :  { %7889 = vmatpush3.bf16.msra.mxu0 %v7886_v19 }
  0x13   :  { %7891 = vmatprep.subr.bf16.mxu0 %v7890_v22 }
  0x16   :  { %7893 = vmatpush3.bf16.msra.mxu0 %v7890_v22 }
  0x17   :  { %7895 = vmatprep.subr.bf16.mxu0 %v7894_v25 }
  0x1a   :  { %7897 = vmatpush3.bf16.msra.mxu0 %v7894_v25 }
  0x1b   :  { %7271 = vmatprep.subr.msk.mxu0 %vm177_vm3, %v80_v26 }
  0x1e   :  { %7272 = vmatpush3.msk.msra.mxu0 %vm177_vm3, %v80_v26  ;;  %vm4026_vm3 = vcmask 1043459  }
  0x1f   :  { %7317 = vmatprep.subr.mxu0 %v8439_v27 }
  0x81   :  { %v47_v30 = vpop.permute.xlu1 %46  ;;  %v44_v31 = vpop.permute.xlu0 %43 }
  0x82   :  { %vm49_vm5 = vcmp.eq.s32.totalorder %v47_v30, %v8576_v29  ;;  %vm48_vm6 = vcmp.eq.s32.totalorder %v44_v31, %v8576_v29 }
  0x83   :  { %v6789_v32 = vsel %vm49_vm5, 1.0, %v8439_v27  ;;  %v6788_v33 = vsel %vm48_vm6, 1.0, %v8439_v27 }
  0x84   :  { %7273 = vmatprep.mubr.msk.f32.mxu0 %vm170_vm4, %v6788_v33 }
  0x85   :  { %v61_v34 = vpop.permute.xlu1 %60  ;;  %7274 = vmatmul.mubr.msk.f32.vlgmr.msra.gmra.mrb[0].mxu0 %vm170_vm4, %v6789_v32  ;;  %vm4035_vm4 = vcmask 392192  }
  0x86   :  { %v58_v35 = vpop.permute.xlu0 %57  ;;  %vm63_vm8 = vcmp.eq.s32.totalorder %v61_v34, %v8576_v29  ;;  %7319 = vmatprep.mubr.msk.f32.mxu0 %vm8440_vm11, %v8439_v27 }
  0x87   :  { %vm62_vm9 = vcmp.eq.s32.totalorder %v58_v35, %v8576_v29  ;;  %v6791_v36 = vsel %vm63_vm8, 1.0, %v8439_v27 }
  0x88   :  { %v6790_v37 = vsel %vm62_vm9, 1.0, %v8439_v27 }
  0x89   :  { %7244 = vmatprep.mubr.msk.f32.mxu1 %vm84_vm7, %v6790_v37 }
  0x8a   :  { %7245 = vmatmul.mubr.msk.f32.vlgmr.msra.gmra.mrb[0].mxu1 %vm84_vm7, %v6791_v36 }
  0x8b   :  { %7901 = vmatpush3.bf16.msra.mxu1 %v7898_v62 }
  0x8c   :  { %7903 = vmatprep.subr.bf16.mxu1 %v7902_v0 }
  0x8f   :  { %7905 = vmatpush3.bf16.msra.mxu1 %v7902_v0 }
  0x90   :  { %7287 = vmatprep.subr.mxu1 %v8439_v27 }
 0x158   :  { %v7275_v38 = vpop.f32.mrb[0].mxu0 }
 0x159   :  { %v247_v39 = vpop.f32.mrb[1].mxu0 }
 0x15d   :  { %v7246_v40 = vpop.f32.mrb[0].mxu1 }
 0x15e   :  { %v253_v42 = vadd.f32 %v7275_v38, %v7246_v40  ;;  %v161_v43 = vpop.f32.mrb[1].mxu1 }
 0x15f   :  { %v248_v44 = vadd.f32 %v247_v39, %v161_v43  ;;  %v8445_v39 = vmov 1966171168   ;;  %v8723_v43 = vshrl.u32 %v40_v28, 7 }
 0x160   :  { %v257_v45 = vadd.f32 %v253_v42, %v83_v41  ;;  %v305_v40 = vunpack.c.l.s4 %v8445_v39 }
 0x161   :  { %v256_v46 = vadd.f32 %v248_v44, %v83_v41  ;;  %v300_v41 = vld [vmem:[%s9905_s0] sm:$0x3]  ;;  %s8447_s0 = smov 64   ;;  %vm4010_vm5 = vcmp.lt.s32.totalorder %v8723_v43, 2 }
 0x162   :  { %v264_v47 = vsel %vm260_vm10, %v257_v45, 0.0  ;;  %v306_v42 = vunpack.c.0.s8 %v305_v40  ;;  %vm301_vm13 = vcmp.gt.s32.totalorder %v300_v41, 0 }
 0x163   :  { %265 = vadd.xlane.f32.xlu1 %v264_v47  ;;  %v261_v48 = vsel %vm260_vm10, %v256_v46, 0.0 }
 0x164   :  { %262 = vadd.xlane.f32.xlu0 %v261_v48  ;;  %v309_v44 = vsub.s32 %v306_v42, %v8723_v43 }
 0x1f0   :  { %v266_v49 = vpop.xlane.xlu1 %265 }
 0x1f1   :  { %v269_v50 = vmul.f32 0.03125, %v266_v49  ;;  %v263_v51 = vpop.xlane.xlu0 %262  ;;  %v1049_v49 = vsub.s32 0, %v8723_v43 }
 0x1f2   :  { %v268_v52 = vmul.f32 0.03125, %v263_v51 }
 0x1f3   :  { %v271_v53 = vsub.f32 %v257_v45, %v269_v50  ;;  %v8446_v45 = vmov -10000.0  }
 0x1f4   :  { %v270_v54 = vsub.f32 %v256_v46, %v268_v52  ;;  %v302_v46 = vsel %vm301_vm13, 0.0, %v8446_v45 }
 0x1f5   :  { %v273_v57 = vmul.f32 %v271_v53, %v271_v53  ;;  %v310_v47 = vrot.slane %v302_v46, %v309_v44 }
 0x1f6   :  { %v272_v55 = vmul.f32 %v270_v54, %v270_v54 }
 0x1f7   :  { %v277_v58 = vsel %vm260_vm10, %v273_v57, 0.0  ;;  %v318_v48 = vrot.slane %v310_v47, %v309_v44  ;;  %v311_v52 = vcombine.high %v310_v47, %v310_v47 }
 0x1f8   :  { %v274_v56 = vsel %vm260_vm10, %v272_v55, 0.0 }
 0x1f9   :  { %275 = vadd.xlane.f32.xlu0 %v274_v56  ;;  %v8727_v50 = vrot.slane %v318_v48, %v1049_v49  ;;  %v325_v56 = vrot.slane %v311_v52, %v309_v44 }
 0x1fb   :  { %v8731_v57 = vrot.slane %v325_v56, %v1049_v49 }
 0x1fd   :  { %278 = vadd.xlane.f32.xlu0 %v277_v58 }
 0x286   :  { %v276_v1 = vpop.xlane.xlu0 %275 }
 0x287   :  { %v280_v2 = vmul.f32 0.03125, %v276_v1 }
 0x289   :  { %v282_v3 = vadd.f32 1e-12, %v280_v2 }
 0x28a   :  { %v279_v4 = vpop.xlane.xlu0 %278 }
 0x28b   :  { %8193 = vrsqrt.f32 %v282_v3  ;;  %v281_v5 = vmul.f32 0.03125, %v279_v4 }
 0x28d   :  { %v283_v6 = vadd.f32 1e-12, %v281_v5 }
 0x28f   :  { %8195 = vrsqrt.f32 %v283_v6 }
 0x295   :  { %v8194_v7 = vpop.eup %8193 }
 0x296   :  { %v286_v9 = vmul.f32 %v8194_v7, %v270_v54 }
 0x298   :  { %v292_v11 = vmul.f32 %v6798_v8, %v286_v9 }
 0x299   :  { %v8196_v12 = vpop.eup %8195 }
 0x29a   :  { %v287_v13 = vmul.f32 %v8196_v12, %v271_v53  ;;  %v8612_v14 = vadd.f32 %v6799_v10, %v292_v11 }
 0x29c   :  { %v293_v15 = vmul.f32 %v6798_v8, %v287_v13  ;;  %7284 = vmatprep.mubr.msk.f32.mxu1 %vm260_vm10, %v8612_v14 }
 0x29e   :  { %v8616_v16 = vadd.f32 %v6799_v10, %v293_v15 }
 0x2a0   :  { %7285 = vmatmul.mubr.msk.f32.vlgmr.msra.gmra.mrb[2].mxu1 %vm260_vm10, %v8616_v16 }
 0x2a1   :  { %7289 = vmatprep.mubr.msk.f32.mxu1 %vm8440_vm11, %v8439_v27 }
 0x373   :  { %v7286_v18 = vpop.f32.mrb[2].mxu1 }
 0x374   :  { %v8627_v19 = vadd.f32 %v7286_v18, %v6800_v17  ;;  %v407_v20 = vpop.f32.mrb[3].mxu1 }
 0x375   :  { %v8629_v21 = vadd.f32 %v6800_v17, %v407_v20 }
 0x376   :  { %420 = vrot.lane.b32.xlu0 %v8627_v19, %s8441_s1 }
 0x377   :  { %418 = vrot.lane.b32.xlu1 %v8629_v21, %s8441_s1 }
 0x37a   :  { %426 = vrot.lane.b32.xlu0 %v8629_v21, %s8442_s28 }
 0x37b   :  { %422 = vrot.lane.b32.xlu1 %v8629_v21, %s8443_s29 }
 0x37e   :  { %430 = vrot.lane.b32.xlu0 %v8629_v21, %s8444_s30 }
 0x37f   :  { %424 = vrot.lane.b32.xlu1 %v8627_v19, %s8443_s29 }
 0x383   :  { %428 = vrot.lane.b32.xlu1 %v8627_v19, %s8442_s28 }
 0x387   :  { %507 = vrot.lane.b32.xlu1 %v8627_v19, %s8444_s30 }
 0x3e8   :  { %v8647_v22 = vpop.permute.xlu0 %420 }
 0x3e9   :  { %659 = vrot.lane.b32.xlu1 %v8647_v22, %s8444_s30  ;;  %v8651_v23 = vpop.permute.xlu1 %418 }
 0x3ea   :  { %583 = vrot.lane.b32.xlu0 %v8651_v23, %s8444_s30 }
 0x3ec   :  { %v8655_v24 = vpop.permute.xlu0 %426 }
 0x3ed   :  { %v8657_v25 = vpop.permute.xlu1 %422 }
 0x3ee   :  { %735 = vrot.lane.b32.xlu0 %v8657_v25, %s8444_s30 }
 0x3f0   :  { %v431_v26 = vpop.permute.xlu0 %430 }
 0x3f1   :  { %7288 = vmatpush3.xpose.msk.msra.mxu1 %vm432_vm12, %v431_v26  ;;  %v8662_v30 = vpop.permute.xlu1 %424 }
 0x3f2   :  { %887 = vrot.lane.b32.xlu0 %v8655_v24, %s8444_s30  ;;  %811 = vrot.lane.b32.xlu1 %v8662_v30, %s8444_s30 }
 0x3f3   :  { %7292 = vmatprep.subr.mxu1 %v8439_v27 }
 0x3f4   :  { %7290 = vmatmul.mubr.msk.f32.vlgmr.msra.gmra.mrb[4].mxu1 %vm432_vm12, %v8629_v21 }
 0x3f5   :  { %v8671_v31 = vpop.permute.xlu1 %428  ;;  %7294 = vmatprep.mubr.msk.f32.mxu1 %vm8440_vm11, %v8439_v27 }
 0x3f6   :  { %963 = vrot.lane.b32.xlu1 %v8671_v31, %s8444_s30 }
 0x3f9   :  { %v508_v32 = vpop.permute.xlu1 %507 }
 0x3fa   :  { %7293 = vmatpush3.xpose.msk.msra.mxu1 %vm432_vm12, %v508_v32 }
 0x3fb   :  { %7297 = vmatprep.subr.mxu1 %v8439_v27 }
 0x3fd   :  { %7295 = vmatmul.mubr.msk.f32.vlgmr.msra.gmra.mrb[6].mxu1 %vm432_vm12, %v8627_v19 }
 0x3fe   :  { %7299 = vmatprep.mubr.msk.f32.mxu1 %vm8440_vm11, %v8439_v27 }
 0x45b   :  { %v660_v34 = vpop.permute.xlu1 %659 }
 0x45c   :  { %v584_v33 = vpop.permute.xlu0 %583 }
 0x45d   :  { %7298 = vmatpush3.xpose.msk.msra.mxu1 %vm432_vm12, %v584_v33 }
 0x45e   :  { %7302 = vmatprep.subr.mxu1 %v8439_v27 }
 0x460   :  { %v736_v35 = vpop.permute.xlu0 %735  ;;  %7300 = vmatmul.mubr.msk.f32.vlgmr.msra.gmra.mrb[8].mxu1 %vm432_vm12, %v8651_v23 }
 0x461   :  { %7303 = vmatpush3.xpose.msk.msra.mxu1 %vm432_vm12, %v660_v34  ;;  %7304 = vmatprep.mubr.msk.f32.mxu1 %vm8440_vm11, %v8439_v27 }
 0x462   :  { %7307 = vmatprep.subr.mxu1 %v8439_v27 }
 0x464   :  { %v888_v36 = vpop.permute.xlu0 %887  ;;  %7305 = vmatmul.mubr.msk.f32.vlgmr.msra.gmra.mrb[10].mxu1 %vm432_vm12, %v8647_v22  ;;  %v812_v37 = vpop.permute.xlu1 %811 }
 0x465   :  { %7308 = vmatpush3.xpose.msk.msra.mxu1 %vm432_vm12, %v736_v35  ;;  %7318 = vmatpush3.xpose.msk.msra.mxu0 %vm432_vm12, %v888_v36 }
 0x466   :  { %7309 = vmatprep.mubr.msk.f32.mxu1 %vm8440_vm11, %v8439_v27  ;;  %7312 = vmatprep.subr.mxu1 %v8439_v27 }
 0x467   :  { %7327 = vmatprep.subr.mxu0 %v8439_v27 }
 0x468   :  { %7310 = vmatmul.mubr.msk.f32.vlgmr.msra.gmra.mrb[12].mxu1 %vm432_vm12, %v8657_v25  ;;  %7320 = vmatmul.mubr.msk.f32.vlgmr.msra.gmra.mrb[2].mxu0 %vm432_vm12, %v8655_v24  ;;  %v964_v38 = vpop.permute.xlu1 %963 }
 0x469   :  { %7313 = vmatpush3.xpose.msk.msra.mxu1 %vm432_vm12, %v812_v37  ;;  %7314 = vmatprep.mubr.msk.f32.mxu1 %vm8440_vm11, %v8439_v27 }
 0x46a   :  { %7322 = vmatprep.subr.mxu1 %v8439_v27  ;;  %7329 = vmatprep.mubr.msk.f32.mxu0 %vm8440_vm11, %v8439_v27 }
 0x46c   :  { %7315 = vmatmul.mubr.msk.f32.vlgmr.msra.gmra.mrb[14].mxu1 %vm432_vm12, %v8662_v30 }
 0x46d   :  { %7323 = vmatpush3.xpose.msk.msra.mxu1 %vm432_vm12, %v964_v38  ;;  %7324 = vmatprep.mubr.msk.f32.mxu1 %vm8440_vm11, %v8439_v27 }
 0x46e   :  { %7332 = vmatprep.subr.mxu1 %v8439_v27 }
 0x470   :  { %7325 = vmatmul.mubr.msk.f32.vlgmr.msra.gmra.mrb[16].mxu1 %vm432_vm12, %v8671_v31 }
 0x471   :  { %7334 = vmatprep.mubr.msk.f32.mxu1 %vm8440_vm11, %v8439_v27 }
 0x4c7   :  { %v503_v51 = vpop.f32.mrb[4].mxu1 }
 0x4c8   :  { %v1039_v53 = vmul.f32 0.35355338, %v503_v51  ;;  %v7291_v54 = vpop.f32.mrb[5].mxu1 }
 0x4ca   :  { %v1057_v55 = vadd.f32 %v8727_v50, %v1039_v53 }
 0x4cc   :  { %v1065_v28 = vsel %vm432_vm12, %v1057_v55, -inf }
 0x4cd   :  { %1066 = vmax.xlane.f32.xlu0 %v1065_v28 }
 0x4d0   :  { %v579_v58 = vpop.f32.mrb[6].mxu1 }
 0x4d1   :  { %v1040_v59 = vmul.f32 0.35355338, %v579_v58  ;;  %v7296_v60 = vpop.f32.mrb[7].mxu1 }
 0x4d3   :  { %v1058_v61 = vadd.f32 %v8731_v57, %v1040_v59 }
 0x4d5   :  { %v1068_v62 = vsel %vm432_vm12, %v1058_v61, -inf }
 0x4d6   :  { %1069 = vmax.xlane.f32.xlu1 %v1068_v62 }
 0x533   :  { %v655_v63 = vpop.f32.mrb[8].mxu1 }
 0x534   :  { %v1041_v0 = vmul.f32 0.35355338, %v655_v63  ;;  %v7301_v1 = vpop.f32.mrb[9].mxu1 }
 0x536   :  { %v1059_v2 = vadd.f32 %v8727_v50, %v1041_v0 }
 0x537   :  { %v731_v3 = vpop.f32.mrb[10].mxu1 }
 0x538   :  { %v1042_v4 = vmul.f32 0.35355338, %v731_v3  ;;  %v7306_v5 = vpop.f32.mrb[11].mxu1  ;;  %v1071_v6 = vsel %vm432_vm12, %v1059_v2, -inf }
 0x539   :  { %1072 = vmax.xlane.f32.xlu0 %v1071_v6 }
 0x53a   :  { %v1060_v7 = vadd.f32 %v8731_v57, %v1042_v4 }
 0x53b   :  { %v807_v8 = vpop.f32.mrb[12].mxu1  ;;  %v959_v9 = vpop.f32.mrb[2].mxu0 }
 0x53c   :  { %v1043_v10 = vmul.f32 0.35355338, %v807_v8  ;;  %v1045_v11 = vmul.f32 0.35355338, %v959_v9  ;;  %v7311_v12 = vpop.f32.mrb[13].mxu1  ;;  %v7321_v13 = vpop.f32.mrb[3].mxu0 }
 0x53d   :  { %v1074_v15 = vsel %vm432_vm12, %v1060_v7, -inf }
 0x53e   :  { %1075 = vmax.xlane.f32.xlu0 %v1074_v15  ;;  %v1061_v17 = vadd.f32 %v8727_v50, %v1043_v10  ;;  %v1063_v33 = vadd.f32 %v8727_v50, %v1045_v11 }
 0x53f   :  { %v883_v18 = vpop.f32.mrb[14].mxu1 }
 0x540   :  { %v1044_v20 = vmul.f32 0.35355338, %v883_v18  ;;  %v7316_v26 = vpop.f32.mrb[15].mxu1  ;;  %v1077_v32 = vsel %vm432_vm12, %v1061_v17, -inf  ;;  %v1083_v38 = vsel %vm432_vm12, %v1063_v33, -inf }
 0x541   :  { %1078 = vmax.xlane.f32.xlu1 %v1077_v32 }
 0x542   :  { %v1062_v34 = vadd.f32 %v8731_v57, %v1044_v20 }
 0x543   :  { %v1035_v35 = vpop.f32.mrb[16].mxu1 }
 0x544   :  { %v1046_v36 = vmul.f32 0.35355338, %v1035_v35  ;;  %v7326_v37 = vpop.f32.mrb[17].mxu1  ;;  %v1080_v39 = vsel %vm432_vm12, %v1062_v34, -inf }
 0x545   :  { %1084 = vmax.xlane.f32.xlu1 %v1083_v38  ;;  %1081 = vmax.xlane.f32.xlu0 %v1080_v39 }
 0x546   :  { %v1064_v40 = vadd.f32 %v8731_v57, %v1046_v36 }
 0x548   :  { %v1086_v41 = vsel %vm432_vm12, %v1064_v40, -inf }
 0x549   :  { %1087 = vmax.xlane.f32.xlu0 %v1086_v41 }
 0x556   :  { %1153 = vrot.lane.b32.xlu1 %v8629_v21, %s8447_s0 }
 0x55a   :  { %1305 = vrot.lane.b32.xlu1 %v8651_v23, %s8447_s0  ;;  %v1067_v45 = vpop.xlane.xlu0 %1066 }
 0x55b   :  { %v1089_v46 = vsub.f32 %v1057_v55, %v1067_v45 }
 0x55d   :  { %v1097_v47 = vmul.f32 1.442695, %v1089_v46 }
 0x55e   :  { %1381 = vrot.lane.b32.xlu1 %v8647_v22, %s8447_s0 }
 0x55f   :  { %1229 = vrot.lane.b32.xlu0 %v8627_v19, %s8447_s0 }
 0x562   :  { %1533 = vrot.lane.b32.xlu1 %v8662_v30, %s8447_s0 }
 0x563   :  { %1457 = vrot.lane.b32.xlu0 %v8657_v25, %s8447_s0  ;;  %v1070_v42 = vpop.xlane.xlu1 %1069 }
 0x564   :  { %v1090_v44 = vsub.f32 %v1058_v61, %v1070_v42 }
 0x566   :  { %v1099_v21 = vmul.f32 1.442695, %v1090_v44 }
 0x568   :  { %8197 = vpow2.f32 %v1099_v21 }
 0x569   :  { %8199 = vpow2.f32 %v1097_v47 }
 0x572   :  { %v8759_v23 = vpop.eup %8197 }
 0x573   :  { %v1116_v22 = vsel %vm432_vm12, %v8759_v23, 0.0  ;;  %v8763_v19 = vpop.eup %8199 }
 0x574   :  { %v1113_v30 = vsel %vm432_vm12, %v8763_v19, 0.0 }
 0x582   :  { %1117 = vadd.xlane.f32.xlu0 %v1116_v22 }
 0x586   :  { %1114 = vadd.xlane.f32.xlu1 %v1113_v30 }
 0x5c6   :  { %v1073_v25 = vpop.xlane.xlu0 %1072 }
 0x5c7   :  { %v1091_v48 = vsub.f32 %v1059_v2, %v1073_v25 }
 0x5c9   :  { %v1101_v49 = vmul.f32 1.442695, %v1091_v48 }
 0x5cb   :  { %8201 = vpow2.f32 %v1101_v49  ;;  %v1076_v51 = vpop.xlane.xlu0 %1075 }
 0x5cc   :  { %v1092_v52 = vsub.f32 %v1060_v7, %v1076_v51 }
 0x5ce   :  { %v1103_v53 = vmul.f32 1.442695, %v1092_v52  ;;  %v1079_v54 = vpop.xlane.xlu1 %1078 }
 0x5cf   :  { %v1093_v55 = vsub.f32 %v1061_v17, %v1079_v54 }
 0x5d0   :  { %8203 = vpow2.f32 %v1103_v53 }
 0x5d1   :  { %v1105_v63 = vmul.f32 1.442695, %v1093_v55 }
 0x5d2   :  { %v1082_v56 = vpop.xlane.xlu0 %1081  ;;  %v1085_v28 = vpop.xlane.xlu1 %1084 }
 0x5d3   :  { %v1094_v58 = vsub.f32 %v1062_v34, %v1082_v56  ;;  %v1095_v59 = vsub.f32 %v1063_v33, %v1085_v28 }
 0x5d5   :  { %v8202_v60 = vpop.eup %8201  ;;  %v1107_v61 = vmul.f32 1.442695, %v1094_v58  ;;  %v1109_v62 = vmul.f32 1.442695, %v1095_v59  ;;  %v1793_v58 = vld [vmem:[%s9910_s5] sm:$0xff]  ;;  %v1794_v59 = vld [vmem:[%s9910_s5 + $0x8] sm:$0xff] }
 0x5d6   :  { %v1088_v0 = vpop.xlane.xlu0 %1087  ;;  %v1154_v1 = vpop.permute.xlu1 %1153  ;;  %v1119_v2 = vsel %vm432_vm12, %v8202_v60, 0.0 }
 0x5d7   :  { %8205 = vpow2.f32 %v1107_v61  ;;  %v1096_v3 = vsub.f32 %v1064_v40, %v1088_v0  ;;  %1120 = vadd.xlane.f32.xlu1 %v1119_v2  ;;  %7328 = vmatpush3.msra.mxu0 %v1154_v1  ;;  %v7906_v61 = vpack.c.bf16 %v1794_v59, %v1793_v58  ;;  %v1796_v0 = vld [vmem:[%s9910_s5 + $0x18] sm:$0xff] }
 0x5d8   :  { %8207 = vpow2.f32 %v1109_v62  ;;  %7337 = vmatprep.subr.mxu0 %v8439_v27 }
 0x5d9   :  { %v1111_v4 = vmul.f32 1.442695, %v1096_v3  ;;  %8209 = vpow2.f32 %v1105_v63  ;;  %v1795_v63 = vld [vmem:[%s9910_s5 + $0x10] sm:$0xff] }
 0x5da   :  { %v8204_v5 = vpop.eup %8203  ;;  %v1230_v6 = vpop.permute.xlu0 %1229  ;;  %v7910_v2 = vpack.c.bf16 %v1796_v0, %v1795_v63 }
 0x5db   :  { %8211 = vpow2.f32 %v1111_v4  ;;  %7333 = vmatpush3.msra.mxu1 %v1230_v6  ;;  %v1122_v7 = vsel %vm432_vm12, %v8204_v5, 0.0  ;;  %v1306_v18 = vpop.permute.xlu1 %1305 }
 0x5dc   :  { %1123 = vadd.xlane.f32.xlu0 %v1122_v7  ;;  %7342 = vmatprep.subr.mxu1 %v8439_v27 }
 0x5de   :  { %v1458_v26 = vpop.permute.xlu0 %1457 }
 0x5df   :  { %v1382_v20 = vpop.permute.xlu1 %1381 }
 0x5e1   :  { %v8206_v8 = vpop.eup %8205 }
 0x5e2   :  { %v8771_v9 = vpop.eup %8207  ;;  %v1128_v10 = vsel %vm432_vm12, %v8206_v8, 0.0 }
 0x5e3   :  { %1129 = vadd.xlane.f32.xlu0 %v1128_v10  ;;  %v1131_v11 = vsel %vm432_vm12, %v8771_v9, 0.0  ;;  %v8210_v12 = vpop.eup %8209  ;;  %v1534_v32 = vpop.permute.xlu1 %1533 }
 0x5e4   :  { %1132 = vadd.xlane.f32.xlu1 %v1131_v11  ;;  %v1125_v17 = vsel %vm432_vm12, %v8210_v12, 0.0 }
 0x5e5   :  { %v8212_v13 = vpop.eup %8211 }
 0x5e6   :  { %v1134_v15 = vsel %vm432_vm12, %v8212_v13, 0.0 }
 0x5e7   :  { %1135 = vadd.xlane.f32.xlu0 %v1134_v15 }
 0x5e8   :  { %1126 = vadd.xlane.f32.xlu1 %v1125_v17 }
 0x5f9   :  { %1685 = vrot.lane.b32.xlu1 %v8671_v31, %s8447_s0 }
 0x5fd   :  { %1609 = vrot.lane.b32.xlu0 %v8655_v24, %s8447_s0 }
 0x60f   :  { %v1118_v33 = vpop.xlane.xlu0 %1117 }
 0x610   :  { %8213 = vrcp.f32 %v1118_v33 }
 0x613   :  { %v1115_v34 = vpop.xlane.xlu1 %1114 }
 0x614   :  { %8215 = vrcp.f32 %v1115_v34 }
 0x61a   :  { %v8214_v35 = vpop.eup %8213 }
 0x61b   :  { %v1146_v36 = vmul.f32 %v8214_v35, %v8759_v23 }
 0x61d   :  { %7335 = vmatmul.mubr.msk.f32.vlgmr.msra.gmra.mrb[18].mxu1 %vm432_vm12, %v1146_v36  ;;  %v6827_v36 = vld [vmem:[%s9914_s9 + $0x3] ss:$0 sm:$0xff] }
 0x61e   :  { %v8216_v37 = vpop.eup %8215  ;;  %7343 = vmatpush3.msra.mxu1 %v1382_v20  ;;  %7344 = vmatprep.mubr.msk.f32.mxu1 %vm8440_vm11, %v8439_v27 }
 0x61f   :  { %v1145_v24 = vmul.f32 %v8216_v37, %v8763_v19  ;;  %7352 = vmatprep.subr.mxu1 %v8439_v27 }
 0x621   :  { %7330 = vmatmul.mubr.msk.f32.vlgmr.msra.gmra.mrb[4].mxu0 %vm432_vm12, %v1145_v24 }
 0x622   :  { %7338 = vmatpush3.msra.mxu0 %v1306_v18  ;;  %7339 = vmatprep.mubr.msk.f32.mxu0 %vm8440_vm11, %v8439_v27 }
 0x623   :  { %7347 = vmatprep.subr.mxu0 %v8439_v27 }
 0x664   :  { %v1121_v31 = vpop.xlane.xlu1 %1120 }
 0x665   :  { %8217 = vrcp.f32 %v1121_v31 }
 0x669   :  { %v1124_v38 = vpop.xlane.xlu0 %1123 }
 0x66a   :  { %8219 = vrcp.f32 %v1124_v38 }
 0x66f   :  { %v8218_v39 = vpop.eup %8217 }
 0x670   :  { %v1130_v40 = vpop.xlane.xlu0 %1129  ;;  %v1147_v41 = vmul.f32 %v8218_v39, %v8202_v60 }
 0x671   :  { %8221 = vrcp.f32 %v1130_v40  ;;  %v1133_v42 = vpop.xlane.xlu1 %1132 }
 0x672   :  { %7340 = vmatmul.mubr.msk.f32.vlgmr.msra.gmra.mrb[6].mxu0 %vm432_vm12, %v1147_v41 }
 0x673   :  { %7348 = vmatpush3.msra.mxu0 %v1458_v26  ;;  %7349 = vmatprep.mubr.msk.f32.mxu0 %vm8440_vm11, %v8439_v27 }
 0x674   :  { %v8220_v44 = vpop.eup %8219  ;;  %v1136_v45 = vpop.xlane.xlu0 %1135  ;;  %7357 = vmatprep.subr.mxu0 %v8439_v27 }
 0x675   :  { %8223 = vrcp.f32 %v1136_v45  ;;  %v1127_v46 = vpop.xlane.xlu1 %1126  ;;  %v1148_v21 = vmul.f32 %v8220_v44, %v8204_v5 }
 0x676   :  { %8225 = vrcp.f32 %v1127_v46 }
 0x677   :  { %7345 = vmatmul.mubr.msk.f32.vlgmr.msra.gmra.mrb[20].mxu1 %vm432_vm12, %v1148_v21  ;;  %8227 = vrcp.f32 %v1133_v42 }
 0x678   :  { %7353 = vmatpush3.msra.mxu1 %v1534_v32  ;;  %7354 = vmatprep.mubr.msk.f32.mxu1 %vm8440_vm11, %v8439_v27  ;;  %v1610_v51 = vpop.permute.xlu0 %1609 }
 0x679   :  { %7362 = vmatprep.subr.mxu1 %v8439_v27  ;;  %v1686_v22 = vpop.permute.xlu1 %1685 }
 0x67b   :  { %v8222_v47 = vpop.eup %8221 }
 0x67c   :  { %v1150_v23 = vmul.f32 %v8222_v47, %v8206_v8 }
 0x67e   :  { %7355 = vmatmul.mubr.msk.f32.vlgmr.msra.gmra.mrb[22].mxu1 %vm432_vm12, %v1150_v23 }
 0x67f   :  { %v8224_v19 = vpop.eup %8223  ;;  %7363 = vmatpush3.msra.mxu1 %v1686_v22  ;;  %7364 = vmatprep.mubr.msk.f32.mxu1 %vm8440_vm11, %v8439_v27 }
 0x680   :  { %v8226_v30 = vpop.eup %8225  ;;  %v1152_v25 = vmul.f32 %v8224_v19, %v8212_v13 }
 0x681   :  { %v1149_v48 = vmul.f32 %v8226_v30, %v8210_v12  ;;  %v8228_v49 = vpop.eup %8227 }
 0x682   :  { %7365 = vmatmul.mubr.msk.f32.vlgmr.msra.gmra.mrb[24].mxu1 %vm432_vm12, %v1152_v25  ;;  %v1151_v52 = vmul.f32 %v8228_v49, %v8771_v9  ;;  %v1926_v25 = vld [vmem:[%s9911_s6 + $0x8] sm:$0xff] }
 0x683   :  { %7350 = vmatmul.mubr.msk.f32.vlgmr.msra.gmra.mrb[8].mxu0 %vm432_vm12, %v1149_v48  ;;  %v1927_v48 = vld [vmem:[%s9911_s6 + $0x10] sm:$0xff] }
 0x684   :  { %7358 = vmatpush3.msra.mxu0 %v1610_v51  ;;  %7359 = vmatprep.mubr.msk.f32.mxu0 %vm8440_vm11, %v8439_v27  ;;  %v1928_v51 = vld [vmem:[%s9911_s6 + $0x18] sm:$0xff] }
 0x685   :  { %7907 = vmatprep.subr.bf16.mxu0 %v7906_v61 }
 0x687   :  { %7360 = vmatmul.mubr.msk.f32.vlgmr.msra.gmra.mrb[10].mxu0 %vm432_vm12, %v1151_v52  ;;  %v7918_v52 = vpack.c.bf16 %v1928_v51, %v1927_v48 }
 0x688   :  { %7909 = vmatpush3.bf16.msra.mxu0 %v7906_v61 }
 0x689   :  { %7911 = vmatprep.subr.bf16.mxu0 %v7910_v2 }
 0x68c   :  { %7913 = vmatpush3.bf16.msra.mxu0 %v7910_v2 }
 0x6f0   :  { %v1301_v53 = vpop.f32.mrb[18].mxu1 }
 0x6f1   :  { %v7336_v54 = vpop.f32.mrb[19].mxu1 }
 0x6f4   :  { %v1225_v55 = vpop.f32.mrb[4].mxu0 }
 0x6f5   :  { %v7331_v56 = vpop.f32.mrb[5].mxu0 }
 0x745   :  { %v1377_v28 = vpop.f32.mrb[6].mxu0 }
 0x746   :  { %1763 = vrot.lane.b32.xlu0 %v1377_v28, %s8448_s17  ;;  %v7341_v60 = vpop.f32.mrb[7].mxu0 }
 0x747   :  { %v6830_v60 = vld [vmem:[%s9914_s9 + $0x4] ss:$0 sm:$0xff] }
 0x74a   :  { %v1453_v62 = vpop.f32.mrb[20].mxu1 }
 0x74b   :  { %1765 = vrot.lane.b32.xlu1 %v1453_v62, %s8448_s17  ;;  %v7346_v1 = vpop.f32.mrb[21].mxu1  ;;  %v6831_v62 = vld [vmem:[%s9914_s9 + $0x5] ss:$0 sm:$0xff] }
 0x751   :  { %v1605_v3 = vpop.f32.mrb[22].mxu1 }
 0x752   :  { %1773 = vrot.lane.b32.xlu1 %v1605_v3, %s8449_s21  ;;  %v7356_v4 = vpop.f32.mrb[23].mxu1 }
 0x755   :  { %v1757_v5 = vpop.f32.mrb[24].mxu1 }
 0x756   :  { %v1529_v6 = vpop.f32.mrb[8].mxu0  ;;  %1781 = vrot.lane.b32.xlu1 %v1757_v5, %s8450_s22  ;;  %v7366_v7 = vpop.f32.mrb[25].mxu1  ;;  %v2033_v5 = vld [vmem:[%s9912_s7] sm:$0xff] }
 0x757   :  { %1771 = vrot.lane.b32.xlu0 %v1529_v6, %s8449_s21  ;;  %v7351_v8 = vpop.f32.mrb[9].mxu0  ;;  %v2034_v6 = vld [vmem:[%s9912_s7 + $0x8] sm:$0xff] }
 0x758   :  { %v7922_v7 = vpack.c.bf16 %v2034_v6, %v2033_v5  ;;  %v2035_v8 = vld [vmem:[%s9912_s7 + $0x10] sm:$0xff] }
 0x75a   :  { %v1681_v9 = vpop.f32.mrb[10].mxu0  ;;  %7923 = vmatprep.subr.bf16.mxu0 %v7922_v7 }
 0x75b   :  { %1779 = vrot.lane.b32.xlu0 %v1681_v9, %s8450_s22  ;;  %v7361_v10 = vpop.f32.mrb[11].mxu0  ;;  %v2036_v9 = vld [vmem:[%s9912_s7 + $0x18] sm:$0xff] }
 0x75c   :  { %v7926_v10 = vpack.c.bf16 %v2036_v9, %v2035_v8 }
 0x7b8   :  { %v1764_v12 = vpop.permute.xlu0 %1763 }
 0x7b9   :  { %v1785_v17 = vsel %vm432_vm12, %v1225_v55, %v1764_v12  ;;  %v2038_v12 = vld [vmem:[%s9912_s7 + $0x28] sm:$0xff] }
 0x7bd   :  { %v1766_v11 = vpop.permute.xlu1 %1765 }
 0x7be   :  { %v1786_v20 = vsel %vm432_vm12, %v1301_v53, %v1766_v11  ;;  %v2037_v11 = vld [vmem:[%s9912_s7 + $0x20] sm:$0xff] }
 0x7c4   :  { %v1774_v13 = vpop.permute.xlu1 %1773 }
 0x7c5   :  { %v1789_v33 = vsel %vm1787_vm14, %v1786_v20, %v1774_v13  ;;  %v7930_v13 = vpack.c.bf16 %v2038_v12, %v2037_v11  ;;  %v6832_v20 = vld [vmem:[%s9914_s9 + $0x6] ss:$0 sm:$0xff] }
 0x7c8   :  { %v1782_v18 = vpop.permute.xlu1 %1781 }
 0x7c9   :  { %v1772_v15 = vpop.permute.xlu0 %1771  ;;  %v1792_v35 = vsel %vm1790_vm15, %v1789_v33, %v1782_v18 }
 0x7ca   :  { %v1788_v26 = vsel %vm1787_vm14, %v1785_v17, %v1772_v15  ;;  %v2039_v15 = vld [vmem:[%s9912_s7 + $0x30] sm:$0xff]  ;;  %v2040_v17 = vld [vmem:[%s9912_s7 + $0x38] sm:$0xff] }
 0x7cb   :  { %v7934_v18 = vpack.c.bf16 %v2040_v17, %v2039_v15 }
 0x7cd   :  { %v1780_v32 = vpop.permute.xlu0 %1779 }
 0x7ce   :  { %v1791_v34 = vsel %vm1790_vm15, %v1788_v26, %v1780_v32 }
 0x7cf   :  { %7375 = vmatprep.mubr.msk.f32.mxu0 %vm260_vm10, %v1791_v34 }
 0x7d0   :  { %7376 = vmatmul.mubr.msk.f32.vlgmr.msra.gmra.mrb[12].mxu0 %vm260_vm10, %v1792_v35 }
 0x7d1   :  { %7925 = vmatpush3.bf16.msra.mxu0 %v7922_v7 }
 0x7d2   :  { %7927 = vmatprep.subr.bf16.mxu0 %v7926_v10 }
 0x7d5   :  { %7929 = vmatpush3.bf16.msra.mxu0 %v7926_v10 }
 0x7d6   :  { %7931 = vmatprep.subr.bf16.mxu0 %v7930_v13 }
 0x7d9   :  { %7933 = vmatpush3.bf16.msra.mxu0 %v7930_v13  ;;  %v6838_v13 = vld [vmem:[%s9914_s9 + $0x8] ss:$0 sm:$0xff] }
 0x7da   :  { %7935 = vmatprep.subr.bf16.mxu0 %v7934_v18 }
 0x7dd   :  { %7937 = vmatpush3.bf16.msra.mxu0 %v7934_v18 }
 0x7de   :  { %7429 = vmatprep.subr.mxu0 %v8439_v27 }
 0x8a3   :  { %v7377_v37 = vpop.f32.mrb[12].mxu0 }
 0x8a4   :  { %v1880_v24 = vadd.f32 %v7377_v37, %v6827_v36  ;;  %v1874_v31 = vpop.f32.mrb[13].mxu0 }
 0x8a5   :  { %v1875_v38 = vadd.f32 %v6827_v36, %v1874_v31 }
 0x8a6   :  { %v1884_v39 = vadd.f32 %v1880_v24, %v8616_v16 }
 0x8a7   :  { %v1883_v40 = vadd.f32 %v1875_v38, %v8612_v14  ;;  %v1925_v14 = vld [vmem:[%s9911_s6] sm:$0xff] }
 0x8a8   :  { %v1890_v41 = vsel %vm260_vm10, %v1884_v39, 0.0  ;;  %v7914_v49 = vpack.c.bf16 %v1926_v25, %v1925_v14 }
 0x8a9   :  { %1891 = vadd.xlane.f32.xlu1 %v1890_v41  ;;  %v1887_v42 = vsel %vm260_vm10, %v1883_v40, 0.0 }
 0x8aa   :  { %1888 = vadd.xlane.f32.xlu0 %v1887_v42  ;;  %7915 = vmatprep.subr.bf16.mxu1 %v7914_v49 }
 0x8ab   :  { %7917 = vmatpush3.bf16.msra.mxu1 %v7914_v49 }
 0x8ac   :  { %7919 = vmatprep.subr.bf16.mxu1 %v7918_v52 }
 0x8af   :  { %7921 = vmatpush3.bf16.msra.mxu1 %v7918_v52 }
 0x936   :  { %v1892_v44 = vpop.xlane.xlu1 %1891 }
 0x937   :  { %v1894_v45 = vmul.f32 0.03125, %v1892_v44  ;;  %v1889_v46 = vpop.xlane.xlu0 %1888 }
 0x938   :  { %v1893_v21 = vmul.f32 0.03125, %v1889_v46 }
 0x939   :  { %v1896_v47 = vsub.f32 %v1884_v39, %v1894_v45 }
 0x93a   :  { %v1895_v23 = vsub.f32 %v1883_v40, %v1893_v21 }
 0x93b   :  { %v1898_v30 = vmul.f32 %v1896_v47, %v1896_v47 }
 0x93c   :  { %v1897_v22 = vmul.f32 %v1895_v23, %v1895_v23 }
 0x93d   :  { %v1902_v16 = vsel %vm260_vm10, %v1898_v30, 0.0 }
 0x93e   :  { %v1899_v19 = vsel %vm260_vm10, %v1897_v22, 0.0 }
 0x93f   :  { %1900 = vadd.xlane.f32.xlu0 %v1899_v19 }
 0x943   :  { %1903 = vadd.xlane.f32.xlu0 %v1902_v16  ;;  %v6837_v16 = vld [vmem:[%s9914_s9 + $0x7] ss:$0 sm:$0xff] }
 0x9cc   :  { %v1901_v53 = vpop.xlane.xlu0 %1900 }
 0x9cd   :  { %v1905_v54 = vmul.f32 0.03125, %v1901_v53 }
 0x9cf   :  { %v1907_v55 = vadd.f32 1e-12, %v1905_v54 }
 0x9d0   :  { %v1904_v56 = vpop.xlane.xlu0 %1903 }
 0x9d1   :  { %8229 = vrsqrt.f32 %v1907_v55  ;;  %v1906_v28 = vmul.f32 0.03125, %v1904_v56 }
 0x9d3   :  { %v1908_v58 = vadd.f32 1e-12, %v1906_v28 }
 0x9d5   :  { %8231 = vrsqrt.f32 %v1908_v58 }
 0x9db   :  { %v8230_v59 = vpop.eup %8229 }
 0x9dc   :  { %v1911_v61 = vmul.f32 %v8230_v59, %v1895_v23 }
 0x9de   :  { %v1917_v63 = vmul.f32 %v6830_v60, %v1911_v61 }
 0x9df   :  { %v8232_v0 = vpop.eup %8231 }
 0x9e0   :  { %v1912_v1 = vmul.f32 %v8232_v0, %v1896_v47  ;;  %v1923_v2 = vadd.f32 %v6831_v62, %v1917_v63  ;;  %v6840_v0 = vld [vmem:[%s9909_s4 + $0x20] sm:$0xff] }
 0x9e2   :  { %v1918_v3 = vmul.f32 %v6830_v60, %v1912_v1  ;;  %7386 = vmatprep.mubr.msk.f32.mxu1 %vm260_vm10, %v1923_v2  ;;  %v6841_v1 = vld [vmem:[%s9909_s4 + $0x28] sm:$0xff] }
 0x9e4   :  { %v1924_v4 = vadd.f32 %v6831_v62, %v1918_v3  ;;  %v7938_v3 = vpack.c.bf16 %v6841_v1, %v6840_v0 }
 0x9e6   :  { %7387 = vmatmul.mubr.msk.f32.vlgmr.msra.gmra.mrb[26].mxu1 %vm260_vm10, %v1924_v4  ;;  %7939 = vmatprep.subr.bf16.mxu1 %v7938_v3 }
 0x9e7   :  { %7941 = vmatpush3.bf16.msra.mxu1 %v7938_v3 }
 0xab9   :  { %v7388_v26 = vpop.f32.mrb[26].mxu1 }
 0xaba   :  { %v2012_v32 = vadd.f32 %v7388_v26, %v6832_v20  ;;  %v2006_v33 = vpop.f32.mrb[27].mxu1 }
 0xabb   :  { %v2007_v34 = vadd.f32 %v6832_v20, %v2006_v33  ;;  %v6839_v20 = vld [vmem:[%s9914_s9 + $0x9] ss:$0 sm:$0xff] }
 0xabc   :  { %v2016_v35 = vmul.f32 %v2012_v32, %v2012_v32 }
 0xabd   :  { %v2015_v36 = vmul.f32 %v2007_v34, %v2007_v34 }
 0xabe   :  { %v2018_v37 = vmul.f32 %v2016_v35, %v2012_v32  ;;  %v6844_v35 = vld [vmem:[%s9914_s9 + $0xa] ss:$0 sm:$0xff] }
 0xabf   :  { %v2017_v24 = vmul.f32 %v2015_v36, %v2007_v34 }
 0xac0   :  { %v2020_v31 = vmul.f32 0.044715, %v2018_v37 }
 0xac1   :  { %v2019_v38 = vmul.f32 0.044715, %v2017_v24 }
 0xac2   :  { %v2022_v39 = vadd.f32 %v2020_v31, %v2012_v32 }
 0xac3   :  { %v2021_v40 = vadd.f32 %v2019_v38, %v2007_v34 }
 0xac4   :  { %v2024_v41 = vmul.f32 0.7978846, %v2022_v39 }
 0xac5   :  { %v2023_v42 = vmul.f32 0.7978846, %v2021_v40 }
 0xac6   :  { %8233 = vtanh.f32 %v2024_v41 }
 0xac7   :  { %8235 = vtanh.f32 %v2023_v42 }
 0xad0   :  { %v8234_v44 = vpop.eup %8233 }
 0xad1   :  { %v8236_v45 = vpop.eup %8235  ;;  %v2028_v46 = vadd.f32 1.0, %v8234_v44 }
 0xad2   :  { %v2027_v21 = vadd.f32 1.0, %v8236_v45 }
 0xad3   :  { %v2030_v47 = vmul.f32 0.5, %v2028_v46 }
 0xad4   :  { %v2029_v23 = vmul.f32 0.5, %v2027_v21 }
 0xad5   :  { %v2032_v19 = vmul.f32 %v2030_v47, %v2012_v32 }
 0xad6   :  { %v2031_v22 = vmul.f32 %v2029_v23, %v2007_v34 }
 0xad8   :  { %7405 = vmatprep.mubr.msk.f32.mxu0 %vm2041_vm1, %v2031_v22 }
 0xad9   :  { %7406 = vmatmul.mubr.msk.f32.vlgmr.msra.gmra.mrb[14].mxu0 %vm2041_vm1, %v2032_v19 }
 0xada   :  { %7431 = vmatprep.mubr.msk.f32.mxu0 %vm8440_vm11, %v8439_v27 }
 0xbac   :  { %v7407_v30 = vpop.f32.mrb[14].mxu0 }
 0xbad   :  { %v2124_v14 = vadd.f32 %v7407_v30, %v1924_v4  ;;  %v2114_v25 = vpop.f32.mrb[15].mxu0  ;;  %v6843_v4 = vld [vmem:[%s9909_s4 + $0x38] sm:$0xff] }
 0xbae   :  { %v2123_v48 = vadd.f32 %v2114_v25, %v1923_v2  ;;  %v6842_v2 = vld [vmem:[%s9909_s4 + $0x30] sm:$0xff] }
 0xbaf   :  { %v2131_v49 = vadd.f32 %v6837_v16, %v2124_v14  ;;  %v7942_v5 = vpack.c.bf16 %v6843_v4, %v6842_v2 }
 0xbb0   :  { %v2130_v51 = vadd.f32 %v6837_v16, %v2123_v48 }
 0xbb1   :  { %v2137_v52 = vsel %vm260_vm10, %v2131_v49, 0.0  ;;  %7943 = vmatprep.subr.bf16.mxu1 %v7942_v5 }
 0xbb2   :  { %2138 = vadd.xlane.f32.xlu0 %v2137_v52  ;;  %v2134_v53 = vsel %vm260_vm10, %v2130_v51, 0.0  ;;  %7945 = vmatpush3.bf16.msra.mxu1 %v7942_v5 }
 0xbb3   :  { %2135 = vadd.xlane.f32.xlu1 %v2134_v53  ;;  %7419 = vmatprep.subr.mxu1 %v8439_v27 }
 0xc3f   :  { %v2139_v54 = vpop.xlane.xlu0 %2138 }
 0xc40   :  { %v2141_v55 = vmul.f32 0.03125, %v2139_v54  ;;  %v2136_v56 = vpop.xlane.xlu1 %2135 }
 0xc41   :  { %v2140_v28 = vmul.f32 0.03125, %v2136_v56 }
 0xc42   :  { %v2143_v58 = vsub.f32 %v2131_v49, %v2141_v55 }
 0xc43   :  { %v2142_v59 = vsub.f32 %v2130_v51, %v2140_v28 }
 0xc44   :  { %v2145_v60 = vmul.f32 %v2143_v58, %v2143_v58 }
 0xc45   :  { %v2144_v61 = vmul.f32 %v2142_v59, %v2142_v59 }
 0xc46   :  { %v2149_v62 = vsel %vm260_vm10, %v2145_v60, 0.0 }
 0xc47   :  { %2150 = vadd.xlane.f32.xlu0 %v2149_v62  ;;  %v2146_v63 = vsel %vm260_vm10, %v2144_v61, 0.0 }
 0xc48   :  { %2147 = vadd.xlane.f32.xlu1 %v2146_v63 }
 0xcd4   :  { %v2151_v6 = vpop.xlane.xlu0 %2150 }
 0xcd5   :  { %v2153_v7 = vmul.f32 0.03125, %v2151_v6  ;;  %v2148_v8 = vpop.xlane.xlu1 %2147 }
 0xcd6   :  { %v2152_v9 = vmul.f32 0.03125, %v2148_v8 }
 0xcd7   :  { %v2155_v10 = vadd.f32 1e-12, %v2153_v7 }
 0xcd8   :  { %v2154_v11 = vadd.f32 1e-12, %v2152_v9 }
 0xcd9   :  { %8237 = vrsqrt.f32 %v2155_v10 }
 0xcda   :  { %8239 = vrsqrt.f32 %v2154_v11 }
 0xce3   :  { %v8238_v12 = vpop.eup %8237 }
 0xce4   :  { %v8240_v15 = vpop.eup %8239  ;;  %v2159_v17 = vmul.f32 %v8238_v12, %v2143_v58 }
 0xce5   :  { %v2158_v18 = vmul.f32 %v8240_v15, %v2142_v59 }
 0xce6   :  { %v2165_v26 = vmul.f32 %v6838_v13, %v2159_v17 }
 0xce7   :  { %v2164_v32 = vmul.f32 %v6838_v13, %v2158_v18 }
 0xce8   :  { %v8924_v34 = vadd.f32 %v6839_v20, %v2165_v26 }
 0xce9   :  { %v8922_v33 = vadd.f32 %v6839_v20, %v2164_v32 }
 0xceb   :  { %7416 = vmatprep.mubr.msk.f32.mxu1 %vm260_vm10, %v8922_v33 }
 0xcec   :  { %7417 = vmatmul.mubr.msk.f32.vlgmr.msra.gmra.mrb[28].mxu1 %vm260_vm10, %v8924_v34 }
 0xced   :  { %7421 = vmatprep.mubr.msk.f32.mxu1 %vm8440_vm11, %v8439_v27 }
 0xdbf   :  { %v7418_v36 = vpop.f32.mrb[28].mxu1 }
 0xdc0   :  { %v8935_v37 = vadd.f32 %v7418_v36, %v6844_v35  ;;  %v2254_v24 = vpop.f32.mrb[29].mxu1 }
 0xdc1   :  { %v8937_v31 = vadd.f32 %v6844_v35, %v2254_v24 }
 0xdc2   :  { %2267 = vrot.lane.b32.xlu0 %v8935_v37, %s8441_s1 }
 0xdc3   :  { %2265 = vrot.lane.b32.xlu1 %v8937_v31, %s8441_s1 }
 0xdc6   :  { %2273 = vrot.lane.b32.xlu0 %v8937_v31, %s8442_s28 }
 0xdc7   :  { %2269 = vrot.lane.b32.xlu1 %v8937_v31, %s8443_s29 }
 0xdca   :  { %2277 = vrot.lane.b32.xlu0 %v8937_v31, %s8444_s30 }
 0xdcb   :  { %2271 = vrot.lane.b32.xlu1 %v8935_v37, %s8443_s29 }
 0xdcf   :  { %2275 = vrot.lane.b32.xlu1 %v8935_v37, %s8442_s28 }
 0xdd3   :  { %2353 = vrot.lane.b32.xlu1 %v8935_v37, %s8444_s30 }
 0xe34   :  { %v8955_v38 = vpop.permute.xlu0 %2267 }
 0xe35   :  { %2505 = vrot.lane.b32.xlu1 %v8955_v38, %s8444_s30  ;;  %v8959_v39 = vpop.permute.xlu1 %2265 }
 0xe36   :  { %2429 = vrot.lane.b32.xlu0 %v8959_v39, %s8444_s30 }
 0xe38   :  { %v8963_v40 = vpop.permute.xlu0 %2273 }
 0xe39   :  { %v8965_v41 = vpop.permute.xlu1 %2269 }
 0xe3a   :  { %2581 = vrot.lane.b32.xlu0 %v8965_v41, %s8444_s30 }
 0xe3c   :  { %v2278_v42 = vpop.permute.xlu0 %2277 }
 0xe3d   :  { %7420 = vmatpush3.xpose.msk.msra.mxu1 %vm432_vm12, %v2278_v42  ;;  %v8970_v44 = vpop.permute.xlu1 %2271 }
 0xe3e   :  { %2733 = vrot.lane.b32.xlu0 %v8963_v40, %s8444_s30  ;;  %2657 = vrot.lane.b32.xlu1 %v8970_v44, %s8444_s30 }
 0xe3f   :  { %7424 = vmatprep.subr.mxu1 %v8439_v27 }
 0xe40   :  { %7422 = vmatmul.mubr.msk.f32.vlgmr.msra.gmra.mrb[30].mxu1 %vm432_vm12, %v8937_v31 }
 0xe41   :  { %v8979_v45 = vpop.permute.xlu1 %2275  ;;  %7426 = vmatprep.mubr.msk.f32.mxu1 %vm8440_vm11, %v8439_v27 }
 0xe42   :  { %2809 = vrot.lane.b32.xlu1 %v8979_v45, %s8444_s30 }
 0xe45   :  { %v2354_v46 = vpop.permute.xlu1 %2353 }
 0xe46   :  { %7425 = vmatpush3.xpose.msk.msra.mxu1 %vm432_vm12, %v2354_v46 }
 0xe47   :  { %7434 = vmatprep.subr.mxu1 %v8439_v27 }
 0xe49   :  { %7427 = vmatmul.mubr.msk.f32.vlgmr.msra.gmra.mrb[32].mxu1 %vm432_vm12, %v8935_v37 }
 0xe4a   :  { %7436 = vmatprep.mubr.msk.f32.mxu1 %vm8440_vm11, %v8439_v27 }
 0xea7   :  { %v2506_v21 = vpop.permute.xlu1 %2505 }
 0xea8   :  { %v2430_v47 = vpop.permute.xlu0 %2429  ;;  %7435 = vmatpush3.xpose.msk.msra.mxu1 %vm432_vm12, %v2506_v21 }
 0xea9   :  { %7430 = vmatpush3.xpose.msk.msra.mxu0 %vm432_vm12, %v2430_v47  ;;  %7444 = vmatprep.subr.mxu1 %v8439_v27 }
 0xeaa   :  { %7439 = vmatprep.subr.mxu0 %v8439_v27 }
 0xeab   :  { %7437 = vmatmul.mubr.msk.f32.vlgmr.msra.gmra.mrb[34].mxu1 %vm432_vm12, %v8955_v38 }
 0xeac   :  { %7432 = vmatmul.mubr.msk.f32.vlgmr.msra.gmra.mrb[16].mxu0 %vm432_vm12, %v8959_v39  ;;  %v2582_v23 = vpop.permute.xlu0 %2581  ;;  %7446 = vmatprep.mubr.msk.f32.mxu1 %vm8440_vm11, %v8439_v27 }
 0xead   :  { %7440 = vmatpush3.xpose.msk.msra.mxu0 %vm432_vm12, %v2582_v23  ;;  %7441 = vmatprep.mubr.msk.f32.mxu0 %vm8440_vm11, %v8439_v27 }
 0xeae   :  { %7449 = vmatprep.subr.mxu0 %v8439_v27 }
 0xeb0   :  { %7442 = vmatmul.mubr.msk.f32.vlgmr.msra.gmra.mrb[18].mxu0 %vm432_vm12, %v8965_v41  ;;  %v2734_v22 = vpop.permute.xlu0 %2733  ;;  %v2658_v19 = vpop.permute.xlu1 %2657 }
 0xeb1   :  { %7445 = vmatpush3.xpose.msk.msra.mxu1 %vm432_vm12, %v2658_v19  ;;  %7450 = vmatpush3.xpose.msk.msra.mxu0 %vm432_vm12, %v2734_v22 }
 0xeb2   :  { %7451 = vmatprep.mubr.msk.f32.mxu0 %vm8440_vm11, %v8439_v27  ;;  %7454 = vmatprep.subr.mxu1 %v8439_v27 }
 0xeb3   :  { %7459 = vmatprep.subr.mxu0 %v8439_v27 }
 0xeb4   :  { %7447 = vmatmul.mubr.msk.f32.vlgmr.msra.gmra.mrb[36].mxu1 %vm432_vm12, %v8970_v44  ;;  %7452 = vmatmul.mubr.msk.f32.vlgmr.msra.gmra.mrb[20].mxu0 %vm432_vm12, %v8963_v40  ;;  %v2810_v30 = vpop.permute.xlu1 %2809 }
 0xeb5   :  { %7455 = vmatpush3.xpose.msk.msra.mxu1 %vm432_vm12, %v2810_v30  ;;  %7456 = vmatprep.mubr.msk.f32.mxu1 %vm8440_vm11, %v8439_v27 }
 0xeb6   :  { %7464 = vmatprep.subr.mxu1 %v8439_v27  ;;  %7461 = vmatprep.mubr.msk.f32.mxu0 %vm8440_vm11, %v8439_v27 }
 0xeb8   :  { %7457 = vmatmul.mubr.msk.f32.vlgmr.msra.gmra.mrb[38].mxu1 %vm432_vm12, %v8979_v45 }
 0xeb9   :  { %7466 = vmatprep.mubr.msk.f32.mxu1 %vm8440_vm11, %v8439_v27 }
 0xf13   :  { %v2349_v16 = vpop.f32.mrb[30].mxu1 }
 0xf14   :  { %v2885_v14 = vmul.f32 0.35355338, %v2349_v16  ;;  %v7423_v25 = vpop.f32.mrb[31].mxu1 }
 0xf16   :  { %v2893_v48 = vadd.f32 %v2885_v14, %v8727_v50 }
 0xf18   :  { %v2901_v49 = vsel %vm432_vm12, %v2893_v48, -inf }
 0xf19   :  { %2902 = vmax.xlane.f32.xlu0 %v2901_v49 }
 0xf1c   :  { %v2425_v51 = vpop.f32.mrb[32].mxu1 }
 0xf1d   :  { %v2886_v52 = vmul.f32 0.35355338, %v2425_v51  ;;  %v7428_v53 = vpop.f32.mrb[33].mxu1 }
 0xf1f   :  { %v2894_v54 = vadd.f32 %v2886_v52, %v8731_v57 }
 0xf21   :  { %v2904_v55 = vsel %vm432_vm12, %v2894_v54, -inf }
 0xf22   :  { %2905 = vmax.xlane.f32.xlu1 %v2904_v55 }
 0xf7e   :  { %v2577_v56 = vpop.f32.mrb[34].mxu1 }
 0xf7f   :  { %v2888_v28 = vmul.f32 0.35355338, %v2577_v56  ;;  %v2501_v58 = vpop.f32.mrb[16].mxu0  ;;  %v7438_v59 = vpop.f32.mrb[35].mxu1 }
 0xf80   :  { %v2887_v60 = vmul.f32 0.35355338, %v2501_v58  ;;  %v7433_v61 = vpop.f32.mrb[17].mxu0 }
 0xf81   :  { %v2896_v0 = vadd.f32 %v2888_v28, %v8731_v57 }
 0xf82   :  { %v2895_v62 = vadd.f32 %v2887_v60, %v8727_v50 }
 0xf83   :  { %v2653_v63 = vpop.f32.mrb[18].mxu0  ;;  %v2910_v7 = vsel %vm432_vm12, %v2896_v0, -inf }
 0xf84   :  { %v2889_v1 = vmul.f32 0.35355338, %v2653_v63  ;;  %v7443_v2 = vpop.f32.mrb[19].mxu0  ;;  %v2907_v3 = vsel %vm432_vm12, %v2895_v62, -inf }
 0xf85   :  { %2908 = vmax.xlane.f32.xlu0 %v2907_v3 }
 0xf86   :  { %v2897_v4 = vadd.f32 %v2889_v1, %v8727_v50 }
 0xf87   :  { %v2729_v5 = vpop.f32.mrb[36].mxu1  ;;  %v2805_v6 = vpop.f32.mrb[20].mxu0 }
 0xf88   :  { %v2890_v8 = vmul.f32 0.35355338, %v2729_v5  ;;  %v2891_v9 = vmul.f32 0.35355338, %v2805_v6  ;;  %v7448_v10 = vpop.f32.mrb[37].mxu1  ;;  %v7453_v11 = vpop.f32.mrb[21].mxu0 }
 0xf89   :  { %v2913_v12 = vsel %vm432_vm12, %v2897_v4, -inf  ;;  %2911 = vmax.xlane.f32.xlu0 %v2910_v7 }
 0xf8a   :  { %2914 = vmax.xlane.f32.xlu1 %v2913_v12  ;;  %v2899_v13 = vadd.f32 %v2891_v9, %v8727_v50  ;;  %v2898_v15 = vadd.f32 %v2890_v8, %v8731_v57 }
 0xf8b   :  { %v2881_v17 = vpop.f32.mrb[38].mxu1 }
 0xf8c   :  { %v2892_v18 = vmul.f32 0.35355338, %v2881_v17  ;;  %v7458_v20 = vpop.f32.mrb[39].mxu1  ;;  %v2919_v26 = vsel %vm432_vm12, %v2899_v13, -inf  ;;  %v2916_v32 = vsel %vm432_vm12, %v2898_v15, -inf }
 0xf8d   :  { %2917 = vmax.xlane.f32.xlu0 %v2916_v32 }
 0xf8e   :  { %2920 = vmax.xlane.f32.xlu1 %v2919_v26  ;;  %v2900_v35 = vadd.f32 %v2892_v18, %v8731_v57 }
 0xf90   :  { %v2922_v36 = vsel %vm432_vm12, %v2900_v35, -inf }
 0xf91   :  { %2923 = vmax.xlane.f32.xlu0 %v2922_v36 }
 0xf9f   :  { %2989 = vrot.lane.b32.xlu1 %v8937_v31, %s8447_s0 }
 0xfa3   :  { %3141 = vrot.lane.b32.xlu1 %v8959_v39, %s8447_s0 }
 0xfa6   :  { %v2903_v24 = vpop.xlane.xlu0 %2902 }
 0xfa7   :  { %3217 = vrot.lane.b32.xlu1 %v8955_v38, %s8447_s0  ;;  %3065 = vrot.lane.b32.xlu0 %v8935_v37, %s8447_s0  ;;  %v2925_v31 = vsub.f32 %v2893_v48, %v2903_v24 }
 0xfa9   :  { %v2933_v46 = vmul.f32 1.442695, %v2925_v31 }
 0xfab   :  { %3369 = vrot.lane.b32.xlu1 %v8970_v44, %s8447_s0  ;;  %3293 = vrot.lane.b32.xlu0 %v8965_v41, %s8447_s0 }
 0xfaf   :  { %v2906_v50 = vpop.xlane.xlu1 %2905 }
 0xfb0   :  { %v2926_v57 = vsub.f32 %v2894_v54, %v2906_v50 }
 0xfb2   :  { %v2935_v42 = vmul.f32 1.442695, %v2926_v57 }
 0xfb4   :  { %8241 = vpow2.f32 %v2935_v42 }
 0xfb5   :  { %8243 = vpow2.f32 %v2933_v46 }
 0xfbe   :  { %v9055_v39 = vpop.eup %8241 }
 0xfbf   :  { %v2952_v38 = vsel %vm432_vm12, %v9055_v39, 0.0  ;;  %v9059_v37 = vpop.eup %8243 }
 0xfc0   :  { %v2949_v44 = vsel %vm432_vm12, %v9059_v37, 0.0 }
 0xfca   :  { %2953 = vadd.xlane.f32.xlu0 %v2952_v38 }
 0xfcf   :  { %2950 = vadd.xlane.f32.xlu1 %v2949_v44 }
0x1012   :  { %v2909_v41 = vpop.xlane.xlu0 %2908 }
0x1013   :  { %v2927_v21 = vsub.f32 %v2895_v62, %v2909_v41 }
0x1015   :  { %v2937_v47 = vmul.f32 1.442695, %v2927_v21 }
0x1016   :  { %v2912_v23 = vpop.xlane.xlu0 %2911 }
0x1017   :  { %8245 = vpow2.f32 %v2937_v47  ;;  %v2928_v22 = vsub.f32 %v2896_v0, %v2912_v23  ;;  %v2915_v19 = vpop.xlane.xlu1 %2914 }
0x1018   :  { %v2929_v30 = vsub.f32 %v2897_v4, %v2915_v19 }
0x1019   :  { %v2939_v16 = vmul.f32 1.442695, %v2928_v22 }
0x101a   :  { %v2941_v14 = vmul.f32 1.442695, %v2929_v30  ;;  %v2918_v25 = vpop.xlane.xlu0 %2917 }
0x101b   :  { %8247 = vpow2.f32 %v2939_v16  ;;  %v2930_v48 = vsub.f32 %v2898_v15, %v2918_v25  ;;  %v2921_v49 = vpop.xlane.xlu1 %2920  ;;  %v6871_v16 = vld [vmem:[%s9910_s5 + $0x20] sm:$0xff] }
0x101c   :  { %8249 = vpow2.f32 %v2941_v14  ;;  %v2931_v51 = vsub.f32 %v2899_v13, %v2921_v49  ;;  %v6872_v14 = vld [vmem:[%s9910_s5 + $0x28] sm:$0xff]  ;;  %v6874_v49 = vld [vmem:[%s9910_s5 + $0x38] sm:$0xff] }
0x101d   :  { %v2943_v52 = vmul.f32 1.442695, %v2930_v48  ;;  %v7946_v25 = vpack.c.bf16 %v6872_v14, %v6871_v16  ;;  %v6873_v48 = vld [vmem:[%s9910_s5 + $0x30] sm:$0xff]  ;;  %v6878_v14 = vld [vmem:[%s9914_s9 + $0xc] ss:$0 sm:$0xff] }
0x101e   :  { %v2945_v53 = vmul.f32 1.442695, %v2931_v51  ;;  %v2924_v54 = vpop.xlane.xlu0 %2923  ;;  %v7950_v51 = vpack.c.bf16 %v6874_v49, %v6873_v48  ;;  %v6879_v48 = vld [vmem:[%s9914_s9 + $0xd] ss:$0 sm:$0xff] }
0x101f   :  { %8251 = vpow2.f32 %v2943_v52  ;;  %v2932_v55 = vsub.f32 %v2900_v35, %v2924_v54  ;;  %v2990_v56 = vpop.permute.xlu1 %2989 }
0x1020   :  { %8253 = vpow2.f32 %v2945_v53  ;;  %7460 = vmatpush3.msra.mxu0 %v2990_v56 }
0x1021   :  { %v8246_v28 = vpop.eup %8245  ;;  %v2947_v58 = vmul.f32 1.442695, %v2932_v55  ;;  %7469 = vmatprep.subr.mxu0 %v8439_v27 }
0x1022   :  { %v3066_v59 = vpop.permute.xlu0 %3065  ;;  %v2955_v60 = vsel %vm432_vm12, %v8246_v28, 0.0 }
0x1023   :  { %8255 = vpow2.f32 %v2947_v58  ;;  %2956 = vadd.xlane.f32.xlu1 %v2955_v60  ;;  %7465 = vmatpush3.msra.mxu1 %v3066_v59  ;;  %v3142_v7 = vpop.permute.xlu1 %3141 }
0x1024   :  { %7474 = vmatprep.subr.mxu1 %v8439_v27 }
0x1025   :  { %v8248_v61 = vpop.eup %8247 }
0x1026   :  { %v8250_v62 = vpop.eup %8249  ;;  %v2958_v63 = vsel %vm432_vm12, %v8248_v61, 0.0  ;;  %v3294_v9 = vpop.permute.xlu0 %3293 }
0x1027   :  { %2959 = vadd.xlane.f32.xlu0 %v2958_v63  ;;  %v2961_v0 = vsel %vm432_vm12, %v8250_v62, 0.0  ;;  %v3218_v8 = vpop.permute.xlu1 %3217 }
0x1028   :  { %2962 = vadd.xlane.f32.xlu1 %v2961_v0 }
0x1029   :  { %v8252_v1 = vpop.eup %8251 }
0x102a   :  { %v9068_v2 = vpop.eup %8253  ;;  %v2964_v3 = vsel %vm432_vm12, %v8252_v1, 0.0 }
0x102b   :  { %2965 = vadd.xlane.f32.xlu0 %v2964_v3  ;;  %v2967_v4 = vsel %vm432_vm12, %v9068_v2, 0.0  ;;  %v3370_v11 = vpop.permute.xlu1 %3369 }
0x102c   :  { %2968 = vadd.xlane.f32.xlu1 %v2967_v4 }
0x102d   :  { %v9073_v5 = vpop.eup %8255 }
0x102e   :  { %v2970_v6 = vsel %vm432_vm12, %v9073_v5, 0.0 }
0x102f   :  { %2971 = vadd.xlane.f32.xlu0 %v2970_v6 }
0x103d   :  { %3521 = vrot.lane.b32.xlu1 %v8979_v45, %s8447_s0 }
0x1045   :  { %3445 = vrot.lane.b32.xlu0 %v8963_v40, %s8447_s0 }
0x1057   :  { %v2954_v10 = vpop.xlane.xlu0 %2953 }
0x1058   :  { %8257 = vrcp.f32 %v2954_v10 }
0x105c   :  { %v2951_v12 = vpop.xlane.xlu1 %2950 }
0x105d   :  { %8259 = vrcp.f32 %v2951_v12  ;;  %v6875_v12 = vld [vmem:[%s9914_s9 + $0xb] ss:$0 sm:$0xff] }
0x1062   :  { %v8258_v13 = vpop.eup %8257 }
0x1063   :  { %v2982_v15 = vmul.f32 %v8258_v13, %v9055_v39 }
0x1065   :  { %7467 = vmatmul.mubr.msk.f32.vlgmr.msra.gmra.mrb[40].mxu1 %vm432_vm12, %v2982_v15 }
0x1066   :  { %7475 = vmatpush3.msra.mxu1 %v3218_v8  ;;  %7476 = vmatprep.mubr.msk.f32.mxu1 %vm8440_vm11, %v8439_v27 }
0x1067   :  { %v8260_v45 = vpop.eup %8259  ;;  %7484 = vmatprep.subr.mxu1 %v8439_v27 }
0x1068   :  { %v2981_v40 = vmul.f32 %v8260_v45, %v9059_v37 }
0x106a   :  { %7462 = vmatmul.mubr.msk.f32.vlgmr.msra.gmra.mrb[22].mxu0 %vm432_vm12, %v2981_v40 }
0x106b   :  { %7470 = vmatpush3.msra.mxu0 %v3142_v7  ;;  %7471 = vmatprep.mubr.msk.f32.mxu0 %vm8440_vm11, %v8439_v27 }
0x106c   :  { %7479 = vmatprep.subr.mxu0 %v8439_v27 }
0x10b0   :  { %v2957_v17 = vpop.xlane.xlu1 %2956 }
0x10b1   :  { %8261 = vrcp.f32 %v2957_v17 }
0x10b4   :  { %v2960_v18 = vpop.xlane.xlu0 %2959 }
0x10b5   :  { %8263 = vrcp.f32 %v2960_v18  ;;  %v2963_v20 = vpop.xlane.xlu1 %2962 }
0x10b6   :  { %8265 = vrcp.f32 %v2963_v20 }
0x10b8   :  { %v2966_v26 = vpop.xlane.xlu0 %2965 }
0x10b9   :  { %8267 = vrcp.f32 %v2966_v26  ;;  %v2969_v32 = vpop.xlane.xlu1 %2968 }
0x10ba   :  { %8269 = vrcp.f32 %v2969_v32 }
0x10bb   :  { %v8262_v35 = vpop.eup %8261 }
0x10bc   :  { %v2972_v36 = vpop.xlane.xlu0 %2971  ;;  %v2983_v50 = vmul.f32 %v8262_v35, %v8246_v28 }
0x10bd   :  { %8271 = vrcp.f32 %v2972_v36  ;;  %v3522_v41 = vpop.permute.xlu1 %3521 }
0x10be   :  { %7472 = vmatmul.mubr.msk.f32.vlgmr.msra.gmra.mrb[24].mxu0 %vm432_vm12, %v2983_v50 }
0x10bf   :  { %v8264_v57 = vpop.eup %8263  ;;  %7480 = vmatpush3.msra.mxu0 %v3294_v9  ;;  %7481 = vmatprep.mubr.msk.f32.mxu0 %vm8440_vm11, %v8439_v27 }
0x10c0   :  { %v8266_v24 = vpop.eup %8265  ;;  %7489 = vmatprep.subr.mxu0 %v8439_v27  ;;  %v2984_v42 = vmul.f32 %v8264_v57, %v8248_v61  ;;  %v3446_v31 = vpop.permute.xlu0 %3445 }
0x10c1   :  { %v2985_v46 = vmul.f32 %v8266_v24, %v8250_v62 }
0x10c2   :  { %7477 = vmatmul.mubr.msk.f32.vlgmr.msra.gmra.mrb[42].mxu1 %vm432_vm12, %v2984_v42 }
0x10c3   :  { %v8268_v39 = vpop.eup %8267  ;;  %7482 = vmatmul.mubr.msk.f32.vlgmr.msra.gmra.mrb[26].mxu0 %vm432_vm12, %v2985_v46  ;;  %7485 = vmatpush3.msra.mxu1 %v3370_v11 }
0x10c4   :  { %v8270_v38 = vpop.eup %8269  ;;  %7490 = vmatpush3.msra.mxu0 %v3446_v31  ;;  %7486 = vmatprep.mubr.msk.f32.mxu1 %vm8440_vm11, %v8439_v27  ;;  %v2986_v37 = vmul.f32 %v8268_v39, %v8252_v1  ;;  %v6881_v39 = vld [vmem:[%s9911_s6 + $0x28] sm:$0xff] }
0x10c5   :  { %7491 = vmatprep.mubr.msk.f32.mxu0 %vm8440_vm11, %v8439_v27  ;;  %7494 = vmatprep.subr.mxu1 %v8439_v27  ;;  %v2987_v44 = vmul.f32 %v8270_v38, %v9068_v2  ;;  %v6882_v38 = vld [vmem:[%s9911_s6 + $0x30] sm:$0xff] }
0x10c6   :  { %7487 = vmatmul.mubr.msk.f32.vlgmr.msra.gmra.mrb[44].mxu1 %vm432_vm12, %v2986_v37  ;;  %7947 = vmatprep.subr.bf16.mxu0 %v7946_v25 }
0x10c7   :  { %v8272_v21 = vpop.eup %8271  ;;  %7492 = vmatmul.mubr.msk.f32.vlgmr.msra.gmra.mrb[28].mxu0 %vm432_vm12, %v2987_v44  ;;  %7495 = vmatpush3.msra.mxu1 %v3522_v41  ;;  %v6883_v44 = vld [vmem:[%s9911_s6 + $0x38] sm:$0xff] }
0x10c8   :  { %7496 = vmatprep.mubr.msk.f32.mxu1 %vm8440_vm11, %v8439_v27  ;;  %v2988_v47 = vmul.f32 %v8272_v21, %v9073_v5  ;;  %7949 = vmatpush3.bf16.msra.mxu0 %v7946_v25  ;;  %v7958_v41 = vpack.c.bf16 %v6883_v44, %v6882_v38 }
0x10c9   :  { %7951 = vmatprep.subr.bf16.mxu0 %v7950_v51 }
0x10ca   :  { %7497 = vmatmul.mubr.msk.f32.vlgmr.msra.gmra.mrb[46].mxu1 %vm432_vm12, %v2988_v47 }
0x10cc   :  { %7953 = vmatpush3.bf16.msra.mxu0 %v7950_v51 }
0x1138   :  { %v3137_v23 = vpop.f32.mrb[40].mxu1 }
0x1139   :  { %v7468_v22 = vpop.f32.mrb[41].mxu1 }
0x113d   :  { %v3061_v19 = vpop.f32.mrb[22].mxu0 }
0x113e   :  { %v7463_v30 = vpop.f32.mrb[23].mxu0 }
0x1191   :  { %v3213_v52 = vpop.f32.mrb[24].mxu0 }
0x1192   :  { %3599 = vrot.lane.b32.xlu0 %v3213_v52, %s8448_s17  ;;  %v7473_v53 = vpop.f32.mrb[25].mxu0 }
0x1195   :  { %v3289_v54 = vpop.f32.mrb[42].mxu1 }
0x1196   :  { %v3365_v55 = vpop.f32.mrb[26].mxu0  ;;  %3601 = vrot.lane.b32.xlu1 %v3289_v54, %s8448_s17  ;;  %v7478_v56 = vpop.f32.mrb[43].mxu1 }
0x1197   :  { %3607 = vrot.lane.b32.xlu0 %v3365_v55, %s8449_s21  ;;  %v7483_v28 = vpop.f32.mrb[27].mxu0  ;;  %v6887_v56 = vld [vmem:[%s9912_s7 + $0x40] sm:$0xff] }
0x1198   :  { %v6888_v28 = vld [vmem:[%s9912_s7 + $0x48] sm:$0xff] }
0x1199   :  { %v3441_v58 = vpop.f32.mrb[44].mxu1 }
0x119a   :  { %v3517_v59 = vpop.f32.mrb[28].mxu0  ;;  %3609 = vrot.lane.b32.xlu1 %v3441_v58, %s8449_s21  ;;  %v7488_v60 = vpop.f32.mrb[45].mxu1  ;;  %v7962_v58 = vpack.c.bf16 %v6888_v28, %v6887_v56  ;;  %v4015_v56 = vld [vmem:[%s9913_s8 + $0x20] sm:$0xff]  ;;  %v4016_v28 = vld [vmem:[%s9913_s8 + $0x28] sm:$0xff] }
0x119b   :  { %3615 = vrot.lane.b32.xlu0 %v3517_v59, %s8450_s22  ;;  %v7493_v61 = vpop.f32.mrb[29].mxu0  ;;  %v6889_v59 = vld [vmem:[%s9912_s7 + $0x50] sm:$0xff]  ;;  %v6890_v60 = vld [vmem:[%s9912_s7 + $0x58] sm:$0xff] }
0x119c   :  { %7963 = vmatprep.subr.bf16.mxu0 %v7962_v58  ;;  %v7966_v61 = vpack.c.bf16 %v6890_v60, %v6889_v59 }
0x119d   :  { %v3593_v62 = vpop.f32.mrb[46].mxu1 }
0x119e   :  { %3617 = vrot.lane.b32.xlu1 %v3593_v62, %s8450_s22  ;;  %v7498_v63 = vpop.f32.mrb[47].mxu1  ;;  %v6891_v62 = vld [vmem:[%s9912_s7 + $0x60] sm:$0xff] }
0x119f   :  { %v6892_v63 = vld [vmem:[%s9912_s7 + $0x68] sm:$0xff] }
0x1204   :  { %v3600_v0 = vpop.permute.xlu0 %3599 }
0x1205   :  { %v3621_v3 = vsel %vm432_vm12, %v3061_v19, %v3600_v0  ;;  %v7970_v0 = vpack.c.bf16 %v6892_v63, %v6891_v62 }
0x1208   :  { %v3602_v1 = vpop.permute.xlu1 %3601 }
0x1209   :  { %v3608_v2 = vpop.permute.xlu0 %3607  ;;  %v3622_v8 = vsel %vm432_vm12, %v3137_v23, %v3602_v1  ;;  %v6893_v1 = vld [vmem:[%s9912_s7 + $0x70] sm:$0xff] }
0x120a   :  { %v3623_v5 = vsel %vm1787_vm14, %v3621_v3, %v3608_v2  ;;  %v6894_v2 = vld [vmem:[%s9912_s7 + $0x78] sm:$0xff] }
0x120b   :  { %v7974_v3 = vpack.c.bf16 %v6894_v2, %v6893_v1  ;;  %v6898_v2 = vld [vmem:[%s9914_s9 + $0x10] ss:$0 sm:$0xff] }
0x120c   :  { %v3610_v4 = vpop.permute.xlu1 %3609 }
0x120d   :  { %v3616_v6 = vpop.permute.xlu0 %3615  ;;  %v3624_v9 = vsel %vm1787_vm14, %v3622_v8, %v3610_v4  ;;  %v6884_v4 = vld [vmem:[%s9914_s9 + $0xe] ss:$0 sm:$0xff] }
0x120e   :  { %v3625_v7 = vsel %vm1790_vm15, %v3623_v5, %v3616_v6 }
0x120f   :  { %7507 = vmatprep.mubr.msk.f32.mxu0 %vm260_vm10, %v3625_v7 }
0x1210   :  { %v3618_v10 = vpop.permute.xlu1 %3617 }
0x1211   :  { %v3626_v11 = vsel %vm1790_vm15, %v3624_v9, %v3618_v10 }
0x1212   :  { %7508 = vmatmul.mubr.msk.f32.vlgmr.msra.gmra.mrb[30].mxu0 %vm260_vm10, %v3626_v11 }
0x1213   :  { %7965 = vmatpush3.bf16.msra.mxu0 %v7962_v58  ;;  %v9233_v58 = vpack.c.bf16 %v4016_v28, %v4015_v56  ;;  %v9297_v56 = vld [vmem:[%s9914_s9 + $0x12] ss:$0 sm:$0xff] }
0x1214   :  { %7967 = vmatprep.subr.bf16.mxu0 %v7966_v61 }
0x1217   :  { %7969 = vmatpush3.bf16.msra.mxu0 %v7966_v61 }
0x1218   :  { %7971 = vmatprep.subr.bf16.mxu0 %v7970_v0 }
0x121b   :  { %7973 = vmatpush3.bf16.msra.mxu0 %v7970_v0 }
0x121c   :  { %7975 = vmatprep.subr.bf16.mxu0 %v7974_v3 }
0x121f   :  { %7977 = vmatpush3.bf16.msra.mxu0 %v7974_v3 }
0x12e5   :  { %v7509_v13 = vpop.f32.mrb[30].mxu0 }
0x12e6   :  { %v3715_v15 = vadd.f32 %v7509_v13, %v6875_v12  ;;  %v3709_v45 = vpop.f32.mrb[31].mxu0 }
0x12e7   :  { %v3710_v40 = vadd.f32 %v6875_v12, %v3709_v45 }
0x12e8   :  { %v3719_v17 = vadd.f32 %v3715_v15, %v8924_v34 }
0x12e9   :  { %v3718_v18 = vadd.f32 %v3710_v40, %v8922_v33  ;;  %v6880_v33 = vld [vmem:[%s9911_s6 + $0x20] sm:$0xff] }
0x12ea   :  { %v3725_v20 = vsel %vm260_vm10, %v3719_v17, 0.0  ;;  %v7954_v37 = vpack.c.bf16 %v6881_v39, %v6880_v33 }
0x12eb   :  { %3726 = vadd.xlane.f32.xlu1 %v3725_v20  ;;  %v3722_v26 = vsel %vm260_vm10, %v3718_v18, 0.0 }
0x12ec   :  { %3723 = vadd.xlane.f32.xlu0 %v3722_v26  ;;  %7955 = vmatprep.subr.bf16.mxu1 %v7954_v37 }
0x12ed   :  { %7957 = vmatpush3.bf16.msra.mxu1 %v7954_v37 }
0x12ee   :  { %7959 = vmatprep.subr.bf16.mxu1 %v7958_v41 }
0x12f1   :  { %7961 = vmatpush3.bf16.msra.mxu1 %v7958_v41 }
0x1378   :  { %v3727_v32 = vpop.xlane.xlu1 %3726 }
0x1379   :  { %v3729_v35 = vmul.f32 0.03125, %v3727_v32  ;;  %v3724_v36 = vpop.xlane.xlu0 %3723 }
0x137a   :  { %v3728_v50 = vmul.f32 0.03125, %v3724_v36 }
0x137b   :  { %v3731_v57 = vsub.f32 %v3719_v17, %v3729_v35 }
0x137c   :  { %v3730_v24 = vsub.f32 %v3718_v18, %v3728_v50 }
0x137d   :  { %v3733_v46 = vmul.f32 %v3731_v57, %v3731_v57 }
0x137e   :  { %v3732_v42 = vmul.f32 %v3730_v24, %v3730_v24 }
0x137f   :  { %v3737_v34 = vsel %vm260_vm10, %v3733_v46, 0.0 }
0x1380   :  { %v3734_v31 = vsel %vm260_vm10, %v3732_v42, 0.0 }
0x1381   :  { %3735 = vadd.xlane.f32.xlu0 %v3734_v31  ;;  %v6897_v31 = vld [vmem:[%s9914_s9 + $0xf] ss:$0 sm:$0xff] }
0x1385   :  { %3738 = vadd.xlane.f32.xlu0 %v3737_v34 }
0x140e   :  { %v3736_v21 = vpop.xlane.xlu0 %3735 }
0x140f   :  { %v3740_v47 = vmul.f32 0.03125, %v3736_v21 }
0x1411   :  { %v3742_v23 = vadd.f32 1e-12, %v3740_v47 }
0x1412   :  { %v3739_v22 = vpop.xlane.xlu0 %3738 }
0x1413   :  { %8273 = vrsqrt.f32 %v3742_v23  ;;  %v3741_v19 = vmul.f32 0.03125, %v3739_v22 }
0x1415   :  { %v3743_v30 = vadd.f32 1e-12, %v3741_v19 }
0x1417   :  { %8275 = vrsqrt.f32 %v3743_v30 }
0x141d   :  { %v8274_v16 = vpop.eup %8273 }
0x141e   :  { %v3746_v25 = vmul.f32 %v8274_v16, %v3730_v24 }
0x1420   :  { %v3752_v49 = vmul.f32 %v6878_v14, %v3746_v25 }
0x1421   :  { %v8276_v51 = vpop.eup %8275 }
0x1422   :  { %v3747_v52 = vmul.f32 %v8276_v51, %v3731_v57  ;;  %v3758_v53 = vadd.f32 %v6879_v48, %v3752_v49  ;;  %v4012_v49 = vld [vmem:[%s9913_s8 + $0x8] sm:$0xff] }
0x1424   :  { %v3753_v54 = vmul.f32 %v6878_v14, %v3747_v52  ;;  %7518 = vmatprep.mubr.msk.f32.mxu1 %vm260_vm10, %v3758_v53  ;;  %v8451_v52 = vmov 0.0|0.0  }
0x1425   :  { %7978 = vmatprep.subr.bf16.mxu1 %v8451_v52  ;;  %7996 = vmatprep.subr.bf16.mxu0 %v8451_v52 }
0x1426   :  { %v3759_v55 = vadd.f32 %v6879_v48, %v3753_v54  ;;  %v4011_v48 = vld [vmem:[%s9913_s8] sm:$0xff]  ;;  %v4014_v54 = vld [vmem:[%s9913_s8 + $0x18] sm:$0xff] }
0x1427   :  { %v9210_v51 = vpack.c.bf16 %v4012_v49, %v4011_v48 }
0x1428   :  { %7519 = vmatmul.mubr.msk.f32.vlgmr.msra.gmra.mrb[48].mxu1 %vm260_vm10, %v3759_v55 }
0x1429   :  { %7552 = vmatprep.mubr.msk.f32.mxu1 %vm8440_vm11, %v8439_v27  ;;  %7980 = vmatpush3.bf16.msra.mxu1 %v9210_v51 }
0x142a   :  { %7981 = vmatprep.subr.bf16.mxu1 %v8451_v52 }
0x14fb   :  { %v7520_v5 = vpop.f32.mrb[48].mxu1 }
0x14fc   :  { %v3848_v6 = vadd.f32 %v7520_v5, %v6884_v4  ;;  %v3842_v7 = vpop.f32.mrb[49].mxu1  ;;  %v6899_v5 = vld [vmem:[%s9914_s9 + $0x11] ss:$0 sm:$0xff] }
0x14fd   :  { %v3843_v8 = vadd.f32 %v6884_v4, %v3842_v7 }
0x14fe   :  { %v3852_v9 = vmul.f32 %v3848_v6, %v3848_v6 }
0x14ff   :  { %v3851_v10 = vmul.f32 %v3843_v8, %v3843_v8 }
0x1500   :  { %v3854_v11 = vmul.f32 %v3852_v9, %v3848_v6 }
0x1501   :  { %v3853_v12 = vmul.f32 %v3851_v10, %v3843_v8 }
0x1502   :  { %v3856_v13 = vmul.f32 0.044715, %v3854_v11 }
0x1503   :  { %v3855_v15 = vmul.f32 0.044715, %v3853_v12 }
0x1504   :  { %v3858_v45 = vadd.f32 %v3856_v13, %v3848_v6 }
0x1505   :  { %v3857_v40 = vadd.f32 %v3855_v15, %v3843_v8 }
0x1506   :  { %v3860_v17 = vmul.f32 0.7978846, %v3858_v45 }
0x1507   :  { %v3859_v18 = vmul.f32 0.7978846, %v3857_v40 }
0x1508   :  { %8277 = vtanh.f32 %v3860_v17 }
0x1509   :  { %8279 = vtanh.f32 %v3859_v18 }
0x1512   :  { %v8278_v20 = vpop.eup %8277 }
0x1513   :  { %v8280_v26 = vpop.eup %8279  ;;  %v3864_v32 = vadd.f32 1.0, %v8278_v20 }
0x1514   :  { %v3863_v35 = vadd.f32 1.0, %v8280_v26 }
0x1515   :  { %v3866_v36 = vmul.f32 0.5, %v3864_v32 }
0x1516   :  { %v3865_v50 = vmul.f32 0.5, %v3863_v35 }
0x1517   :  { %v3868_v24 = vmul.f32 %v3866_v36, %v3848_v6 }
0x1518   :  { %v3867_v57 = vmul.f32 %v3865_v50, %v3843_v8 }
0x151a   :  { %7537 = vmatprep.mubr.msk.f32.mxu0 %vm2041_vm1, %v3867_v57 }
0x151b   :  { %7538 = vmatmul.mubr.msk.f32.vlgmr.msra.gmra.mrb[32].mxu0 %vm2041_vm1, %v3868_v24 }
0x151c   :  { %7582 = vmatprep.mubr.msk.f32.mxu0 %vm8440_vm11, %v8439_v27  ;;  %7998 = vmatpush3.bf16.msra.mxu0 %v9210_v51 }
0x151d   :  { %7999 = vmatprep.subr.bf16.mxu0 %v8451_v52 }
0x15ee   :  { %v7539_v42 = vpop.f32.mrb[32].mxu0 }
0x15ef   :  { %v3960_v46 = vadd.f32 %v7539_v42, %v3759_v55  ;;  %v3950_v34 = vpop.f32.mrb[33].mxu0 }
0x15f0   :  { %v3959_v33 = vadd.f32 %v3950_v34, %v3758_v53  ;;  %v4013_v53 = vld [vmem:[%s9913_s8 + $0x10] sm:$0xff] }
0x15f1   :  { %v3967_v39 = vadd.f32 %v6897_v31, %v3960_v46  ;;  %v9224_v55 = vpack.c.bf16 %v4014_v54, %v4013_v53 }
0x15f2   :  { %v3966_v38 = vadd.f32 %v6897_v31, %v3959_v33 }
0x15f3   :  { %v3973_v37 = vsel %vm260_vm10, %v3967_v39, 0.0  ;;  %7983 = vmatpush3.bf16.msra.mxu1 %v9224_v55  ;;  %8001 = vmatpush3.bf16.msra.mxu0 %v9224_v55 }
0x15f4   :  { %3974 = vadd.xlane.f32.xlu0 %v3973_v37  ;;  %v3970_v44 = vsel %vm260_vm10, %v3966_v38, 0.0  ;;  %7984 = vmatprep.subr.bf16.mxu1 %v8451_v52 }
0x15f5   :  { %3971 = vadd.xlane.f32.xlu1 %v3970_v44  ;;  %8002 = vmatprep.subr.bf16.mxu0 %v8451_v52 }
0x15f7   :  { %7986 = vmatpush3.bf16.msra.mxu1 %v9233_v58  ;;  %8004 = vmatpush3.bf16.msra.mxu0 %v9233_v58 }
0x15f8   :  { %7987 = vmatprep.subr.bf16.mxu1 %v8451_v52  ;;  %8014 = vmatprep.subr.bf16.mxu0 %v8451_v52 }
0x1681   :  { %v3975_v41 = vpop.xlane.xlu0 %3974 }
0x1682   :  { %v3977_v21 = vmul.f32 0.03125, %v3975_v41  ;;  %v3972_v47 = vpop.xlane.xlu1 %3971 }
0x1683   :  { %v3976_v23 = vmul.f32 0.03125, %v3972_v47 }
0x1684   :  { %v3979_v22 = vsub.f32 %v3967_v39, %v3977_v21 }
0x1685   :  { %v3978_v19 = vsub.f32 %v3966_v38, %v3976_v23 }
0x1686   :  { %v3981_v30 = vmul.f32 %v3979_v22, %v3979_v22 }
0x1687   :  { %v3980_v16 = vmul.f32 %v3978_v19, %v3978_v19 }
0x1688   :  { %v3985_v14 = vsel %vm260_vm10, %v3981_v30, 0.0 }
0x1689   :  { %3986 = vadd.xlane.f32.xlu0 %v3985_v14  ;;  %v3982_v25 = vsel %vm260_vm10, %v3980_v16, 0.0 }
0x168a   :  { %3983 = vadd.xlane.f32.xlu1 %v3982_v25 }
0x1716   :  { %v3987_v59 = vpop.xlane.xlu0 %3986 }
0x1717   :  { %v3989_v60 = vmul.f32 0.03125, %v3987_v59  ;;  %v3984_v61 = vpop.xlane.xlu1 %3983 }
0x1718   :  { %v3988_v62 = vmul.f32 0.03125, %v3984_v61 }
0x1719   :  { %v3991_v63 = vadd.f32 1e-12, %v3989_v60 }
0x171a   :  { %v3990_v0 = vadd.f32 1e-12, %v3988_v62 }
0x171b   :  { %8281 = vrsqrt.f32 %v3991_v63 }
0x171c   :  { %8283 = vrsqrt.f32 %v3990_v0 }
0x1725   :  { %v8282_v1 = vpop.eup %8281 }
0x1726   :  { %v8284_v3 = vpop.eup %8283  ;;  %v3995_v4 = vmul.f32 %v8282_v1, %v3979_v22 }
0x1727   :  { %v3994_v6 = vmul.f32 %v8284_v3, %v3978_v19 }
0x1728   :  { %v4001_v7 = vmul.f32 %v6898_v2, %v3995_v4 }
0x1729   :  { %v4000_v8 = vmul.f32 %v6898_v2, %v3994_v6 }
0x172a   :  { %v4007_v9 = vadd.f32 %v6899_v5, %v4001_v7 }
0x172b   :  { %v4006_v10 = vadd.f32 %v6899_v5, %v4000_v8 }
0x172c   :  { %v4020_v11 = vrot.slane %v4007_v9, 7  ;;  %v4025_v12 = vrot.slane %v4007_v9, 4  ;;  %v4144_v13 = vrot.slane %v4007_v9, 3  ;;  %v4256_v15 = vrot.slane %v4007_v9, 1 }
0x172d   :  { %v4024_v45 = vrot.slane %v4006_v10, 5  ;;  %v4140_v40 = vrot.slane %v4006_v10, 1  ;;  %v4143_v17 = vrot.slane %v4006_v10, 4  ;;  %v4255_v18 = vrot.slane %v4006_v10, 2 }
0x172e   :  { %v4022_v20 = vsel %vm4021_vm2, %v4020_v11, %v4006_v10  ;;  %v4259_v26 = vrot.slane %v4006_v10, 3  ;;  %v4260_v32 = vrot.slane %v4007_v9, 2  ;;  %v4597_v35 = vsel %vm4026_vm3, %v4020_v11, %v4006_v10 }
0x172f   :  { %v4027_v36 = vsel %vm4026_vm3, %v4025_v12, %v4024_v45  ;;  %v4141_v50 = vsel %vm4021_vm2, %v4007_v9, %v4140_v40  ;;  %v4145_v57 = vsel %vm4026_vm3, %v4144_v13, %v4143_v17  ;;  %v4257_v24 = vsel %vm4021_vm2, %v4256_v15, %v4255_v18 }
0x1730   :  { %v4029_v42 = vsel %vm91_vm0, %v4022_v20, %v4027_v36  ;;  %v4147_v31 = vsel %vm91_vm0, %v4141_v50, %v4145_v57  ;;  %v4261_v46 = vsel %vm4026_vm3, %v4260_v32, %v4259_v26  ;;  %v4371_v34 = vsel %vm4021_vm2, %v4260_v32, %v4259_v26 }
0x1731   :  { %v4030_v33 = vsel %vm260_vm10, %v4029_v42, 0.0  ;;  %v9260_v39 = vsel %vm91_vm0, %v4257_v24, %v4261_v46  ;;  %v4373_v38 = vsel %vm4026_vm3, %v4256_v15, %v4255_v18  ;;  %v4483_v37 = vsel %vm4021_vm2, %v4144_v13, %v4143_v17 }
0x1732   :  { %7553 = vmatmul.mubr.msk.f32.vlgmr.msra.gmra.mrb[50].mxu1 %vm4035_vm4, %v4030_v33  ;;  %v9266_v44 = vsel %vm91_vm0, %v4371_v34, %v4373_v38  ;;  %v4485_v41 = vsel %vm4026_vm3, %v4007_v9, %v4140_v40  ;;  %v4595_v21 = vsel %vm4021_vm2, %v4025_v12, %v4024_v45  ;;  %v4707_v47 = vrot.slane %v4006_v10, 6 }
0x1733   :  { %7989 = vmatpush3.bf16.msra.mxu1 %v9210_v51  ;;  %7567 = vmatprep.mubr.msk.f32.mxu1 %vm8440_vm11, %v8439_v27  ;;  %v9274_v23 = vsel %vm91_vm0, %v4483_v37, %v4485_v41  ;;  %v9277_v22 = vsel %vm91_vm0, %v4595_v21, %v4597_v35  ;;  %v4708_v19 = vrot.slane %v4007_v9, 5  ;;  %v4711_v30 = vrot.slane %v4006_v10, 7 }
0x1734   :  { %7990 = vmatprep.subr.bf16.mxu1 %v8451_v52  ;;  %v4712_v16 = vrot.slane %v4007_v9, 6 }
0x1735   :  { %v4709_v14 = vsel %vm4021_vm2, %v4708_v19, %v4707_v47  ;;  %v4825_v25 = vsel %vm4026_vm3, %v4708_v19, %v4707_v47 }
0x1736   :  { %v4713_v48 = vsel %vm4026_vm3, %v4712_v16, %v4711_v30  ;;  %v4823_v49 = vsel %vm4021_vm2, %v4712_v16, %v4711_v30 }
0x1737   :  { %7992 = vmatpush3.bf16.msra.mxu1 %v9224_v55  ;;  %v9286_v53 = vsel %vm91_vm0, %v4709_v14, %v4713_v48  ;;  %v9289_v54 = vsel %vm91_vm0, %v4823_v49, %v4825_v25 }
0x1738   :  { %7993 = vmatprep.subr.bf16.mxu1 %v8451_v52 }
0x173b   :  { %7995 = vmatpush3.bf16.msra.mxu1 %v9233_v58 }
0x173c   :  { %8005 = vmatprep.subr.bf16.mxu1 %v8451_v52 }
0x1805   :  { %v4105_v28 = vpop.f32.mrb[50].mxu1 }
0x1806   :  { %v4106_v59 = vadd.f32 %v9297_v56, %v4105_v28  ;;  %v7554_v60 = vpop.f32.mrb[51].mxu1 }
0x1808   :  { %4112 = vrot.lane.b32.xlu1 %v4106_v59, %s8447_s0 }
0x187a   :  { %v4113_v61 = vpop.permute.xlu1 %4112 }
0x187b   :  { %v4115_v62 = vsel %vm4010_vm5, %v4106_v59, %v4113_v61 }
0x187c   :  { %8285 = vtanh.f32 %v4115_v62  ;;  %v6902_v0 = vmul.f32 -1.442695, %v4115_v62 }
0x187e   :  { %8287 = vpow2.f32 %v6902_v0 }
0x1886   :  { %v8286_v63 = vpop.eup %8285 }
0x1887   :  { %4125 = vrot.lane.b32.xlu0 %v8286_v63, %s8444_s30 }
0x1888   :  { %v8288_v1 = vpop.eup %8287 }
0x1889   :  { %v4119_v2 = vadd.f32 1.0, %v8288_v1 }
0x188b   :  { %8289 = vrcp.f32 %v4119_v2 }
0x1895   :  { %v8290_v3 = vpop.eup %8289 }
0x1896   :  { %v4123_v6 = vmul.f32 0.0, %v8290_v3 }
0x18f9   :  { %v4126_v4 = vpop.permute.xlu0 %4125 }
0x18fa   :  { %v4128_v5 = vmul.f32 %v8290_v3, %v4126_v4 }
0x18fc   :  { %4130 = vrot.lane.b32.xlu1 %v4128_v5, %s8449_s21 }
0x196e   :  { %v4131_v7 = vpop.permute.xlu1 %4130 }
0x196f   :  { %v4133_v8 = vadd.f32 %v4131_v7, %v4123_v6 }
0x1971   :  { %8291 = vtanh.f32 %v4133_v8 }
0x197b   :  { %v8292_v9 = vpop.eup %8291 }
0x197c   :  { %4136 = vrot.lane.b32.xlu1 %v8292_v9, %s8452_s2 }
0x19ee   :  { %v4137_v10 = vpop.permute.xlu1 %4136 }
0x19ef   :  { %v9307_v11 = vmul.f32 %v8290_v3, %v4137_v10 }
0x19f1   :  { %4149 = vrot.lane.b32.xlu0 %v9307_v11, %s8443_s29 }
0x1a63   :  { %v4150_v12 = vpop.permute.xlu0 %4149 }
0x1a64   :  { %v4152_v13 = vsel %vm260_vm10, %v4147_v31, %v4150_v12 }
0x1a65   :  { %7568 = vmatmul.mubr.msk.f32.vlgmr.msra.gmra.mrb[52].mxu1 %vm4035_vm4, %v4152_v13 }
0x1a66   :  { %8007 = vmatpush3.bf16.msra.mxu1 %v9210_v51  ;;  %7597 = vmatprep.mubr.msk.f32.mxu1 %vm8440_vm11, %v8439_v27 }
0x1a67   :  { %8008 = vmatprep.subr.bf16.mxu1 %v8451_v52 }
0x1a6a   :  { %8010 = vmatpush3.bf16.msra.mxu1 %v9224_v55 }
0x1a6b   :  { %8011 = vmatprep.subr.bf16.mxu1 %v8451_v52 }
0x1a6e   :  { %8013 = vmatpush3.bf16.msra.mxu1 %v9233_v58 }
0x1a6f   :  { %8023 = vmatprep.subr.bf16.mxu1 %v8451_v52 }
0x1b38   :  { %v4222_v15 = vpop.f32.mrb[52].mxu1 }
0x1b39   :  { %v4223_v45 = vadd.f32 %v9297_v56, %v4222_v15  ;;  %v7569_v40 = vpop.f32.mrb[53].mxu1 }
0x1b3b   :  { %4227 = vrot.lane.b32.xlu1 %v4223_v45, %s8447_s0 }
0x1bad   :  { %v4228_v17 = vpop.permute.xlu1 %4227 }
0x1bae   :  { %v4230_v18 = vsel %vm4010_vm5, %v4223_v45, %v4228_v17 }
0x1baf   :  { %8293 = vtanh.f32 %v4230_v18  ;;  %v6904_v26 = vmul.f32 -1.442695, %v4230_v18 }
0x1bb1   :  { %8295 = vpow2.f32 %v6904_v26 }
0x1bb9   :  { %v8294_v20 = vpop.eup %8293 }
0x1bba   :  { %4240 = vrot.lane.b32.xlu0 %v8294_v20, %s8444_s30 }
0x1bbb   :  { %v8296_v32 = vpop.eup %8295 }
0x1bbc   :  { %v4234_v35 = vadd.f32 1.0, %v8296_v32 }
0x1bbe   :  { %8297 = vrcp.f32 %v4234_v35 }
0x1bc8   :  { %v8298_v36 = vpop.eup %8297 }
0x1bc9   :  { %v4238_v24 = vmul.f32 %v8298_v36, %v4133_v8 }
0x1c2c   :  { %v4241_v50 = vpop.permute.xlu0 %4240 }
0x1c2d   :  { %v4243_v57 = vmul.f32 %v8298_v36, %v4241_v50 }
0x1c2f   :  { %4245 = vrot.lane.b32.xlu1 %v4243_v57, %s8449_s21 }
0x1ca1   :  { %v4246_v42 = vpop.permute.xlu1 %4245 }
0x1ca2   :  { %v4248_v31 = vadd.f32 %v4246_v42, %v4238_v24 }
0x1ca4   :  { %8299 = vtanh.f32 %v4248_v31 }
0x1cae   :  { %v8300_v46 = vpop.eup %8299 }
0x1caf   :  { %4251 = vrot.lane.b32.xlu0 %v8300_v46, %s8452_s2 }
0x1d21   :  { %v4252_v34 = vpop.permute.xlu0 %4251 }
0x1d22   :  { %v9328_v33 = vmul.f32 %v8298_v36, %v4252_v34 }
0x1d24   :  { %4265 = vrot.lane.b32.xlu1 %v9328_v33, %s8443_s29 }
0x1d96   :  { %v4266_v38 = vpop.permute.xlu1 %4265 }
0x1d97   :  { %v4268_v37 = vsel %vm260_vm10, %v9260_v39, %v4266_v38 }
0x1d98   :  { %7583 = vmatmul.mubr.msk.f32.vlgmr.msra.gmra.mrb[34].mxu0 %vm4035_vm4, %v4268_v37 }
0x1d99   :  { %8016 = vmatpush3.bf16.msra.mxu0 %v9210_v51  ;;  %7612 = vmatprep.mubr.msk.f32.mxu0 %vm8440_vm11, %v8439_v27 }
0x1d9a   :  { %8017 = vmatprep.subr.bf16.mxu0 %v8451_v52 }
0x1d9d   :  { %8019 = vmatpush3.bf16.msra.mxu0 %v9224_v55 }
0x1d9e   :  { %8020 = vmatprep.subr.bf16.mxu0 %v8451_v52 }
0x1da1   :  { %8022 = vmatpush3.bf16.msra.mxu0 %v9233_v58 }
0x1da2   :  { %8032 = vmatprep.subr.bf16.mxu0 %v8451_v52 }
0x1e6b   :  { %v4338_v41 = vpop.f32.mrb[34].mxu0 }
0x1e6c   :  { %v4339_v39 = vadd.f32 %v9297_v56, %v4338_v41  ;;  %v7584_v21 = vpop.f32.mrb[35].mxu0 }
0x1e6e   :  { %4343 = vrot.lane.b32.xlu0 %v4339_v39, %s8447_s0 }
0x1ee0   :  { %v4344_v47 = vpop.permute.xlu0 %4343 }
0x1ee1   :  { %v4346_v19 = vsel %vm4010_vm5, %v4339_v39, %v4344_v47 }
0x1ee2   :  { %8301 = vtanh.f32 %v4346_v19  ;;  %v6906_v16 = vmul.f32 -1.442695, %v4346_v19 }
0x1ee4   :  { %8303 = vpow2.f32 %v6906_v16 }
0x1eec   :  { %v8302_v30 = vpop.eup %8301 }
0x1eed   :  { %4356 = vrot.lane.b32.xlu1 %v8302_v30, %s8444_s30 }
0x1eee   :  { %v8304_v14 = vpop.eup %8303 }
0x1eef   :  { %v4350_v25 = vadd.f32 1.0, %v8304_v14 }
0x1ef1   :  { %8305 = vrcp.f32 %v4350_v25 }
0x1efb   :  { %v8306_v48 = vpop.eup %8305 }
0x1efc   :  { %v4354_v59 = vmul.f32 %v8306_v48, %v4248_v31 }
0x1f5f   :  { %v4357_v49 = vpop.permute.xlu1 %4356 }
0x1f60   :  { %v4359_v28 = vmul.f32 %v8306_v48, %v4357_v49 }
0x1f62   :  { %4361 = vrot.lane.b32.xlu0 %v4359_v28, %s8449_s21 }
0x1fd4   :  { %v4362_v60 = vpop.permute.xlu0 %4361 }
0x1fd5   :  { %v4364_v61 = vadd.f32 %v4362_v60, %v4354_v59 }
0x1fd7   :  { %8307 = vtanh.f32 %v4364_v61 }
0x1fe1   :  { %v8308_v62 = vpop.eup %8307 }
0x1fe2   :  { %4367 = vrot.lane.b32.xlu1 %v8308_v62, %s8452_s2 }
0x2054   :  { %v4368_v63 = vpop.permute.xlu1 %4367 }
0x2055   :  { %v9350_v0 = vmul.f32 %v8306_v48, %v4368_v63 }
0x2057   :  { %4377 = vrot.lane.b32.xlu0 %v9350_v0, %s8443_s29 }
0x20c9   :  { %v4378_v1 = vpop.permute.xlu0 %4377 }
0x20ca   :  { %v4380_v2 = vsel %vm260_vm10, %v9266_v44, %v4378_v1 }
0x20cb   :  { %7598 = vmatmul.mubr.msk.f32.vlgmr.msra.gmra.mrb[54].mxu1 %vm4035_vm4, %v4380_v2 }
0x20cc   :  { %8025 = vmatpush3.bf16.msra.mxu1 %v9210_v51  ;;  %7627 = vmatprep.mubr.msk.f32.mxu1 %vm8440_vm11, %v8439_v27 }
0x20cd   :  { %8026 = vmatprep.subr.bf16.mxu1 %v8451_v52 }
0x20d0   :  { %8028 = vmatpush3.bf16.msra.mxu1 %v9224_v55 }
0x20d1   :  { %8029 = vmatprep.subr.bf16.mxu1 %v8451_v52 }
0x20d4   :  { %8031 = vmatpush3.bf16.msra.mxu1 %v9233_v58 }
0x20d5   :  { %8041 = vmatprep.subr.bf16.mxu1 %v8451_v52 }
0x219e   :  { %v4450_v3 = vpop.f32.mrb[54].mxu1 }
0x219f   :  { %v4451_v44 = vadd.f32 %v9297_v56, %v4450_v3  ;;  %v7599_v4 = vpop.f32.mrb[55].mxu1 }
0x21a1   :  { %4455 = vrot.lane.b32.xlu1 %v4451_v44, %s8447_s0 }
0x2213   :  { %v4456_v5 = vpop.permute.xlu1 %4455 }
0x2214   :  { %v4458_v6 = vsel %vm4010_vm5, %v4451_v44, %v4456_v5 }
0x2215   :  { %8309 = vtanh.f32 %v4458_v6  ;;  %v6908_v8 = vmul.f32 -1.442695, %v4458_v6 }
0x2217   :  { %8311 = vpow2.f32 %v6908_v8 }
0x221f   :  { %v8310_v7 = vpop.eup %8309 }
0x2220   :  { %4468 = vrot.lane.b32.xlu0 %v8310_v7, %s8444_s30 }
0x2221   :  { %v8312_v9 = vpop.eup %8311 }
0x2222   :  { %v4462_v10 = vadd.f32 1.0, %v8312_v9 }
0x2224   :  { %8313 = vrcp.f32 %v4462_v10 }
0x222e   :  { %v8314_v12 = vpop.eup %8313 }
0x222f   :  { %v4466_v45 = vmul.f32 %v8314_v12, %v4364_v61 }
0x2292   :  { %v4469_v13 = vpop.permute.xlu0 %4468 }
0x2293   :  { %v4471_v15 = vmul.f32 %v8314_v12, %v4469_v13 }
0x2295   :  { %4473 = vrot.lane.b32.xlu1 %v4471_v15, %s8449_s21 }
0x2307   :  { %v4474_v40 = vpop.permute.xlu1 %4473 }
0x2308   :  { %v4476_v17 = vadd.f32 %v4474_v40, %v4466_v45 }
0x230a   :  { %8315 = vtanh.f32 %v4476_v17 }
0x2314   :  { %v8316_v18 = vpop.eup %8315 }
0x2315   :  { %4479 = vrot.lane.b32.xlu0 %v8316_v18, %s8452_s2 }
0x2387   :  { %v4480_v20 = vpop.permute.xlu0 %4479 }
0x2388   :  { %v9372_v26 = vmul.f32 %v8314_v12, %v4480_v20 }
0x238a   :  { %4489 = vrot.lane.b32.xlu1 %v9372_v26, %s8443_s29 }
0x23fc   :  { %v4490_v32 = vpop.permute.xlu1 %4489 }
0x23fd   :  { %v4492_v35 = vsel %vm260_vm10, %v9274_v23, %v4490_v32 }
0x23fe   :  { %7613 = vmatmul.mubr.msk.f32.vlgmr.msra.gmra.mrb[36].mxu0 %vm4035_vm4, %v4492_v35 }
0x23ff   :  { %8034 = vmatpush3.bf16.msra.mxu0 %v9210_v51  ;;  %7642 = vmatprep.mubr.msk.f32.mxu0 %vm8440_vm11, %v8439_v27 }
0x2400   :  { %8035 = vmatprep.subr.bf16.mxu0 %v8451_v52 }
0x2403   :  { %8037 = vmatpush3.bf16.msra.mxu0 %v9224_v55 }
0x2404   :  { %8038 = vmatprep.subr.bf16.mxu0 %v8451_v52 }
0x2407   :  { %8040 = vmatpush3.bf16.msra.mxu0 %v9233_v58 }
0x2408   :  { %8050 = vmatprep.subr.bf16.mxu0 %v8451_v52 }
0x24d1   :  { %v4562_v36 = vpop.f32.mrb[36].mxu0 }
0x24d2   :  { %v4563_v23 = vadd.f32 %v9297_v56, %v4562_v36  ;;  %v7614_v50 = vpop.f32.mrb[37].mxu0 }
0x24d4   :  { %4567 = vrot.lane.b32.xlu0 %v4563_v23, %s8447_s0 }
0x2546   :  { %v4568_v57 = vpop.permute.xlu0 %4567 }
0x2547   :  { %v4570_v24 = vsel %vm4010_vm5, %v4563_v23, %v4568_v57 }
0x2548   :  { %8317 = vtanh.f32 %v4570_v24  ;;  %v6910_v31 = vmul.f32 -1.442695, %v4570_v24 }
0x254a   :  { %8319 = vpow2.f32 %v6910_v31 }
0x2552   :  { %v8318_v42 = vpop.eup %8317 }
0x2553   :  { %4580 = vrot.lane.b32.xlu1 %v8318_v42, %s8444_s30 }
0x2554   :  { %v8320_v46 = vpop.eup %8319 }
0x2555   :  { %v4574_v34 = vadd.f32 1.0, %v8320_v46 }
0x2557   :  { %8321 = vrcp.f32 %v4574_v34 }
0x2561   :  { %v8322_v38 = vpop.eup %8321 }
0x2562   :  { %v4578_v39 = vmul.f32 %v8322_v38, %v4476_v17 }
0x25c5   :  { %v4581_v37 = vpop.permute.xlu1 %4580 }
0x25c6   :  { %v4583_v41 = vmul.f32 %v8322_v38, %v4581_v37 }
0x25c8   :  { %4585 = vrot.lane.b32.xlu0 %v4583_v41, %s8449_s21 }
0x263a   :  { %v4586_v21 = vpop.permute.xlu0 %4585 }
0x263b   :  { %v4588_v47 = vadd.f32 %v4586_v21, %v4578_v39 }
0x263d   :  { %8323 = vtanh.f32 %v4588_v47 }
0x2647   :  { %v8324_v19 = vpop.eup %8323 }
0x2648   :  { %4591 = vrot.lane.b32.xlu1 %v8324_v19, %s8452_s2 }
0x26ba   :  { %v4592_v30 = vpop.permute.xlu1 %4591 }
0x26bb   :  { %v9394_v16 = vmul.f32 %v8322_v38, %v4592_v30 }
0x26bd   :  { %4601 = vrot.lane.b32.xlu0 %v9394_v16, %s8443_s29 }
0x272f   :  { %v4602_v14 = vpop.permute.xlu0 %4601 }
0x2730   :  { %v4604_v25 = vsel %vm260_vm10, %v9277_v22, %v4602_v14 }
0x2731   :  { %7628 = vmatmul.mubr.msk.f32.vlgmr.msra.gmra.mrb[56].mxu1 %vm4035_vm4, %v4604_v25 }
0x2732   :  { %8043 = vmatpush3.bf16.msra.mxu1 %v9210_v51  ;;  %7657 = vmatprep.mubr.msk.f32.mxu1 %vm8440_vm11, %v8439_v27 }
0x2733   :  { %8044 = vmatprep.subr.bf16.mxu1 %v8451_v52 }
0x2736   :  { %8046 = vmatpush3.bf16.msra.mxu1 %v9224_v55 }
0x2737   :  { %8047 = vmatprep.subr.bf16.mxu1 %v8451_v52 }
0x273a   :  { %8049 = vmatpush3.bf16.msra.mxu1 %v9233_v58 }
0x273b   :  { %8059 = vmatprep.subr.bf16.mxu1 %v8451_v52 }
0x2804   :  { %v4674_v48 = vpop.f32.mrb[56].mxu1 }
0x2805   :  { %v4675_v22 = vadd.f32 %v9297_v56, %v4674_v48  ;;  %v7629_v49 = vpop.f32.mrb[57].mxu1  ;;  %v6917_v48 = vld [vmem:[%s9913_s8 + $0x30] sm:$0xff] }
0x2807   :  { %4679 = vrot.lane.b32.xlu1 %v4675_v22, %s8447_s0 }
0x2879   :  { %v4680_v51 = vpop.permute.xlu1 %4679 }
0x287a   :  { %v4682_v28 = vsel %vm4010_vm5, %v4675_v22, %v4680_v51  ;;  %v6918_v22 = vld [vmem:[%s9913_s8 + $0x38] sm:$0xff] }
0x287b   :  { %8325 = vtanh.f32 %v4682_v28  ;;  %v6912_v55 = vmul.f32 -1.442695, %v4682_v28  ;;  %v9453_v49 = vpack.c.bf16 %v6918_v22, %v6917_v48  ;;  %v4995_v28 = vrot.slane %v9307_v11, 2 }
0x287d   :  { %8327 = vpow2.f32 %v6912_v55  ;;  %v6920_v55 = vld [vmem:[%s9913_s8 + $0x48] sm:$0xff] }
0x2885   :  { %v8326_v59 = vpop.eup %8325 }
0x2886   :  { %4692 = vrot.lane.b32.xlu0 %v8326_v59, %s8444_s30  ;;  %v6919_v59 = vld [vmem:[%s9913_s8 + $0x40] sm:$0xff] }
0x2887   :  { %v8328_v60 = vpop.eup %8327 }
0x2888   :  { %v4686_v58 = vadd.f32 1.0, %v8328_v60  ;;  %v9468_v60 = vpack.c.bf16 %v6920_v55, %v6919_v59 }
0x288a   :  { %8329 = vrcp.f32 %v4686_v58  ;;  %v6921_v58 = vld [vmem:[%s9913_s8 + $0x50] sm:$0xff] }
0x2894   :  { %v8330_v61 = vpop.eup %8329 }
0x2895   :  { %v4690_v1 = vmul.f32 %v8330_v61, %v4588_v47 }
0x28f8   :  { %v4693_v62 = vpop.permute.xlu0 %4692 }
0x28f9   :  { %v4695_v63 = vmul.f32 %v8330_v61, %v4693_v62 }
0x28fb   :  { %4697 = vrot.lane.b32.xlu1 %v4695_v63, %s8449_s21 }
0x296d   :  { %v4698_v2 = vpop.permute.xlu1 %4697 }
0x296e   :  { %v4700_v3 = vadd.f32 %v4698_v2, %v4690_v1 }
0x2970   :  { %8331 = vtanh.f32 %v4700_v3 }
0x297a   :  { %v8332_v44 = vpop.eup %8331 }
0x297b   :  { %4703 = vrot.lane.b32.xlu0 %v8332_v44, %s8452_s2 }
0x29ed   :  { %v4704_v4 = vpop.permute.xlu0 %4703 }
0x29ee   :  { %v9416_v5 = vmul.f32 %v8330_v61, %v4704_v4  ;;  %v6922_v61 = vld [vmem:[%s9913_s8 + $0x58] sm:$0xff] }
0x29ef   :  { %v9480_v62 = vpack.c.bf16 %v6922_v61, %v6921_v58 }
0x29f0   :  { %4717 = vrot.lane.b32.xlu1 %v9416_v5, %s8443_s29 }
0x2a62   :  { %v4718_v6 = vpop.permute.xlu1 %4717 }
0x2a63   :  { %v4720_v7 = vsel %vm260_vm10, %v9286_v53, %v4718_v6 }
0x2a64   :  { %7643 = vmatmul.mubr.msk.f32.vlgmr.msra.gmra.mrb[38].mxu0 %vm4035_vm4, %v4720_v7 }
0x2a65   :  { %7672 = vmatprep.mubr.msk.f32.mxu0 %vm8440_vm11, %v8439_v27  ;;  %8052 = vmatpush3.bf16.msra.mxu0 %v9453_v49 }
0x2a66   :  { %8053 = vmatprep.subr.bf16.mxu0 %v8451_v52 }
0x2a69   :  { %8055 = vmatpush3.bf16.msra.mxu0 %v9468_v60 }
0x2a6a   :  { %8056 = vmatprep.subr.bf16.mxu0 %v8451_v52 }
0x2a6d   :  { %8058 = vmatpush3.bf16.msra.mxu0 %v9480_v62 }
0x2a6e   :  { %8068 = vmatprep.subr.bf16.mxu0 %v8451_v52 }
0x2b37   :  { %v4790_v8 = vpop.f32.mrb[38].mxu0 }
0x2b38   :  { %v4791_v9 = vadd.f32 %v9297_v56, %v4790_v8  ;;  %v7644_v10 = vpop.f32.mrb[39].mxu0 }
0x2b3a   :  { %4795 = vrot.lane.b32.xlu0 %v4791_v9, %s8447_s0 }
0x2bac   :  { %v4796_v12 = vpop.permute.xlu0 %4795 }
0x2bad   :  { %v4798_v13 = vsel %vm4010_vm5, %v4791_v9, %v4796_v12 }
0x2bae   :  { %8333 = vtanh.f32 %v4798_v13  ;;  %v6914_v53 = vmul.f32 -1.442695, %v4798_v13 }
0x2bb0   :  { %8335 = vpow2.f32 %v6914_v53 }
0x2bb8   :  { %v8334_v15 = vpop.eup %8333 }
0x2bb9   :  { %4808 = vrot.lane.b32.xlu1 %v8334_v15, %s8444_s30 }
0x2bba   :  { %v8336_v45 = vpop.eup %8335 }
0x2bbb   :  { %v4802_v40 = vadd.f32 1.0, %v8336_v45 }
0x2bbd   :  { %8337 = vrcp.f32 %v4802_v40 }
0x2bc7   :  { %v8338_v17 = vpop.eup %8337 }
0x2bc8   :  { %v4806_v32 = vmul.f32 %v8338_v17, %v4700_v3 }
0x2c2b   :  { %v4809_v18 = vpop.permute.xlu1 %4808 }
0x2c2c   :  { %v4811_v20 = vmul.f32 %v8338_v17, %v4809_v18 }
0x2c2e   :  { %4813 = vrot.lane.b32.xlu0 %v4811_v20, %s8449_s21 }
0x2ca0   :  { %v4814_v35 = vpop.permute.xlu0 %4813 }
0x2ca1   :  { %v4816_v36 = vadd.f32 %v4814_v35, %v4806_v32 }
0x2ca3   :  { %8339 = vtanh.f32 %v4816_v36 }
0x2cad   :  { %v8340_v23 = vpop.eup %8339 }
0x2cae   :  { %4819 = vrot.lane.b32.xlu1 %v8340_v23, %s8452_s2 }
0x2d20   :  { %v4820_v50 = vpop.permute.xlu1 %4819 }
0x2d21   :  { %v9432_v57 = vmul.f32 %v8338_v17, %v4820_v50 }
0x2d23   :  { %4829 = vrot.lane.b32.xlu0 %v9432_v57, %s8443_s29 }
0x2d95   :  { %v4830_v24 = vpop.permute.xlu0 %4829 }
0x2d96   :  { %v4832_v42 = vsel %vm260_vm10, %v9289_v54, %v4830_v24 }
0x2d97   :  { %7658 = vmatmul.mubr.msk.f32.vlgmr.msra.gmra.mrb[58].mxu1 %vm4035_vm4, %v4832_v42 }
0x2d98   :  { %7687 = vmatprep.mubr.msk.f32.mxu1 %vm8440_vm11, %v8439_v27  ;;  %8061 = vmatpush3.bf16.msra.mxu1 %v9453_v49 }
0x2d99   :  { %8062 = vmatprep.subr.bf16.mxu1 %v8451_v52 }
0x2d9c   :  { %8064 = vmatpush3.bf16.msra.mxu1 %v9468_v60 }
0x2d9d   :  { %8065 = vmatprep.subr.bf16.mxu1 %v8451_v52 }
0x2da0   :  { %8067 = vmatpush3.bf16.msra.mxu1 %v9480_v62 }
0x2da1   :  { %8077 = vmatprep.subr.bf16.mxu1 %v8451_v52 }
0x2e6a   :  { %v4902_v31 = vpop.f32.mrb[58].mxu1 }
0x2e6b   :  { %v4903_v46 = vadd.f32 %v9297_v56, %v4902_v31  ;;  %v7659_v34 = vpop.f32.mrb[59].mxu1 }
0x2e6d   :  { %4907 = vrot.lane.b32.xlu1 %v4903_v46, %s8447_s0 }
0x2edf   :  { %v4908_v38 = vpop.permute.xlu1 %4907 }
0x2ee0   :  { %v4910_v37 = vsel %vm4010_vm5, %v4903_v46, %v4908_v38  ;;  %v4987_v38 = vrot.slane %v9328_v33, 2 }
0x2ee1   :  { %8341 = vtanh.f32 %v4910_v37  ;;  %v6916_v54 = vmul.f32 -1.442695, %v4910_v37  ;;  %v4947_v37 = vrot.slane %v9432_v57, 2 }
0x2ee3   :  { %8343 = vpow2.f32 %v6916_v54 }
0x2eeb   :  { %v8342_v41 = vpop.eup %8341 }
0x2eec   :  { %4920 = vrot.lane.b32.xlu0 %v8342_v41, %s8444_s30 }
0x2eed   :  { %v8344_v39 = vpop.eup %8343 }
0x2eee   :  { %v4914_v21 = vadd.f32 1.0, %v8344_v39 }
0x2ef0   :  { %8345 = vrcp.f32 %v4914_v21 }
0x2efa   :  { %v8346_v47 = vpop.eup %8345 }
0x2efb   :  { %v4918_v56 = vmul.f32 %v8346_v47, %v4816_v36 }
0x2f5e   :  { %v4921_v19 = vpop.permute.xlu0 %4920 }
0x2f5f   :  { %v4923_v30 = vmul.f32 %v8346_v47, %v4921_v19 }
0x2f61   :  { %4925 = vrot.lane.b32.xlu1 %v4923_v30, %s8449_s21 }
0x2fd3   :  { %v4926_v14 = vpop.permute.xlu1 %4925 }
0x2fd4   :  { %v4928_v25 = vadd.f32 %v4926_v14, %v4918_v56 }
0x2fd6   :  { %8347 = vtanh.f32 %v4928_v25 }
0x2fe0   :  { %v8348_v51 = vpop.eup %8347 }
0x2fe1   :  { %4931 = vrot.lane.b32.xlu0 %v8348_v51, %s8452_s2 }
0x2fe5   :  { %4996 = vrot.lane.b32.xlu0 %v4995_v28, %s8444_s30 }
0x3053   :  { %v4932_v63 = vpop.permute.xlu0 %4931 }
0x3054   :  { %v4934_v1 = vmul.f32 %v8346_v47, %v4932_v63 }
0x3056   :  { %v4939_v2 = vrot.slane %v4934_v1, 2  ;;  %4992 = vrot.lane.b32.xlu1 %v4934_v1, %s8453_s12 }
0x3057   :  { %v4997_v3 = vpop.permute.xlu0 %4996 }
0x3058   :  { %4940 = vrot.lane.b32.xlu0 %v4939_v2, %s8444_s30 }
0x305a   :  { %4935 = vrot.lane.b32.xlu1 %v9307_v11, %s8453_s12  ;;  %v9509_v11 = vld [vmem:[%s9914_s9 + $0x13] ss:$0 sm:$0xff] }
0x30c8   :  { %v4993_v44 = vpop.permute.xlu1 %4992 }
0x30c9   :  { %v4999_v4 = vsel %vm1787_vm14, %v4993_v44, %v4997_v3 }
0x30ca   :  { %v5009_v6 = vrot.slane %v4999_v4, 6  ;;  %v4941_v7 = vpop.permute.xlu0 %4940 }
0x30cc   :  { %v4936_v8 = vpop.permute.xlu1 %4935 }
0x30cd   :  { %v4943_v9 = vsel %vm1787_vm14, %v4936_v8, %v4941_v7 }
0x30ce   :  { %v5011_v10 = vsel %vm91_vm0, %v4943_v9, %v5009_v6  ;;  %v5786_v12 = vrot.slane %v4943_v9, 6 }
0x30cf   :  { %v5012_v13 = vsel %vm260_vm10, %v5011_v10, 0.0  ;;  %v4979_v10 = vrot.slane %v9350_v0, 2 }
0x30d0   :  { %7673 = vmatmul.mubr.msk.f32.vlgmr.msra.gmra.mrb[40].mxu0 %vm4035_vm4, %v5012_v13  ;;  %v9496_v15 = vsel %vm91_vm0, %v4999_v4, %v5786_v12  ;;  %v4955_v12 = vrot.slane %v9416_v5, 2 }
0x30d1   :  { %8070 = vmatpush3.bf16.msra.mxu0 %v9453_v49  ;;  %7702 = vmatprep.mubr.msk.f32.mxu0 %vm8440_vm11, %v8439_v27 }
0x30d2   :  { %8071 = vmatprep.subr.bf16.mxu0 %v8451_v52 }
0x30d5   :  { %8073 = vmatpush3.bf16.msra.mxu0 %v9468_v60 }
0x30d6   :  { %8074 = vmatprep.subr.bf16.mxu0 %v8451_v52 }
0x30d9   :  { %8076 = vmatpush3.bf16.msra.mxu0 %v9480_v62 }
0x30da   :  { %8086 = vmatprep.subr.bf16.mxu0 %v8451_v52 }
0x31a3   :  { %v5086_v53 = vpop.f32.mrb[40].mxu0 }
0x31a4   :  { %v5087_v45 = vadd.f32 %v9509_v11, %v5086_v53  ;;  %v7674_v40 = vpop.f32.mrb[41].mxu0 }
0x31a6   :  { %5091 = vrot.lane.b32.xlu1 %v5087_v45, %s8447_s0 }
0x3218   :  { %v5092_v17 = vpop.permute.xlu1 %5091 }
0x3219   :  { %v5094_v18 = vsel %vm4010_vm5, %v5087_v45, %v5092_v17 }
0x321a   :  { %8349 = vtanh.f32 %v5094_v18  ;;  %v6925_v32 = vmul.f32 -1.442695, %v5094_v18 }
0x321c   :  { %8351 = vpow2.f32 %v6925_v32 }
0x3224   :  { %v8350_v20 = vpop.eup %8349 }
0x3225   :  { %5104 = vrot.lane.b32.xlu0 %v8350_v20, %s8444_s30 }
0x3226   :  { %v8352_v35 = vpop.eup %8351 }
0x3227   :  { %v5098_v36 = vadd.f32 1.0, %v8352_v35 }
0x3229   :  { %8353 = vrcp.f32 %v5098_v36 }
0x3233   :  { %v8354_v23 = vpop.eup %8353 }
0x3234   :  { %v5102_v42 = vmul.f32 0.0, %v8354_v23 }
0x3297   :  { %v5105_v50 = vpop.permute.xlu0 %5104 }
0x3298   :  { %v5107_v24 = vmul.f32 %v8354_v23, %v5105_v50 }
0x329a   :  { %5109 = vrot.lane.b32.xlu1 %v5107_v24, %s8449_s21 }
0x329e   :  { %4984 = vrot.lane.b32.xlu1 %v9432_v57, %s8453_s12 }
0x32a2   :  { %4944 = vrot.lane.b32.xlu1 %v9328_v33, %s8453_s12 }
0x330c   :  { %v5110_v31 = vpop.permute.xlu1 %5109 }
0x330d   :  { %v5112_v46 = vadd.f32 %v5110_v31, %v5102_v42 }
0x330f   :  { %8355 = vtanh.f32 %v5112_v46 }
0x3310   :  { %v4985_v39 = vpop.permute.xlu1 %4984 }
0x3314   :  { %v4945_v47 = vpop.permute.xlu1 %4944 }
0x3319   :  { %v8356_v34 = vpop.eup %8355 }
0x331a   :  { %5115 = vrot.lane.b32.xlu0 %v8356_v34, %s8452_s2 }
0x331e   :  { %4988 = vrot.lane.b32.xlu0 %v4987_v38, %s8444_s30 }
0x3322   :  { %4948 = vrot.lane.b32.xlu0 %v4947_v37, %s8444_s30 }
0x338c   :  { %v5116_v41 = vpop.permute.xlu0 %5115 }
0x338d   :  { %v9526_v54 = vmul.f32 %v8354_v23, %v5116_v41 }
0x338f   :  { %5124 = vrot.lane.b32.xlu1 %v9526_v54, %s8443_s29 }
0x3390   :  { %v4989_v21 = vpop.permute.xlu0 %4988 }
0x3391   :  { %v4991_v33 = vsel %vm1787_vm14, %v4985_v39, %v4989_v21 }
0x3392   :  { %v5120_v57 = vrot.slane %v4991_v33, 6 }
0x3394   :  { %v4949_v19 = vpop.permute.xlu0 %4948 }
0x3395   :  { %v4951_v30 = vsel %vm1787_vm14, %v4945_v47, %v4949_v19 }
0x3396   :  { %v5675_v56 = vrot.slane %v4951_v30, 6  ;;  %v5122_v48 = vsel %vm91_vm0, %v4951_v30, %v5120_v57 }
0x3398   :  { %v9533_v14 = vsel %vm91_vm0, %v4991_v33, %v5675_v56 }
0x3401   :  { %v5125_v25 = vpop.permute.xlu1 %5124 }
0x3402   :  { %v5127_v22 = vsel %vm260_vm10, %v5122_v48, %v5125_v25  ;;  %v4971_v25 = vrot.slane %v9372_v26, 2  ;;  %v4963_v48 = vrot.slane %v9394_v16, 2 }
0x3403   :  { %7688 = vmatmul.mubr.msk.f32.vlgmr.msra.gmra.mrb[60].mxu1 %vm4035_vm4, %v5127_v22 }
0x3404   :  { %8079 = vmatpush3.bf16.msra.mxu1 %v9453_v49  ;;  %7717 = vmatprep.mubr.msk.f32.mxu1 %vm8440_vm11, %v8439_v27 }
0x3405   :  { %8080 = vmatprep.subr.bf16.mxu1 %v8451_v52 }
0x3408   :  { %8082 = vmatpush3.bf16.msra.mxu1 %v9468_v60 }
0x3409   :  { %8083 = vmatprep.subr.bf16.mxu1 %v8451_v52 }
0x340c   :  { %8085 = vmatpush3.bf16.msra.mxu1 %v9480_v62 }
0x340d   :  { %8095 = vmatprep.subr.bf16.mxu1 %v8451_v52 }
0x34d6   :  { %v5197_v51 = vpop.f32.mrb[60].mxu1 }
0x34d7   :  { %v5198_v28 = vadd.f32 %v9509_v11, %v5197_v51  ;;  %v7689_v59 = vpop.f32.mrb[61].mxu1 }
0x34d9   :  { %5202 = vrot.lane.b32.xlu0 %v5198_v28, %s8447_s0 }
0x354b   :  { %v5203_v55 = vpop.permute.xlu0 %5202 }
0x354c   :  { %v5205_v58 = vsel %vm4010_vm5, %v5198_v28, %v5203_v55 }
0x354d   :  { %8357 = vtanh.f32 %v5205_v58  ;;  %v6927_v63 = vmul.f32 -1.442695, %v5205_v58 }
0x354f   :  { %8359 = vpow2.f32 %v6927_v63 }
0x3557   :  { %v8358_v61 = vpop.eup %8357 }
0x3558   :  { %5215 = vrot.lane.b32.xlu1 %v8358_v61, %s8444_s30 }
0x3559   :  { %v8360_v1 = vpop.eup %8359 }
0x355a   :  { %v5209_v2 = vadd.f32 1.0, %v8360_v1 }
0x355c   :  { %8361 = vrcp.f32 %v5209_v2 }
0x3566   :  { %v8362_v3 = vpop.eup %8361 }
0x3567   :  { %v5213_v6 = vmul.f32 %v8362_v3, %v5112_v46 }
0x35ca   :  { %v5216_v44 = vpop.permute.xlu1 %5215 }
0x35cb   :  { %v5218_v4 = vmul.f32 %v8362_v3, %v5216_v44 }
0x35cd   :  { %5220 = vrot.lane.b32.xlu0 %v5218_v4, %s8449_s21 }
0x35d1   :  { %4976 = vrot.lane.b32.xlu0 %v9416_v5, %s8453_s12 }
0x35d5   :  { %4952 = vrot.lane.b32.xlu0 %v9350_v0, %s8453_s12 }
0x363f   :  { %v5221_v7 = vpop.permute.xlu0 %5220 }
0x3640   :  { %v5223_v8 = vadd.f32 %v5221_v7, %v5213_v6 }
0x3642   :  { %8363 = vtanh.f32 %v5223_v8 }
0x3643   :  { %v4977_v45 = vpop.permute.xlu0 %4976 }
0x3647   :  { %v4953_v17 = vpop.permute.xlu0 %4952 }
0x364c   :  { %v8364_v9 = vpop.eup %8363 }
0x364d   :  { %5226 = vrot.lane.b32.xlu1 %v8364_v9, %s8452_s2 }
0x3651   :  { %4980 = vrot.lane.b32.xlu1 %v4979_v10, %s8444_s30 }
0x3655   :  { %4956 = vrot.lane.b32.xlu1 %v4955_v12, %s8444_s30 }
0x36bf   :  { %v5227_v13 = vpop.permute.xlu1 %5226 }
0x36c0   :  { %v9561_v53 = vmul.f32 %v8362_v3, %v5227_v13 }
0x36c2   :  { %5235 = vrot.lane.b32.xlu0 %v9561_v53, %s8443_s29 }
0x36c3   :  { %v4981_v40 = vpop.permute.xlu1 %4980 }
0x36c4   :  { %v4983_v0 = vsel %vm1787_vm14, %v4977_v45, %v4981_v40 }
0x36c5   :  { %v5231_v5 = vrot.slane %v4983_v0, 6 }
0x36c7   :  { %v4957_v18 = vpop.permute.xlu1 %4956 }
0x36c8   :  { %v4959_v20 = vsel %vm1787_vm14, %v4953_v17, %v4957_v18 }
0x36c9   :  { %v5564_v32 = vrot.slane %v4959_v20, 6  ;;  %v5233_v23 = vsel %vm91_vm0, %v4959_v20, %v5231_v5 }
0x36cb   :  { %v9568_v35 = vsel %vm91_vm0, %v4983_v0, %v5564_v32 }
0x3734   :  { %v5236_v36 = vpop.permute.xlu0 %5235 }
0x3735   :  { %v5238_v50 = vsel %vm260_vm10, %v5233_v23, %v5236_v36 }
0x3736   :  { %7703 = vmatmul.mubr.msk.f32.vlgmr.msra.gmra.mrb[42].mxu0 %vm4035_vm4, %v5238_v50 }
0x3737   :  { %8088 = vmatpush3.bf16.msra.mxu0 %v9453_v49  ;;  %7732 = vmatprep.mubr.msk.f32.mxu0 %vm8440_vm11, %v8439_v27 }
0x3738   :  { %8089 = vmatprep.subr.bf16.mxu0 %v8451_v52 }
0x373b   :  { %8091 = vmatpush3.bf16.msra.mxu0 %v9468_v60 }
0x373c   :  { %8092 = vmatprep.subr.bf16.mxu0 %v8451_v52 }
0x373f   :  { %8094 = vmatpush3.bf16.msra.mxu0 %v9480_v62 }
0x3740   :  { %8104 = vmatprep.subr.bf16.mxu0 %v8451_v52 }
0x3809   :  { %v5308_v24 = vpop.f32.mrb[42].mxu0 }
0x380a   :  { %v5309_v42 = vadd.f32 %v9509_v11, %v5308_v24  ;;  %v7704_v31 = vpop.f32.mrb[43].mxu0 }
0x380c   :  { %5313 = vrot.lane.b32.xlu1 %v5309_v42, %s8447_s0 }
0x387e   :  { %v5314_v46 = vpop.permute.xlu1 %5313 }
0x387f   :  { %v5316_v34 = vsel %vm4010_vm5, %v5309_v42, %v5314_v46 }
0x3880   :  { %8365 = vtanh.f32 %v5316_v34  ;;  %v6929_v37 = vmul.f32 -1.442695, %v5316_v34 }
0x3882   :  { %8367 = vpow2.f32 %v6929_v37 }
0x388a   :  { %v8366_v38 = vpop.eup %8365 }
0x388b   :  { %5326 = vrot.lane.b32.xlu0 %v8366_v38, %s8444_s30 }
0x388c   :  { %v8368_v41 = vpop.eup %8367 }
0x388d   :  { %v5320_v39 = vadd.f32 1.0, %v8368_v41 }
0x388f   :  { %8369 = vrcp.f32 %v5320_v39 }
0x3899   :  { %v8370_v21 = vpop.eup %8369 }
0x389a   :  { %v5324_v30 = vmul.f32 %v8370_v21, %v5223_v8 }
0x38fd   :  { %v5327_v47 = vpop.permute.xlu0 %5326 }
0x38fe   :  { %v5329_v19 = vmul.f32 %v8370_v21, %v5327_v47 }
0x3900   :  { %5331 = vrot.lane.b32.xlu1 %v5329_v19, %s8449_s21 }
0x3904   :  { %4968 = vrot.lane.b32.xlu1 %v9394_v16, %s8453_s12 }
0x3908   :  { %4960 = vrot.lane.b32.xlu1 %v9372_v26, %s8453_s12 }
0x3972   :  { %v5332_v56 = vpop.permute.xlu1 %5331 }
0x3973   :  { %v5334_v33 = vadd.f32 %v5332_v56, %v5324_v30 }
0x3975   :  { %8371 = vtanh.f32 %v5334_v33 }
0x3976   :  { %v4969_v28 = vpop.permute.xlu1 %4968 }
0x397a   :  { %v4961_v55 = vpop.permute.xlu1 %4960 }
0x397f   :  { %v8372_v57 = vpop.eup %8371 }
0x3980   :  { %5337 = vrot.lane.b32.xlu0 %v8372_v57, %s8452_s2 }
0x3984   :  { %4972 = vrot.lane.b32.xlu0 %v4971_v25, %s8444_s30 }
0x3988   :  { %4964 = vrot.lane.b32.xlu0 %v4963_v48, %s8444_s30 }
0x39f2   :  { %v5338_v22 = vpop.permute.xlu0 %5337 }
0x39f3   :  { %v9596_v51 = vmul.f32 %v8370_v21, %v5338_v22 }
0x39f5   :  { %5346 = vrot.lane.b32.xlu1 %v9596_v51, %s8443_s29 }
0x39f6   :  { %v4973_v59 = vpop.permute.xlu0 %4972 }
0x39f7   :  { %v4975_v26 = vsel %vm1787_vm14, %v4969_v28, %v4973_v59 }
0x39f8   :  { %v5342_v16 = vrot.slane %v4975_v26, 6 }
0x39fa   :  { %v4965_v58 = vpop.permute.xlu0 %4964 }
0x39fb   :  { %v4967_v61 = vsel %vm1787_vm14, %v4961_v55, %v4965_v58 }
0x39fc   :  { %v5453_v63 = vrot.slane %v4967_v61, 6  ;;  %v5344_v3 = vsel %vm91_vm0, %v4967_v61, %v5342_v16 }
0x39fe   :  { %v5455_v1 = vsel %vm91_vm0, %v4975_v26, %v5453_v63  ;;  %vm6043_vm0 = vcmask 123904  }
0x3a67   :  { %v5347_v2 = vpop.permute.xlu1 %5346 }
0x3a68   :  { %v5349_v44 = vsel %vm260_vm10, %v5344_v3, %v5347_v2 }
0x3a69   :  { %7718 = vmatmul.mubr.msk.f32.vlgmr.msra.gmra.mrb[62].mxu1 %vm4035_vm4, %v5349_v44 }
0x3a6a   :  { %8097 = vmatpush3.bf16.msra.mxu1 %v9453_v49  ;;  %7747 = vmatprep.mubr.msk.f32.mxu1 %vm8440_vm11, %v8439_v27 }
0x3a6b   :  { %8098 = vmatprep.subr.bf16.mxu1 %v8451_v52 }
0x3a6e   :  { %8100 = vmatpush3.bf16.msra.mxu1 %v9468_v60 }
0x3a6f   :  { %8101 = vmatprep.subr.bf16.mxu1 %v8451_v52 }
0x3a72   :  { %8103 = vmatpush3.bf16.msra.mxu1 %v9480_v62 }
0x3a73   :  { %8113 = vmatprep.subr.bf16.mxu1 %v8451_v52 }
0x3b3c   :  { %v5419_v4 = vpop.f32.mrb[62].mxu1 }
0x3b3d   :  { %v5420_v6 = vadd.f32 %v9509_v11, %v5419_v4  ;;  %v7719_v7 = vpop.f32.mrb[63].mxu1 }
0x3b3f   :  { %5424 = vrot.lane.b32.xlu0 %v5420_v6, %s8447_s0 }
0x3bb1   :  { %v5425_v8 = vpop.permute.xlu0 %5424 }
0x3bb2   :  { %v5427_v9 = vsel %vm4010_vm5, %v5420_v6, %v5425_v8 }
0x3bb3   :  { %8373 = vtanh.f32 %v5427_v9  ;;  %v6931_v12 = vmul.f32 -1.442695, %v5427_v9 }
0x3bb5   :  { %8375 = vpow2.f32 %v6931_v12 }
0x3bbd   :  { %v8374_v10 = vpop.eup %8373 }
0x3bbe   :  { %5437 = vrot.lane.b32.xlu1 %v8374_v10, %s8444_s30 }
0x3bbf   :  { %v8376_v13 = vpop.eup %8375 }
0x3bc0   :  { %v5431_v45 = vadd.f32 1.0, %v8376_v13 }
0x3bc2   :  { %8377 = vrcp.f32 %v5431_v45 }
0x3bcc   :  { %v8378_v40 = vpop.eup %8377 }
0x3bcd   :  { %v5435_v20 = vmul.f32 %v8378_v40, %v5334_v33 }
0x3c30   :  { %v5438_v17 = vpop.permute.xlu1 %5437 }
0x3c31   :  { %v5440_v18 = vmul.f32 %v8378_v40, %v5438_v17 }
0x3c33   :  { %5442 = vrot.lane.b32.xlu0 %v5440_v18, %s8449_s21 }
0x3ca5   :  { %v5443_v32 = vpop.permute.xlu0 %5442 }
0x3ca6   :  { %v5445_v0 = vadd.f32 %v5443_v32, %v5435_v20 }
0x3ca8   :  { %8379 = vtanh.f32 %v5445_v0 }
0x3cb2   :  { %v8380_v5 = vpop.eup %8379 }
0x3cb3   :  { %5448 = vrot.lane.b32.xlu1 %v8380_v5, %s8452_s2 }
0x3d25   :  { %v5449_v36 = vpop.permute.xlu1 %5448 }
0x3d26   :  { %v9621_v23 = vmul.f32 %v8378_v40, %v5449_v36 }
0x3d28   :  { %5457 = vrot.lane.b32.xlu0 %v9621_v23, %s8443_s29 }
0x3d9a   :  { %v5458_v50 = vpop.permute.xlu0 %5457 }
0x3d9b   :  { %v5460_v24 = vsel %vm260_vm10, %v5455_v1, %v5458_v50 }
0x3d9c   :  { %7733 = vmatmul.mubr.msk.f32.vlgmr.msra.gmra.mrb[44].mxu0 %vm4035_vm4, %v5460_v24 }
0x3d9d   :  { %8106 = vmatpush3.bf16.msra.mxu0 %v9453_v49  ;;  %7762 = vmatprep.mubr.msk.f32.mxu0 %vm8440_vm11, %v8439_v27 }
0x3d9e   :  { %8107 = vmatprep.subr.bf16.mxu0 %v8451_v52 }
0x3da1   :  { %8109 = vmatpush3.bf16.msra.mxu0 %v9468_v60 }
0x3da2   :  { %8110 = vmatprep.subr.bf16.mxu0 %v8451_v52 }
0x3da5   :  { %8112 = vmatpush3.bf16.msra.mxu0 %v9480_v62 }
0x3da6   :  { %8122 = vmatprep.subr.bf16.mxu0 %v8451_v52 }
0x3e6f   :  { %v5530_v42 = vpop.f32.mrb[44].mxu0 }
0x3e70   :  { %v5531_v31 = vadd.f32 %v9509_v11, %v5530_v42  ;;  %v7734_v46 = vpop.f32.mrb[45].mxu0 }
0x3e72   :  { %5535 = vrot.lane.b32.xlu1 %v5531_v31, %s8447_s0 }
0x3ee4   :  { %v5536_v34 = vpop.permute.xlu1 %5535 }
0x3ee5   :  { %v5538_v38 = vsel %vm4010_vm5, %v5531_v31, %v5536_v34 }
0x3ee6   :  { %8381 = vtanh.f32 %v5538_v38  ;;  %v6933_v41 = vmul.f32 -1.442695, %v5538_v38 }
0x3ee8   :  { %8383 = vpow2.f32 %v6933_v41 }
0x3ef0   :  { %v8382_v37 = vpop.eup %8381 }
0x3ef1   :  { %5548 = vrot.lane.b32.xlu0 %v8382_v37, %s8444_s30 }
0x3ef2   :  { %v8384_v39 = vpop.eup %8383 }
0x3ef3   :  { %v5542_v21 = vadd.f32 1.0, %v8384_v39 }
0x3ef5   :  { %8385 = vrcp.f32 %v5542_v21 }
0x3eff   :  { %v8386_v47 = vpop.eup %8385 }
0x3f00   :  { %v5546_v56 = vmul.f32 %v8386_v47, %v5445_v0 }
0x3f63   :  { %v5549_v19 = vpop.permute.xlu0 %5548 }
0x3f64   :  { %v5551_v30 = vmul.f32 %v8386_v47, %v5549_v19 }
0x3f66   :  { %5553 = vrot.lane.b32.xlu1 %v5551_v30, %s8449_s21 }
0x3fd8   :  { %v5554_v33 = vpop.permute.xlu1 %5553 }
0x3fd9   :  { %v5556_v57 = vadd.f32 %v5554_v33, %v5546_v56 }
0x3fdb   :  { %8387 = vtanh.f32 %v5556_v57 }
0x3fe5   :  { %v8388_v25 = vpop.eup %8387 }
0x3fe6   :  { %5559 = vrot.lane.b32.xlu0 %v8388_v25, %s8452_s2 }
0x4058   :  { %v5560_v48 = vpop.permute.xlu0 %5559 }
0x4059   :  { %v9642_v22 = vmul.f32 %v8386_v47, %v5560_v48 }
0x405b   :  { %5568 = vrot.lane.b32.xlu1 %v9642_v22, %s8443_s29 }
0x40cd   :  { %v5569_v28 = vpop.permute.xlu1 %5568 }
0x40ce   :  { %v5571_v59 = vsel %vm260_vm10, %v9568_v35, %v5569_v28 }
0x40cf   :  { %7748 = vmatmul.mubr.msk.f32.vlgmr.msra.gmra.mrb[64].mxu1 %vm4035_vm4, %v5571_v59 }
0x40d0   :  { %8115 = vmatpush3.bf16.msra.mxu1 %v9453_v49  ;;  %7777 = vmatprep.mubr.msk.f32.mxu1 %vm8440_vm11, %v8439_v27 }
0x40d1   :  { %8116 = vmatprep.subr.bf16.mxu1 %v8451_v52 }
0x40d4   :  { %8118 = vmatpush3.bf16.msra.mxu1 %v9468_v60 }
0x40d5   :  { %8119 = vmatprep.subr.bf16.mxu1 %v8451_v52 }
0x40d8   :  { %8121 = vmatpush3.bf16.msra.mxu1 %v9480_v62 }
0x40d9   :  { %8134 = vmatprep.subr.bf16.mxu1 %v8451_v52 }
0x41a2   :  { %v5641_v55 = vpop.f32.mrb[64].mxu1 }
0x41a3   :  { %v5642_v35 = vadd.f32 %v9509_v11, %v5641_v55  ;;  %v7749_v58 = vpop.f32.mrb[65].mxu1  ;;  %v5961_v55 = vld [vmem:[%s9914_s9 + $0x18] sm:$0xff] }
0x41a4   :  { %v5963_v58 = vld [vmem:[%s9914_s9 + $0x28] sm:$0xff] }
0x41a5   :  { %5646 = vrot.lane.b32.xlu0 %v5642_v35, %s8447_s0 }
0x4217   :  { %v5647_v49 = vpop.permute.xlu0 %5646 }
0x4218   :  { %v5649_v61 = vsel %vm4010_vm5, %v5642_v35, %v5647_v49  ;;  %v5962_v35 = vld [vmem:[%s9914_s9 + $0x20] sm:$0xff] }
0x4219   :  { %8389 = vtanh.f32 %v5649_v61  ;;  %v6935_v60 = vmul.f32 -1.442695, %v5649_v61  ;;  %v9715_v49 = vpack.c.bf16 %v5962_v35, %v5961_v55  ;;  %v5964_v61 = vld [vmem:[%s9914_s9 + $0x30] sm:$0xff] }
0x421b   :  { %8391 = vpow2.f32 %v6935_v60 }
0x4223   :  { %v8390_v63 = vpop.eup %8389 }
0x4224   :  { %5659 = vrot.lane.b32.xlu1 %v8390_v63, %s8444_s30  ;;  %v9721_v63 = vpack.c.bf16 %v5964_v61, %v5963_v58 }
0x4225   :  { %v8392_v26 = vpop.eup %8391 }
0x4226   :  { %v5653_v62 = vadd.f32 1.0, %v8392_v26 }
0x4228   :  { %8393 = vrcp.f32 %v5653_v62 }
0x4232   :  { %v8394_v1 = vpop.eup %8393 }
0x4233   :  { %v5657_v3 = vmul.f32 %v8394_v1, %v5556_v57 }
0x4296   :  { %v5660_v16 = vpop.permute.xlu1 %5659 }
0x4297   :  { %v5662_v2 = vmul.f32 %v8394_v1, %v5660_v16 }
0x4299   :  { %5664 = vrot.lane.b32.xlu0 %v5662_v2, %s8449_s21  ;;  %v5924_v2 = vrot.slane %v9642_v22, 2 }
0x430b   :  { %v5665_v44 = vpop.permute.xlu0 %5664 }
0x430c   :  { %v5667_v4 = vadd.f32 %v5665_v44, %v5657_v3  ;;  %v5932_v3 = vrot.slane %v9621_v23, 2  ;;  %v5940_v44 = vrot.slane %v9596_v51, 2 }
0x430e   :  { %8395 = vtanh.f32 %v5667_v4 }
0x4318   :  { %v8396_v6 = vpop.eup %8395 }
0x4319   :  { %5670 = vrot.lane.b32.xlu1 %v8396_v6, %s8452_s2  ;;  %v5956_v6 = vrot.slane %v9526_v54, 2 }
0x438b   :  { %v5671_v7 = vpop.permute.xlu1 %5670 }
0x438c   :  { %v9664_v8 = vmul.f32 %v8394_v1, %v5671_v7 }
0x438e   :  { %5679 = vrot.lane.b32.xlu0 %v9664_v8, %s8443_s29  ;;  %v5916_v16 = vrot.slane %v9664_v8, 2 }
0x4400   :  { %v5680_v9 = vpop.permute.xlu0 %5679 }
0x4401   :  { %v5682_v10 = vsel %vm260_vm10, %v9533_v14, %v5680_v9 }
0x4402   :  { %7763 = vmatmul.mubr.msk.f32.vlgmr.msra.gmra.mrb[46].mxu0 %vm4035_vm4, %v5682_v10 }
0x4403   :  { %7788 = vmatprep.mubr.msk.f32.mxu0 %vm8440_vm11, %v8439_v27  ;;  %8124 = vmatpush3.bf16.msra.mxu0 %v9715_v49 }
0x4404   :  { %8125 = vmatprep.subr.bf16.mxu0 %v8451_v52 }
0x4407   :  { %8127 = vmatpush3.bf16.msra.mxu0 %v9721_v63 }
0x4408   :  { %8128 = vmatprep.subr.bf16.mxu0 %v8451_v52 }
0x44d5   :  { %v5752_v12 = vpop.f32.mrb[46].mxu0 }
0x44d6   :  { %v5753_v13 = vadd.f32 %v9509_v11, %v5752_v12  ;;  %v7764_v45 = vpop.f32.mrb[47].mxu0 }
0x44d8   :  { %5757 = vrot.lane.b32.xlu1 %v5753_v13, %s8447_s0 }
0x454a   :  { %v5758_v40 = vpop.permute.xlu1 %5757 }
0x454b   :  { %v5760_v17 = vsel %vm4010_vm5, %v5753_v13, %v5758_v40 }
0x454c   :  { %8397 = vtanh.f32 %v5760_v17  ;;  %v6937_v14 = vmul.f32 -1.442695, %v5760_v17 }
0x454e   :  { %8399 = vpow2.f32 %v6937_v14 }
0x4556   :  { %v8398_v18 = vpop.eup %8397 }
0x4557   :  { %5770 = vrot.lane.b32.xlu0 %v8398_v18, %s8444_s30 }
0x4558   :  { %v8400_v20 = vpop.eup %8399 }
0x4559   :  { %v5764_v32 = vadd.f32 1.0, %v8400_v20 }
0x455b   :  { %8401 = vrcp.f32 %v5764_v32 }
0x4565   :  { %v8402_v0 = vpop.eup %8401 }
0x4566   :  { %v5768_v50 = vmul.f32 %v8402_v0, %v5667_v4  ;;  %v5948_v4 = vrot.slane %v9561_v53, 2 }
0x45c9   :  { %v5771_v5 = vpop.permute.xlu0 %5770 }
0x45ca   :  { %v5773_v36 = vmul.f32 %v8402_v0, %v5771_v5 }
0x45cc   :  { %5775 = vrot.lane.b32.xlu1 %v5773_v36, %s8449_s21 }
0x463e   :  { %v5776_v24 = vpop.permute.xlu1 %5775 }
0x463f   :  { %v5778_v42 = vadd.f32 %v5776_v24, %v5768_v50 }
0x4641   :  { %8403 = vtanh.f32 %v5778_v42 }
0x464b   :  { %v8404_v31 = vpop.eup %8403 }
0x464c   :  { %5781 = vrot.lane.b32.xlu0 %v8404_v31, %s8452_s2 }
0x46be   :  { %v5782_v46 = vpop.permute.xlu0 %5781 }
0x46bf   :  { %v5784_v34 = vmul.f32 %v8402_v0, %v5782_v46 }
0x46c1   :  { %5790 = vrot.lane.b32.xlu1 %v5784_v34, %s8443_s29  ;;  %v5908_v1 = vrot.slane %v5784_v34, 2 }
0x4733   :  { %v5791_v38 = vpop.permute.xlu1 %5790 }
0x4734   :  { %v5793_v37 = vsel %vm260_vm10, %v9496_v15, %v5791_v38 }
0x4735   :  { %7778 = vmatmul.mubr.msk.f32.vlgmr.msra.gmra.mrb[66].mxu1 %vm4035_vm4, %v5793_v37 }
0x4736   :  { %7810 = vmatprep.mubr.msk.f32.mxu1 %vm8440_vm11, %v8439_v27  ;;  %8136 = vmatpush3.bf16.msra.mxu1 %v9715_v49 }
0x4737   :  { %8137 = vmatprep.subr.bf16.mxu1 %v8451_v52 }
0x473a   :  { %8139 = vmatpush3.bf16.msra.mxu1 %v9721_v63 }
0x473b   :  { %8146 = vmatprep.subr.bf16.mxu1 %v8451_v52 }
0x4808   :  { %v5863_v41 = vpop.f32.mrb[66].mxu1 }
0x4809   :  { %v5864_v39 = vadd.f32 %v9509_v11, %v5863_v41  ;;  %v7779_v21 = vpop.f32.mrb[67].mxu1 }
0x480b   :  { %5868 = vrot.lane.b32.xlu0 %v5864_v39, %s8447_s0 }
0x487d   :  { %v5869_v47 = vpop.permute.xlu0 %5868 }
0x487e   :  { %v5871_v19 = vsel %vm4010_vm5, %v5864_v39, %v5869_v47 }
0x487f   :  { %8405 = vtanh.f32 %v5871_v19  ;;  %v6939_v15 = vmul.f32 -1.442695, %v5871_v19 }
0x4881   :  { %8407 = vpow2.f32 %v6939_v15 }
0x4889   :  { %v8406_v30 = vpop.eup %8405 }
0x488a   :  { %5881 = vrot.lane.b32.xlu1 %v8406_v30, %s8444_s30 }
0x488b   :  { %v8408_v56 = vpop.eup %8407 }
0x488c   :  { %v5875_v33 = vadd.f32 1.0, %v8408_v56 }
0x488e   :  { %8409 = vrcp.f32 %v5875_v33 }
0x4898   :  { %v8410_v57 = vpop.eup %8409 }
0x4899   :  { %v5879_v43 = vmul.f32 %v8410_v57, %v5778_v42 }
0x48fc   :  { %v5882_v25 = vpop.permute.xlu1 %5881 }
0x48fd   :  { %v5884_v48 = vmul.f32 %v8410_v57, %v5882_v25 }
0x48ff   :  { %5886 = vrot.lane.b32.xlu0 %v5884_v48, %s8449_s21 }
0x4903   :  { %5896 = vrot.lane.b32.xlu0 %v9526_v54, %s8453_s12 }
0x4907   :  { %5905 = vrot.lane.b32.xlu0 %v9561_v53, %s8453_s12 }
0x490b   :  { %5913 = vrot.lane.b32.xlu0 %v9596_v51, %s8453_s12 }
0x490f   :  { %5921 = vrot.lane.b32.xlu0 %v9621_v23, %s8453_s12 }
0x4913   :  { %5929 = vrot.lane.b32.xlu0 %v9642_v22, %s8453_s12 }
0x4917   :  { %5937 = vrot.lane.b32.xlu0 %v9664_v8, %s8453_s12 }
0x491b   :  { %5945 = vrot.lane.b32.xlu0 %v5784_v34, %s8453_s12  ;;  %v6940_v34 = vld [vmem:[%s9914_s9 + $0x14] ss:$0 sm:$0xff]  ;;  %s8454_s9 = smov 48  }
0x4971   :  { %v5887_v11 = vpop.permute.xlu0 %5886 }
0x4972   :  { %v5889_v28 = vadd.f32 %v5887_v11, %v5879_v43 }
0x4974   :  { %8411 = vtanh.f32 %v5889_v28 }
0x4975   :  { %v5897_v7 = vpop.permute.xlu0 %5896 }
0x4979   :  { %v5906_v22 = vpop.permute.xlu0 %5905 }
0x497d   :  { %v5914_v8 = vpop.permute.xlu0 %5913 }
0x497e   :  { %v8412_v59 = vpop.eup %8411 }
0x497f   :  { %5892 = vrot.lane.b32.xlu1 %v8412_v59, %s8452_s2 }
0x4981   :  { %v5922_v51 = vpop.permute.xlu0 %5921 }
0x4985   :  { %v5930_v13 = vpop.permute.xlu0 %5929 }
0x4989   :  { %v5938_v14 = vpop.permute.xlu0 %5937 }
0x498d   :  { %v5946_v32 = vpop.permute.xlu0 %5945 }
0x49f1   :  { %v5893_v60 = vpop.permute.xlu1 %5892 }
0x49f2   :  { %v5895_v26 = vmul.f32 %v8410_v57, %v5893_v60 }
0x49f4   :  { %v5900_v62 = vrot.slane %v5895_v26, 2  ;;  %5953 = vrot.lane.b32.xlu0 %v5895_v26, %s8453_s12 }
0x49f6   :  { %5901 = vrot.lane.b32.xlu1 %v5900_v62, %s8444_s30 }
0x49fa   :  { %5909 = vrot.lane.b32.xlu1 %v5908_v1, %s8444_s30 }
0x49fe   :  { %5917 = vrot.lane.b32.xlu1 %v5916_v16, %s8444_s30 }
0x4a02   :  { %5925 = vrot.lane.b32.xlu1 %v5924_v2, %s8444_s30 }
0x4a06   :  { %5933 = vrot.lane.b32.xlu1 %v5932_v3, %s8444_s30 }
0x4a0a   :  { %5941 = vrot.lane.b32.xlu1 %v5940_v44, %s8444_s30 }
0x4a0e   :  { %5949 = vrot.lane.b32.xlu1 %v5948_v4, %s8444_s30 }
0x4a12   :  { %5957 = vrot.lane.b32.xlu1 %v5956_v6, %s8444_s30 }
0x4a66   :  { %v5954_v24 = vpop.permute.xlu0 %5953 }
0x4a68   :  { %v5902_v9 = vpop.permute.xlu1 %5901 }
0x4a69   :  { %v5904_v23 = vsel %vm1787_vm14, %v5897_v7, %v5902_v9 }
0x4a6a   :  { %7789 = vmatmul.mubr.msk.f32.vlgmr.msra.gmra.mrb[48].mxu0 %vm260_vm10, %v5904_v23 }
0x4a6b   :  { %8130 = vmatpush3.bf16.msra.mxu0 %v9715_v49  ;;  %7799 = vmatprep.mubr.msk.f32.mxu0 %vm8440_vm11, %v8439_v27 }
0x4a6c   :  { %v5910_v53 = vpop.permute.xlu1 %5909  ;;  %8131 = vmatprep.subr.bf16.mxu0 %v8451_v52 }
0x4a6d   :  { %v5912_v10 = vsel %vm1787_vm14, %v5906_v22, %v5910_v53 }
0x4a6f   :  { %8133 = vmatpush3.bf16.msra.mxu0 %v9721_v63 }
0x4a70   :  { %v5918_v54 = vpop.permute.xlu1 %5917  ;;  %8140 = vmatprep.subr.bf16.mxu0 %v8451_v52 }
0x4a71   :  { %v5920_v12 = vsel %vm1787_vm14, %v5914_v8, %v5918_v54 }
0x4a72   :  { %7800 = vmatmul.mubr.msk.f32.vlgmr.msra.gmra.mrb[50].mxu0 %vm260_vm10, %v5912_v10  ;;  %7811 = vmatmul.mubr.msk.f32.vlgmr.msra.gmra.mrb[68].mxu1 %vm260_vm10, %v5920_v12 }
0x4a73   :  { %8142 = vmatpush3.bf16.msra.mxu0 %v9715_v49  ;;  %8148 = vmatpush3.bf16.msra.mxu1 %v9715_v49 }
0x4a74   :  { %v5926_v45 = vpop.permute.xlu1 %5925  ;;  %8143 = vmatprep.subr.bf16.mxu0 %v8451_v52  ;;  %8149 = vmatprep.subr.bf16.mxu1 %v8451_v52 }
0x4a75   :  { %7821 = vmatprep.mubr.msk.f32.mxu0 %vm8440_vm11, %v8439_v27  ;;  %7832 = vmatprep.mubr.msk.f32.mxu1 %vm8440_vm11, %v8439_v27  ;;  %v5928_v17 = vsel %vm1787_vm14, %v5922_v51, %v5926_v45 }
0x4a77   :  { %8145 = vmatpush3.bf16.msra.mxu0 %v9721_v63  ;;  %8151 = vmatpush3.bf16.msra.mxu1 %v9721_v63 }
0x4a78   :  { %v5934_v40 = vpop.permute.xlu1 %5933  ;;  %8152 = vmatprep.subr.bf16.mxu0 %v8451_v52  ;;  %8158 = vmatprep.subr.bf16.mxu1 %v8451_v52 }
0x4a79   :  { %v5936_v18 = vsel %vm1787_vm14, %v5930_v13, %v5934_v40 }
0x4a7a   :  { %7822 = vmatmul.mubr.msk.f32.vlgmr.msra.gmra.mrb[52].mxu0 %vm260_vm10, %v5928_v17  ;;  %7833 = vmatmul.mubr.msk.f32.vlgmr.msra.gmra.mrb[70].mxu1 %vm260_vm10, %v5936_v18 }
0x4a7b   :  { %8154 = vmatpush3.bf16.msra.mxu0 %v9715_v49  ;;  %8160 = vmatpush3.bf16.msra.mxu1 %v9715_v49 }
0x4a7c   :  { %v5942_v20 = vpop.permute.xlu1 %5941  ;;  %8155 = vmatprep.subr.bf16.mxu0 %v8451_v52  ;;  %8161 = vmatprep.subr.bf16.mxu1 %v8451_v52 }
0x4a7d   :  { %7843 = vmatprep.mubr.msk.f32.mxu0 %vm8440_vm11, %v8439_v27  ;;  %7854 = vmatprep.mubr.msk.f32.mxu1 %vm8440_vm11, %v8439_v27  ;;  %v5944_v5 = vsel %vm1787_vm14, %v5938_v14, %v5942_v20 }
0x4a7f   :  { %8157 = vmatpush3.bf16.msra.mxu0 %v9721_v63  ;;  %8163 = vmatpush3.bf16.msra.mxu1 %v9721_v63 }
0x4a80   :  { %v5950_v0 = vpop.permute.xlu1 %5949  ;;  %8164 = vmatprep.subr.bf16.mxu0 %v8451_v52 }
0x4a81   :  { %v5952_v36 = vsel %vm1787_vm14, %v5946_v32, %v5950_v0 }
0x4a82   :  { %7844 = vmatmul.mubr.msk.f32.vlgmr.msra.gmra.mrb[54].mxu0 %vm260_vm10, %v5944_v5  ;;  %7855 = vmatmul.mubr.msk.f32.vlgmr.msra.gmra.mrb[72].mxu1 %vm260_vm10, %v5952_v36 }
0x4a83   :  { %8166 = vmatpush3.bf16.msra.mxu0 %v9715_v49  ;;  %7865 = vmatprep.mubr.msk.f32.mxu0 %vm8440_vm11, %v8439_v27 }
0x4a84   :  { %8167 = vmatprep.subr.bf16.mxu0 %v8451_v52  ;;  %v5958_v50 = vpop.permute.xlu1 %5957 }
0x4a85   :  { %v5960_v42 = vsel %vm1787_vm14, %v5954_v24, %v5958_v50 }
0x4a87   :  { %8169 = vmatpush3.bf16.msra.mxu0 %v9721_v63 }
0x4a8a   :  { %7866 = vmatmul.mubr.msk.f32.vlgmr.msra.gmra.mrb[56].mxu0 %vm260_vm10, %v5960_v42 }
0x4b3d   :  { %v6039_v31 = vpop.f32.mrb[48].mxu0 }
0x4b3e   :  { %v7790_v46 = vpop.f32.mrb[49].mxu0  ;;  %v9800_v21 = vadd.f32 %v6940_v34, %v6039_v31 }
0x4b40   :  { %v6044_v30 = vsel %vm6043_vm0, %v9800_v21, -inf }
0x4b45   :  { %v6133_v38 = vpop.f32.mrb[50].mxu0  ;;  %v6226_v37 = vpop.f32.mrb[68].mxu1 }
0x4b46   :  { %v9798_v41 = vadd.f32 %v6940_v34, %v6133_v38  ;;  %v7801_v27 = vpop.f32.mrb[51].mxu0  ;;  %v6227_v52 = vadd.f32 %v6940_v34, %v6226_v37  ;;  %v7812_v39 = vpop.f32.mrb[69].mxu1 }
0x4b48   :  { %v6137_v47 = vsel %vm6043_vm0, %v9798_v41, -inf  ;;  %v6230_v19 = vsel %vm6043_vm0, %v6227_v52, -inf }
0x4b49   :  { %6138 = vmax.xlane.f32.xlu1 %v6137_v47  ;;  %6231 = vmax.xlane.f32.xlu0 %v6230_v19 }
0x4b4d   :  { %v6319_v15 = vpop.f32.mrb[52].mxu0  ;;  %6045 = vmax.xlane.f32.xlu0 %v6044_v30  ;;  %v6412_v56 = vpop.f32.mrb[70].mxu1 }
0x4b4e   :  { %v9807_v33 = vadd.f32 %v6940_v34, %v6319_v15  ;;  %v7823_v57 = vpop.f32.mrb[53].mxu0  ;;  %v9809_v25 = vadd.f32 %v6940_v34, %v6412_v56  ;;  %v7834_v48 = vpop.f32.mrb[71].mxu1 }
0x4b50   :  { %v6323_v43 = vsel %vm6043_vm0, %v9807_v33, -inf  ;;  %v6416_v11 = vsel %vm6043_vm0, %v9809_v25, -inf }
0x4b51   :  { %6324 = vmax.xlane.f32.xlu0 %v6323_v43  ;;  %6417 = vmax.xlane.f32.xlu1 %v6416_v11 }
0x4b55   :  { %v6505_v28 = vpop.f32.mrb[54].mxu0  ;;  %v6598_v59 = vpop.f32.mrb[72].mxu1 }
0x4b56   :  { %v9815_v55 = vadd.f32 %v6940_v34, %v6505_v28  ;;  %v7845_v35 = vpop.f32.mrb[55].mxu0  ;;  %v9817_v58 = vadd.f32 %v6940_v34, %v6598_v59  ;;  %v7856_v49 = vpop.f32.mrb[73].mxu1 }
0x4b58   :  { %v6509_v61 = vsel %vm6043_vm0, %v9815_v55, -inf  ;;  %v6602_v63 = vsel %vm6043_vm0, %v9817_v58, -inf }
0x4b59   :  { %6510 = vmax.xlane.f32.xlu0 %v6509_v61  ;;  %6603 = vmax.xlane.f32.xlu1 %v6602_v63 }
0x4b5d   :  { %v6691_v60 = vpop.f32.mrb[56].mxu0 }
0x4b5e   :  { %v9823_v26 = vadd.f32 %v6940_v34, %v6691_v60  ;;  %v7867_v62 = vpop.f32.mrb[57].mxu0 }
0x4b60   :  { %v6695_v1 = vsel %vm6043_vm0, %v9823_v26, -inf }
0x4b61   :  { %6696 = vmax.xlane.f32.xlu0 %v6695_v1 }
0x4b77   :  { %6720 = vrot.lane.b32.xlu0 %v6227_v52, %s8452_s2 }
0x4bd6   :  { %v6139_v16 = vpop.xlane.xlu1 %6138  ;;  %v6232_v2 = vpop.xlane.xlu0 %6231 }
0x4bd7   :  { %vm6140_vm6 = vcmp.eq.f32.partialorder %v9798_v41, %v6139_v16  ;;  %vm6233_vm7 = vcmp.eq.f32.partialorder %v6227_v52, %v6232_v2 }
0x4bd8   :  { %v6141_v3 = vsel %vm6140_vm6, %v8576_v29, 16  ;;  %v6234_v44 = vsel %vm6233_vm7, %v8576_v29, 16 }
0x4bd9   :  { %v6142_v4 = vsel %vm6043_vm0, %v6141_v3, 2147483647  ;;  %v6235_v6 = vsel %vm6043_vm0, %v6234_v44, 2147483647 }
0x4bda   :  { %v6144_v7 = vshra.s32 %v6142_v4, 16  ;;  %v6237_v22 = vshra.s32 %v6235_v6, 16  ;;  %v6046_v8 = vpop.xlane.xlu0 %6045  ;;  %v6143_v52 = vand.u32 65535, %v6142_v4  ;;  %v6236_v39 = vand.u32 65535, %v6235_v6 }
0x4bdb   :  { %vm6047_vm15 = vcmp.eq.f32.partialorder %v9800_v21, %v6046_v8 }
0x4bdc   :  { %v6146_v9 = vcvt.s32.f32 %v6144_v7  ;;  %v6239_v23 = vcvt.s32.f32 %v6237_v22  ;;  %v6145_v15 = vcvt.s32.f32 %v6143_v52  ;;  %v6238_v56 = vcvt.s32.f32 %v6236_v39 }
0x4bdd   :  { %v6048_v43 = vsel %vm6047_vm15, %v8576_v29, 16  ;;  %vm6758_vm15 = vcmask 23552  }
0x4bde   :  { %6147 = vmin.xlane.f32.xlu0 %v6146_v9  ;;  %v6325_v53 = vpop.xlane.xlu0 %6324  ;;  %v6418_v51 = vpop.xlane.xlu1 %6417  ;;  %6240 = vmin.xlane.f32.xlu1 %v6239_v23  ;;  %v6049_v59 = vsel %vm6043_vm0, %v6048_v43, 2147483647 }
0x4bdf   :  { %vm6326_vm8 = vcmp.eq.f32.partialorder %v9807_v33, %v6325_v53  ;;  %vm6419_vm9 = vcmp.eq.f32.partialorder %v9809_v25, %v6418_v51  ;;  %v6051_v63 = vshra.s32 %v6049_v59, 16 }
0x4be0   :  { %v6327_v54 = vsel %vm6326_vm8, %v8576_v29, 16  ;;  %v6420_v10 = vsel %vm6419_vm9, %v8576_v29, 16 }
0x4be1   :  { %v6328_v12 = vsel %vm6043_vm0, %v6327_v54, 2147483647  ;;  %v6421_v13 = vsel %vm6043_vm0, %v6420_v10, 2147483647  ;;  %v6053_v16 = vcvt.s32.f32 %v6051_v63 }
0x4be2   :  { %v6330_v45 = vshra.s32 %v6328_v12, 16  ;;  %v6423_v40 = vshra.s32 %v6421_v13, 16  ;;  %v6329_v11 = vand.u32 65535, %v6328_v12  ;;  %v6422_v28 = vand.u32 65535, %v6421_v13 }
0x4be4   :  { %v6332_v17 = vcvt.s32.f32 %v6330_v45  ;;  %v6425_v18 = vcvt.s32.f32 %v6423_v40  ;;  %v6331_v49 = vcvt.s32.f32 %v6329_v11  ;;  %v6424_v61 = vcvt.s32.f32 %v6422_v28 }
0x4be5   :  { %v6050_v45 = vand.u32 65535, %v6049_v59 }
0x4be6   :  { %v6511_v14 = vpop.xlane.xlu0 %6510  ;;  %6333 = vmin.xlane.f32.xlu0 %v6332_v17  ;;  %6426 = vmin.xlane.f32.xlu1 %v6425_v18  ;;  %v6604_v20 = vpop.xlane.xlu1 %6603 }
0x4be7   :  { %vm6512_vm11 = vcmp.eq.f32.partialorder %v9815_v55, %v6511_v14  ;;  %vm6605_vm12 = vcmp.eq.f32.partialorder %v9817_v58, %v6604_v20 }
0x4be8   :  { %v6513_v32 = vsel %vm6512_vm11, %v8576_v29, 16  ;;  %v6606_v0 = vsel %vm6605_vm12, %v8576_v29, 16  ;;  %vm6754_vm11 = vcmask 7168   ;;  %vm6756_vm12 = vcmask 15360  }
0x4be9   :  { %v6514_v5 = vsel %vm6043_vm0, %v6513_v32, 2147483647  ;;  %v6607_v36 = vsel %vm6043_vm0, %v6606_v0, 2147483647 }
0x4bea   :  { %v6516_v50 = vshra.s32 %v6514_v5, 16  ;;  %v6609_v24 = vshra.s32 %v6607_v36, 16  ;;  %v6608_v1 = vand.u32 65535, %v6607_v36 }
0x4bec   :  { %v6518_v42 = vcvt.s32.f32 %v6516_v50  ;;  %v6611_v31 = vcvt.s32.f32 %v6609_v24  ;;  %v6610_v4 = vcvt.s32.f32 %v6608_v1 }
0x4bee   :  { %6519 = vmin.xlane.f32.xlu0 %v6518_v42  ;;  %v6697_v46 = vpop.xlane.xlu0 %6696  ;;  %6612 = vmin.xlane.f32.xlu1 %v6611_v31 }
0x4bef   :  { %vm6698_vm13 = vcmp.eq.f32.partialorder %v9823_v26, %v6697_v46 }
0x4bf0   :  { %v6699_v34 = vsel %vm6698_vm13, %v8576_v29, 16  ;;  %v6515_v29 = vand.u32 65535, %v6514_v5  ;;  %vm6749_vm13 = vcmask 785408  }
0x4bf1   :  { %v6700_v38 = vsel %vm6043_vm0, %v6699_v34, 2147483647 }
0x4bf2   :  { %v6702_v37 = vshra.s32 %v6700_v38, 16  ;;  %v9850_v47 = vpop.permute.xlu0 %6720  ;;  %v6517_v44 = vcvt.s32.f32 %v6515_v29  ;;  %v6701_v22 = vand.u32 65535, %v6700_v38 }
0x4bf4   :  { %v6704_v27 = vcvt.s32.f32 %v6702_v37 }
0x4bf6   :  { %6705 = vmin.xlane.f32.xlu0 %v6704_v27 }
0x4c0c   :  { %6732 = vrot.lane.b32.xlu0 %v9815_v55, %s8453_s12 }
0x4c6b   :  { %v9853_v19 = vpop.xlane.xlu0 %6147  ;;  %v6241_v30 = vpop.xlane.xlu1 %6240 }
0x4c6c   :  { %vm6149_vm2 = vcmp.eq.f32.partialorder %v6146_v9, %v9853_v19  ;;  %vm6242_vm3 = vcmp.eq.f32.partialorder %v6239_v23, %v6241_v30  ;;  %v6703_v9 = vcvt.s32.f32 %v6701_v22  ;;  %v6247_v53 = vcvt.f32.s32 %v6241_v30 }
0x4c6d   :  { %v6150_v57 = vsel %vm6149_vm2, %v6145_v15, inf  ;;  %v6243_v48 = vsel %vm6242_vm3, %v6238_v56, inf  ;;  %v6154_v50 = vcvt.f32.s32 %v9853_v19  ;;  %vm6764_vm2 = vcmask 48128  }
0x4c6e   :  { %6151 = vmin.xlane.f32.xlu0 %v6150_v57  ;;  %6244 = vmin.xlane.f32.xlu1 %v6243_v48  ;;  %v6248_v54 = vshll.u32 %v6247_v53, 16  ;;  %vm6766_vm3 = vcmask 56320  }
0x4c6f   :  { %v6155_v37 = vshll.u32 %v6154_v50, 16 }
0x4c73   :  { %v9858_v55 = vpop.xlane.xlu0 %6333  ;;  %v6427_v35 = vpop.xlane.xlu1 %6426 }
0x4c74   :  { %vm6335_vm5 = vcmp.eq.f32.partialorder %v6332_v17, %v9858_v55  ;;  %vm6428_vm6 = vcmp.eq.f32.partialorder %v6425_v18, %v6427_v35  ;;  %v6433_v13 = vcvt.f32.s32 %v6427_v35  ;;  %v6340_v24 = vcvt.f32.s32 %v9858_v55 }
0x4c75   :  { %v6336_v60 = vsel %vm6335_vm5, %v6331_v49, inf  ;;  %v6429_v62 = vsel %vm6428_vm6, %v6424_v61, inf  ;;  %vm6768_vm5 = vcmask 58368  }
0x4c76   :  { %6337 = vmin.xlane.f32.xlu0 %v6336_v60  ;;  %6430 = vmin.xlane.f32.xlu1 %v6429_v62  ;;  %v6434_v17 = vshll.u32 %v6433_v13, 16 }
0x4c7a   :  { %6054 = vmin.xlane.f32.xlu1 %v6053_v16 }
0x4c7b   :  { %v6520_v2 = vpop.xlane.xlu0 %6519  ;;  %v9861_v3 = vpop.xlane.xlu1 %6612 }
0x4c7c   :  { %vm6521_vm0 = vcmp.eq.f32.partialorder %v6518_v42, %v6520_v2  ;;  %vm6614_vm7 = vcmp.eq.f32.partialorder %v6611_v31, %v9861_v3  ;;  %v6526_v31 = vcvt.f32.s32 %v6520_v2  ;;  %v6619_v15 = vcvt.f32.s32 %v9861_v3 }
0x4c7d   :  { %v6522_v6 = vsel %vm6521_vm0, %v6517_v44, inf  ;;  %v6615_v7 = vsel %vm6614_vm7, %v6610_v4, inf }
0x4c7e   :  { %6523 = vmin.xlane.f32.xlu0 %v6522_v6  ;;  %6616 = vmin.xlane.f32.xlu1 %v6615_v7  ;;  %v6527_v30 = vshll.u32 %v6526_v31, 16  ;;  %v6620_v1 = vshll.u32 %v6619_v15, 16 }
0x4c83   :  { %v9864_v8 = vpop.xlane.xlu0 %6705 }
0x4c84   :  { %vm6707_vm8 = vcmp.eq.f32.partialorder %v6704_v27, %v9864_v8  ;;  %v6341_v27 = vshll.u32 %v6340_v24, 16  ;;  %v6712_v11 = vcvt.f32.s32 %v9864_v8 }
0x4c85   :  { %v6708_v23 = vsel %vm6707_vm8, %v6703_v9, inf }
0x4c86   :  { %6709 = vmin.xlane.f32.xlu0 %v6708_v23  ;;  %v6713_v3 = vshll.u32 %v6712_v11, 16 }
0x4c8f   :  { %6716 = vrot.lane.b32.xlu1 %v9798_v41, %s8449_s21 }
0x4c93   :  { %6724 = vrot.lane.b32.xlu1 %v9807_v33, %s8454_s9  ;;  %v6052_v33 = vcvt.s32.f32 %v6050_v45 }
0x4c97   :  { %6728 = vrot.lane.b32.xlu1 %v9809_v25, %s8447_s0  ;;  %s8455_s0 = smov [#allocation2]  }
0x4c98   :  { %s6778_s21 = sshll.u32 %s8455_s0, 4  ;;  %s6779_s21 = int_to_ptr.vmem [resolvable:$true] %s6778_s21 }
0x4c99   :  { %s8413_s2 = scalar_lea.vmem %s6779_s21, 32  ;;  %p8418_p1 = scmp.lt.s32.totalorder %s6779_s21, %s6779_s21 }
0x4c9a   :  { %p8414_p0 = scmp.ne.s32.totalorder %s6779_s21, %s8413_s2  ;;  %p8419_p2 = scmp.lt.s32.totalorder %s8413_s2, %s8413_s2 }
0x4c9c   :  { %6740 = vrot.lane.b32.xlu0 %v9823_v26, %s8443_s29  ;;  %v6733_v26 = vpop.permute.xlu0 %6732  ;;  %p8420_p3 = por %p8419_p2, %p8418_p1 }
0x4c9e   :  { %p8421_p4 = pnand %p8420_p3, %p8414_p0 }
0x4cfb   :  { %v6245_v51 = vpop.xlane.xlu1 %6244  ;;  %v6152_v0 = vpop.xlane.xlu0 %6151 }
0x4cfc   :  { %v6246_v10 = vcvt.f32.s32 %v6245_v51 }
0x4cfe   :  { %v6249_v12 = vadd.s32 %v6248_v54, %v6246_v10 }
0x4d03   :  { %v6431_v40 = vpop.xlane.xlu1 %6430  ;;  %v6338_v36 = vpop.xlane.xlu0 %6337 }
0x4d04   :  { %v6432_v18 = vcvt.f32.s32 %v6431_v40  ;;  %v6339_v19 = vcvt.f32.s32 %v6338_v36 }
0x4d06   :  { %v9874_v41 = vadd.s32 %v6434_v17, %v6432_v18  ;;  %v6342_v55 = vadd.s32 %v6341_v27, %v6339_v19 }
0x4d07   :  { %v6055_v14 = vpop.xlane.xlu1 %6054 }
0x4d08   :  { %vm6056_vm9 = vcmp.eq.f32.partialorder %v6053_v16, %v6055_v14  ;;  %v6061_v38 = vcvt.f32.s32 %v6055_v14 }
0x4d09   :  { %v6057_v20 = vsel %vm6056_vm9, %v6052_v33, inf }
0x4d0a   :  { %6058 = vmin.xlane.f32.xlu1 %v6057_v20  ;;  %v6062_v48 = vshll.u32 %v6061_v38, 16 }
0x4d0b   :  { %v6617_v25 = vpop.xlane.xlu1 %6616  ;;  %v6524_v42 = vpop.xlane.xlu0 %6523 }
0x4d0c   :  { %v6525_v59 = vcvt.f32.s32 %v6524_v42  ;;  %v6618_v35 = vcvt.f32.s32 %v6617_v25 }
0x4d0e   :  { %v6528_v44 = vadd.s32 %v6527_v30, %v6525_v59  ;;  %v6621_v6 = vadd.s32 %v6620_v1, %v6618_v35 }
0x4d0f   :  { %v6717_v32 = vpop.permute.xlu1 %6716 }
0x4d10   :  { %v6743_v46 = vsel %vm1787_vm14, %v9800_v21, %v6717_v32  ;;  %vm6747_vm14 = vcmask 654336  }
0x4d11   :  { %v6744_v39 = vsel %vm260_vm10, %v6743_v46, %v9850_v47  ;;  %vm6751_vm10 = vcmask 916480  }
0x4d13   :  { %v6725_v5 = vpop.permute.xlu1 %6724  ;;  %v6710_v52 = vpop.xlane.xlu0 %6709 }
0x4d14   :  { %v6745_v56 = vsel %vm4035_vm4, %v6744_v39, %v6725_v5  ;;  %v6711_v63 = vcvt.f32.s32 %v6710_v52  ;;  %vm6762_vm4 = vcmask 39936  }
0x4d16   :  { %v6714_v22 = vadd.s32 %v6713_v3, %v6711_v63 }
0x4d17   :  { %v6729_v34 = vpop.permute.xlu1 %6728  ;;  %v6741_v60 = vpop.permute.xlu0 %6740 }
0x4d18   :  { %v6746_v43 = vsel %vm2041_vm1, %v6745_v56, %v6729_v34  ;;  %vm6760_vm1 = vcmask 31744  }
0x4d19   :  { %v6748_v49 = vsel %vm6747_vm14, %v6746_v43, %v6733_v26 }
0x4d1b   :  { %6736 = vrot.lane.b32.xlu1 %v9817_v58, %s8444_s30  ;;  %v6153_v58 = vcvt.f32.s32 %v6152_v0 }
0x4d1d   :  { %v6156_v28 = vadd.s32 %v6155_v37, %v6153_v58 }
0x4d97   :  { %v6059_v57 = vpop.xlane.xlu1 %6058 }
0x4d98   :  { %v6060_v21 = vcvt.f32.s32 %v6059_v57 }
0x4d9a   :  { %v6063_v47 = vadd.s32 %v6062_v48, %v6060_v21 }
0x4d9b   :  { %v6737_v61 = vpop.permute.xlu1 %6736 }
0x4d9c   :  { %v6755_v62 = vsel %vm6754_vm11, %v6063_v47, %v6156_v28  ;;  %v6750_v29 = vsel %vm6749_vm13, %v6748_v49, %v6737_v61 }
0x4d9d   :  { %v6757_v16 = vsel %vm6756_vm12, %v6755_v62, %v6249_v12  ;;  %v6752_v2 = vsel %vm6751_vm10, %v6750_v29, %v6741_v60 }
0x4d9e   :  { %v6759_v4 = vsel %vm6758_vm15, %v6757_v16, %v6342_v55  ;;  %6753 = vst [vmem:[%s9915_s10] sm:$0x3] %v6752_v2 }
0x4d9f   :  { %v6761_v7 = vsel %vm6760_vm1, %v6759_v4, %v9874_v41 }
0x4da0   :  { %v6763_v8 = vsel %vm6762_vm4, %v6761_v7, %v6528_v44 }
0x4da1   :  { %v6765_v9 = vsel %vm6764_vm2, %v6763_v8, %v6621_v6 }
0x4da2   :  { %v6767_v23 = vsel %vm6766_vm3, %v6765_v9, %v6714_v22 }
0x4da3   :  { %6769 = vst.msk [vmem:[#allocation2] sm:$0x3] %vm6768_vm5, %v6767_v23 }
0x4da4   :  { %8424 = shalt.err (!%p8421_p4)
}
0x4da5   :  { %s8425_s20 = scalar_lea.hbm %s9916_s11, 32 }
0x4da6   :  { %p8426_p5 = scmp.ne.s32.totalorder %s9916_s11, %s8425_s20  ;;  %p8429_p6 = scmp.lt.u32.totalorder %s8425_s20, %s9916_s11 }
0x4da8   :  { %p8431_p7 = pnand %p8429_p6, %p8426_p5 }
0x4daa   :  { %8434 = shalt.err (!%p8431_p7)
}
0x4dab   :  { %6781 = dma.vmem_to_hbm [thread:$0]  %s6779_s21, 32, %s9916_s11, [#allocation3]  }
0x4dac   :  { %8435 = dma.done.wait [#allocation3], 32  }
0x4dad   :  { %8436 = vsyncadd [#allocation3], 4294967264 }
0x4dae   :  { %6787 = vsyncpa [#allocation3], 1 }

</bundles_post_ra>
